<compile_context>
chip_gen: v7x
topology: tpu7x:2x2x1
jax: 0.10.0
libtpu: 0.0.40
codegen_flags: <defaults>
</compile_context>

<pallas_src>
import jax
import jax.numpy as jnp
import numpy as np
from jax import lax
from jax.experimental import pallas as pl
from jax.experimental.pallas import tpu as pltpu


# ---------------------------------------------------------------------------
# Kernel
# ---------------------------------------------------------------------------
def _decoder_model_kernel(
        ctcr_ref, ocp_ref, oprof_ref, sim_ref,
        eps_tp_ref, eps_g_ref, eps_g1_ref, u_ref,
        w1_ref, b1_ref, wm_ref, bm_ref, ws_ref, bs_ref,
        wd1_ref, bd1_ref, g1_ref, be1_ref,
        wd2_ref, bd2_ref, g2_ref, be2_ref,
        wmu_ref, bmu_ref, wlv_ref, blv_ref,
        wpi_ref, bpi_ref, wsg_ref, bsg_ref,
        lp_ref, ld_ref, kl_ref):

    f32 = jnp.float32

    def dot(a, b):
        return jnp.dot(a, b, preferred_element_type=f32)

    def lrelu(v):                       # LeakyReLU(0.2)
        return jnp.where(v >= 0.0, v, 0.2 * v)

    def bnorm(v, g, b):                 # BatchNorm1d, train-mode batch stats, eps=1e-5
        m = jnp.mean(v, axis=0, keepdims=True)
        var = jnp.mean((v - m) ** 2, axis=0, keepdims=True)
        return (v - m) * lax.rsqrt(var + 1e-5) * g + b

    # ---------------- TCR2profile -------------------------------------------
    x = ctcr_ref[...]                                            # (B, Dtcr)
    h = jnp.maximum(dot(x, w1_ref[...]) + b1_ref[...], 0.0)      # ReLU
    mu = dot(h, wm_ref[...]) + bm_ref[...]
    lv = dot(h, ws_ref[...]) + bs_ref[...]
    cp = mu + eps_tp_ref[...] * jnp.exp(0.5 * lv)                # reparam sample (B, Dprof)

    B = x.shape[0]
    kl_rows = jnp.sum(1.0 + lv - mu * mu - jnp.exp(lv), axis=-1, keepdims=True)   # (B,1)
    kl_ref[...] = jnp.sum(-0.001 * kl_rows, axis=0, keepdims=True) / float(B)     # (1,1)

    # ---------------- Decoder_profile_GaussianMixture -----------------------
    d1 = bnorm(lrelu(dot(cp, wd1_ref[...]) + bd1_ref[...]), g1_ref[...], be1_ref[...])
    d2 = bnorm(lrelu(dot(d1, wd2_ref[...]) + bd2_ref[...]), g2_ref[...], be2_ref[...])

    mu1 = jnp.exp(dot(d2, wmu_ref[...]) + bmu_ref[...])
    lv1 = dot(d2, wlv_ref[...]) + blv_ref[...]
    pi_lin = dot(d2, wpi_ref[...]) + bpi_ref[...]
    pi = 1.0 / (1.0 + jnp.exp(-pi_lin))                          # Sigmoid
    sg = dot(d2, wsg_ref[...]) + bsg_ref[...]

    gs = eps_g_ref[...] * jnp.exp(0.5 * sg)                      # 0 + eps * exp(0.5*sigma)
    gs1 = mu1 + eps_g1_ref[...] * jnp.exp(0.5 * lv1)
    mix = (u_ref[...] < pi).astype(f32)                          # Bernoulli(pi) sample
    decomp = gs * mix + gs1 * (1.0 - mix)                        # (B, Dout)

    # ---------------- Huber loss (delta=1, mean) -----------------------------
    diff = decomp - oprof_ref[...]
    ad = jnp.abs(diff)
    hub = jnp.where(ad < 1.0, 0.5 * diff * diff, ad - 0.5)
    hub_rows = jnp.sum(hub, axis=-1, keepdims=True)              # (B,1)
    n_el = hub.shape[0] * hub.shape[1]
    ld_ref[...] = jnp.sum(hub_rows, axis=0, keepdims=True) / float(n_el)

    # ---------------- Contrastive prior loss ---------------------------------
    # F.normalize(cp): L2 along dim 1, eps=1e-12
    norm = jnp.sqrt(jnp.sum(cp * cp, axis=-1, keepdims=True))
    cpn = cp / jnp.maximum(norm, 1e-12)
    ocp = ocp_ref[...]

    # contract last dims of both operands -> no in-kernel transposes
    dn = (((1,), (1,)), ((), ()))
    c2o = lax.dot_general(cpn, ocp, dn, preferred_element_type=f32) * 5.0   # / 0.2
    o2c = lax.dot_general(ocp, cpn, dn, preferred_element_type=f32) * 5.0

    sim = sim_ref[...]                                           # (B, B), precomputed

    def xent(scores):
        s = scores - jnp.max(scores, axis=-1, keepdims=True)
        ls = s - jnp.log(jnp.sum(jnp.exp(s), axis=-1, keepdims=True))       # log_softmax
        row = -jnp.sum(ls * sim, axis=-1, keepdims=True)                    # (B,1)
        return jnp.sum(row, axis=0, keepdims=True) / float(B)               # (1,1)

    lp_ref[...] = 0.5 * (xent(c2o) + xent(o2c))


# ---------------------------------------------------------------------------
# Wrapper
# ---------------------------------------------------------------------------
def decoder_model_forward(original_compressed_profile, original_profile,
                          compressed_TCR, idx_TCR,
                          eps_tp, eps_g, eps_g1, u_bern, params):
    # sim_targets (torch.no_grad block) — tiny, computed host-side once.
    idx = idx_TCR.reshape(-1, 1)
    sim = (idx == idx.T).astype(jnp.float32)
    sim = sim / jnp.sum(sim, axis=1, keepdims=True)

    def r2(v):
        return v.reshape(1, -1).astype(jnp.float32)

    # Pre-transposed weights ((in, out)) so the kernel feeds the MXU directly.
    args = [
        compressed_TCR, original_compressed_profile, original_profile, sim,
        eps_tp, eps_g, eps_g1, u_bern,
        params["w1"].T, r2(params["b1"]),
        params["wm"].T, r2(params["bm"]),
        params["ws"].T, r2(params["bs"]),
        params["wd1"].T, r2(params["bd1"]),
        r2(params["g1"]), r2(params["be1"]),
        params["wd2"].T, r2(params["bd2"]),
        r2(params["g2"]), r2(params["be2"]),
        params["wmu"].T, r2(params["bmu"]),
        params["wlv"].T, r2(params["blv"]),
        params["wpi"].T, r2(params["bpi"]),
        params["wsg"].T, r2(params["bsg"]),
    ]

    def full_spec(shape):
        nd = len(shape)
        return pl.BlockSpec(shape, lambda i, _nd=nd: (0,) * _nd)

    in_specs = [full_spec(a.shape) for a in args]
    out_shape = tuple(jax.ShapeDtypeStruct((1, 1), jnp.float32) for _ in range(3))
    out_specs = tuple(pl.BlockSpec((1, 1), lambda i: (0, 0)) for _ in range(3))

    lp, ld, kl = pl.pallas_call(
        _decoder_model_kernel,
        out_shape=out_shape,
        grid_spec=pltpu.PrefetchScalarGridSpec(
            num_scalar_prefetch=0,
            grid=(1,),                      # whole (batch-fused) problem in one step
            in_specs=in_specs,
            out_specs=out_specs,
        ),
        compiler_params=pltpu.CompilerParams(
            dimension_semantics=("arbitrary",)),
    )(*args)
    return lp[0, 0], ld[0, 0], kl[0, 0]


# ---------------------------------------------------------------------------
# Pure-JAX reference (mirrors the PyTorch module with the same noise arrays)
# ---------------------------------------------------------------------------
def reference(ctcr, ocp, oprof, idx, eps_tp, eps_g, eps_g1, u, p):
    h = jnp.maximum(ctcr @ p["w1"].T + p["b1"], 0.0)
    mu = h @ p["wm"].T + p["bm"]
    lv = h @ p["ws"].T + p["bs"]
    cp = mu + eps_tp * jnp.exp(0.5 * lv)
    kl = jnp.mean(-0.001 * jnp.sum(1.0 + lv - mu ** 2 - jnp.exp(lv), axis=1))

    def bn(x, g, b):
        m = x.mean(0)
        v = ((x - m) ** 2).mean(0)
        return (x - m) / jnp.sqrt(v + 1e-5) * g + b

    def lrelu(x):
        return jnp.where(x >= 0, x, 0.2 * x)

    d1 = bn(lrelu(cp @ p["wd1"].T + p["bd1"]), p["g1"], p["be1"])
    d2 = bn(lrelu(d1 @ p["wd2"].T + p["bd2"]), p["g2"], p["be2"])
    mu1 = jnp.exp(d2 @ p["wmu"].T + p["bmu"])
    lv1 = d2 @ p["wlv"].T + p["blv"]
    pi = 1.0 / (1.0 + jnp.exp(-(d2 @ p["wpi"].T + p["bpi"])))
    sg = d2 @ p["wsg"].T + p["bsg"]
    gs = eps_g * jnp.exp(0.5 * sg)
    gs1 = mu1 + eps_g1 * jnp.exp(0.5 * lv1)
    mix = (u < pi).astype(jnp.float32)
    decomp = gs * mix + gs1 * (1.0 - mix)

    cpn = cp / jnp.maximum(jnp.sqrt(jnp.sum(cp * cp, axis=1, keepdims=True)), 1e-12)
    c2o = cpn @ ocp.T / 0.2
    o2c = ocp @ cpn.T / 0.2
    idx = idx.reshape(-1, 1)
    sim = (idx == idx.T).astype(jnp.float32)
    sim = sim / sim.sum(1, keepdims=True)

    def logsm(x):
        x = x - x.max(1, keepdims=True)
        return x - jnp.log(jnp.sum(jnp.exp(x), axis=1, keepdims=True))

    loss_c2o = -jnp.sum(logsm(c2o) * sim, axis=1).mean()
    loss_o2c = -jnp.sum(logsm(o2c) * sim, axis=1).mean()
    loss_prior = (loss_c2o + loss_o2c) / 2

    d = decomp - oprof
    ad = jnp.abs(d)
    loss_de = jnp.mean(jnp.where(ad < 1.0, 0.5 * d * d, ad - 0.5))
    return loss_prior, loss_de, kl


# ---------------------------------------------------------------------------
# Main
# ---------------------------------------------------------------------------
if __name__ == "__main__":
    B = 8
    d_tcr, d_prof = 128, 128           # compressed_TCR_dim, compressed_profile_dim (=decoder in_dim)
    hid1, hid2, d_out = 256, 256, 512  # decoder hid_dim, hid_dim2, out_dim (scaled-down defaults)

    key = jax.random.PRNGKey(0)
    ks = jax.random.split(key, 32)

    def w(k, shape, scale=0.05):
        return (scale * jax.random.normal(k, shape)).astype(jnp.float32)

    params = {
        # TCR2profile: layer1, nn_mean, nn_std
        "w1": w(ks[0], (d_prof, d_tcr)), "b1": w(ks[1], (d_prof,)),
        "wm": w(ks[2], (d_prof, d_prof)), "bm": w(ks[3], (d_prof,)),
        "ws": w(ks[4], (d_prof, d_prof)), "bs": w(ks[5], (d_prof,)),
        # Decoder_profile_GaussianMixture: layer1 + BN1, layer2 + BN2, four heads
        "wd1": w(ks[6], (hid1, d_prof)), "bd1": w(ks[7], (hid1,)),
        "g1": (1.0 + 0.1 * jax.random.normal(ks[8], (hid1,))).astype(jnp.float32),
        "be1": w(ks[9], (hid1,), 0.1),
        "wd2": w(ks[10], (hid2, hid1)), "bd2": w(ks[11], (hid2,)),
        "g2": (1.0 + 0.1 * jax.random.normal(ks[12], (hid2,))).astype(jnp.float32),
        "be2": w(ks[13], (hid2,), 0.1),
        "wmu": w(ks[14], (d_out, hid2)), "bmu": w(ks[15], (d_out,)),
        "wlv": w(ks[16], (d_out, hid2)), "blv": w(ks[17], (d_out,)),
        "wpi": w(ks[18], (d_out, hid2)), "bpi": w(ks[19], (d_out,)),
        "wsg": w(ks[20], (d_out, hid2)), "bsg": w(ks[21], (d_out,)),
    }

    compressed_TCR = jax.random.normal(ks[22], (B, d_tcr), dtype=jnp.float32)
    original_compressed_profile = jax.random.normal(ks[23], (B, d_prof), dtype=jnp.float32)
    original_profile = jax.random.normal(ks[24], (B, d_out), dtype=jnp.float32)
    idx_TCR = jnp.array([0, 1, 0, 2, 1, 3, 2, 0], dtype=jnp.int32)

    # Sampling noise (torch.randn_like / Bernoulli uniform) drawn host-side.
    eps_tp = jax.random.normal(ks[25], (B, d_prof), dtype=jnp.float32)
    eps_g = jax.random.normal(ks[26], (B, d_out), dtype=jnp.float32)
    eps_g1 = jax.random.normal(ks[27], (B, d_out), dtype=jnp.float32)
    u_bern = jax.random.uniform(ks[28], (B, d_out), dtype=jnp.float32)

    lp, ld, kl = decoder_model_forward(
        original_compressed_profile, original_profile, compressed_TCR, idx_TCR,
        eps_tp, eps_g, eps_g1, u_bern, params)
    lp, ld, kl = jax.block_until_ready((lp, ld, kl))

    rlp, rld, rkl = reference(
        compressed_TCR, original_compressed_profile, original_profile, idx_TCR,
        eps_tp, eps_g, eps_g1, u_bern, params)

    np.testing.assert_allclose(np.asarray(lp), np.asarray(rlp), rtol=5e-4, atol=5e-4)
    np.testing.assert_allclose(np.asarray(ld), np.asarray(rld), rtol=5e-4, atol=5e-4)
    np.testing.assert_allclose(np.asarray(kl), np.asarray(rkl), rtol=5e-4, atol=5e-4)

    print("KERNEL_OK")
</pallas_src>

<mosaic_0001>
module attributes {stable_mosaic.version = 11 : i64} {
  func.func @_decoder_model_kernel(%arg0: i32, %arg1: memref<8x128xf32, #tpu.memory_space<vmem>>, %arg2: memref<8x128xf32, #tpu.memory_space<vmem>>, %arg3: memref<8x512xf32, #tpu.memory_space<vmem>>, %arg4: memref<8x8xf32, #tpu.memory_space<vmem>>, %arg5: memref<8x128xf32, #tpu.memory_space<vmem>>, %arg6: memref<8x512xf32, #tpu.memory_space<vmem>>, %arg7: memref<8x512xf32, #tpu.memory_space<vmem>>, %arg8: memref<8x512xf32, #tpu.memory_space<vmem>>, %arg9: memref<128x128xf32, #tpu.memory_space<vmem>>, %arg10: memref<1x128xf32, #tpu.memory_space<vmem>>, %arg11: memref<128x128xf32, #tpu.memory_space<vmem>>, %arg12: memref<1x128xf32, #tpu.memory_space<vmem>>, %arg13: memref<128x128xf32, #tpu.memory_space<vmem>>, %arg14: memref<1x128xf32, #tpu.memory_space<vmem>>, %arg15: memref<128x256xf32, #tpu.memory_space<vmem>>, %arg16: memref<1x256xf32, #tpu.memory_space<vmem>>, %arg17: memref<1x256xf32, #tpu.memory_space<vmem>>, %arg18: memref<1x256xf32, #tpu.memory_space<vmem>>, %arg19: memref<256x256xf32, #tpu.memory_space<vmem>>, %arg20: memref<1x256xf32, #tpu.memory_space<vmem>>, %arg21: memref<1x256xf32, #tpu.memory_space<vmem>>, %arg22: memref<1x256xf32, #tpu.memory_space<vmem>>, %arg23: memref<256x512xf32, #tpu.memory_space<vmem>>, %arg24: memref<1x512xf32, #tpu.memory_space<vmem>>, %arg25: memref<256x512xf32, #tpu.memory_space<vmem>>, %arg26: memref<1x512xf32, #tpu.memory_space<vmem>>, %arg27: memref<256x512xf32, #tpu.memory_space<vmem>>, %arg28: memref<1x512xf32, #tpu.memory_space<vmem>>, %arg29: memref<256x512xf32, #tpu.memory_space<vmem>>, %arg30: memref<1x512xf32, #tpu.memory_space<vmem>>, %arg31: memref<1x1xf32, #tpu.memory_space<vmem>>, %arg32: memref<1x1xf32, #tpu.memory_space<vmem>>, %arg33: memref<1x1xf32, #tpu.memory_space<vmem>>) attributes {dimension_semantics = [#tpu.dimension_semantics<arbitrary>], iteration_bounds = array<i64: 1>, scalar_prefetch = 0 : i64, scratch_operands = 0 : i64, tpu.core_type = #tpu.core_type<tc>, window_params = [{pipeline_mode = #tpu.pipeline_mode<synchronous>, transform_indices = @transform_0, window_bounds = array<i64: 8, 128>}, {pipeline_mode = #tpu.pipeline_mode<synchronous>, transform_indices = @transform_1, window_bounds = array<i64: 8, 128>}, {pipeline_mode = #tpu.pipeline_mode<synchronous>, transform_indices = @transform_2, window_bounds = array<i64: 8, 512>}, {pipeline_mode = #tpu.pipeline_mode<synchronous>, transform_indices = @transform_3, window_bounds = array<i64: 8, 8>}, {pipeline_mode = #tpu.pipeline_mode<synchronous>, transform_indices = @transform_4, window_bounds = array<i64: 8, 128>}, {pipeline_mode = #tpu.pipeline_mode<synchronous>, transform_indices = @transform_5, window_bounds = array<i64: 8, 512>}, {pipeline_mode = #tpu.pipeline_mode<synchronous>, transform_indices = @transform_6, window_bounds = array<i64: 8, 512>}, {pipeline_mode = #tpu.pipeline_mode<synchronous>, transform_indices = @transform_7, window_bounds = array<i64: 8, 512>}, {pipeline_mode = #tpu.pipeline_mode<synchronous>, transform_indices = @transform_8, window_bounds = array<i64: 128, 128>}, {pipeline_mode = #tpu.pipeline_mode<synchronous>, transform_indices = @transform_9, window_bounds = array<i64: 1, 128>}, {pipeline_mode = #tpu.pipeline_mode<synchronous>, transform_indices = @transform_10, window_bounds = array<i64: 128, 128>}, {pipeline_mode = #tpu.pipeline_mode<synchronous>, transform_indices = @transform_11, window_bounds = array<i64: 1, 128>}, {pipeline_mode = #tpu.pipeline_mode<synchronous>, transform_indices = @transform_12, window_bounds = array<i64: 128, 128>}, {pipeline_mode = #tpu.pipeline_mode<synchronous>, transform_indices = @transform_13, window_bounds = array<i64: 1, 128>}, {pipeline_mode = #tpu.pipeline_mode<synchronous>, transform_indices = @transform_14, window_bounds = array<i64: 128, 256>}, {pipeline_mode = #tpu.pipeline_mode<synchronous>, transform_indices = @transform_15, window_bounds = array<i64: 1, 256>}, {pipeline_mode = #tpu.pipeline_mode<synchronous>, transform_indices = @transform_16, window_bounds = array<i64: 1, 256>}, {pipeline_mode = #tpu.pipeline_mode<synchronous>, transform_indices = @transform_17, window_bounds = array<i64: 1, 256>}, {pipeline_mode = #tpu.pipeline_mode<synchronous>, transform_indices = @transform_18, window_bounds = array<i64: 256, 256>}, {pipeline_mode = #tpu.pipeline_mode<synchronous>, transform_indices = @transform_19, window_bounds = array<i64: 1, 256>}, {pipeline_mode = #tpu.pipeline_mode<synchronous>, transform_indices = @transform_20, window_bounds = array<i64: 1, 256>}, {pipeline_mode = #tpu.pipeline_mode<synchronous>, transform_indices = @transform_21, window_bounds = array<i64: 1, 256>}, {pipeline_mode = #tpu.pipeline_mode<synchronous>, transform_indices = @transform_22, window_bounds = array<i64: 256, 512>}, {pipeline_mode = #tpu.pipeline_mode<synchronous>, transform_indices = @transform_23, window_bounds = array<i64: 1, 512>}, {pipeline_mode = #tpu.pipeline_mode<synchronous>, transform_indices = @transform_24, window_bounds = array<i64: 256, 512>}, {pipeline_mode = #tpu.pipeline_mode<synchronous>, transform_indices = @transform_25, window_bounds = array<i64: 1, 512>}, {pipeline_mode = #tpu.pipeline_mode<synchronous>, transform_indices = @transform_26, window_bounds = array<i64: 256, 512>}, {pipeline_mode = #tpu.pipeline_mode<synchronous>, transform_indices = @transform_27, window_bounds = array<i64: 1, 512>}, {pipeline_mode = #tpu.pipeline_mode<synchronous>, transform_indices = @transform_28, window_bounds = array<i64: 256, 512>}, {pipeline_mode = #tpu.pipeline_mode<synchronous>, transform_indices = @transform_29, window_bounds = array<i64: 1, 512>}, {pipeline_mode = #tpu.pipeline_mode<synchronous>, transform_indices = @transform_30, window_bounds = array<i64: 1, 1>}, {pipeline_mode = #tpu.pipeline_mode<synchronous>, transform_indices = @transform_31, window_bounds = array<i64: 1, 1>}, {pipeline_mode = #tpu.pipeline_mode<synchronous>, transform_indices = @transform_32, window_bounds = array<i64: 1, 1>}]} {
    %c0 = arith.constant 0 : index
    %c0_0 = arith.constant 0 : index
    %0 = vector.load %arg1[%c0, %c0_0] : memref<8x128xf32, #tpu.memory_space<vmem>>, vector<8x128xf32>
    %c0_1 = arith.constant 0 : index
    %c0_2 = arith.constant 0 : index
    %1 = vector.load %arg9[%c0_1, %c0_2] : memref<128x128xf32, #tpu.memory_space<vmem>>, vector<128x128xf32>
    %cst = arith.constant dense<0.000000e+00> : vector<8x128xf32>
    %2 = tpu.matmul %0, %1, %cst {dimension_numbers = #tpu.dot_dimension_numbers<[1], [0], [0], [1], [0, 0, 1, 1], [], []>} : vector<8x128xf32>, vector<128x128xf32>, vector<8x128xf32> -> vector<8x128xf32>
    %c0_3 = arith.constant 0 : index
    %c0_4 = arith.constant 0 : index
    %3 = vector.load %arg10[%c0_3, %c0_4] : memref<1x128xf32, #tpu.memory_space<vmem>>, vector<1x128xf32>
    %4 = vector.broadcast %3 : vector<1x128xf32> to vector<8x128xf32>
    %5 = arith.addf %2, %4 : vector<8x128xf32>
    %cst_5 = arith.constant 0.000000e+00 : f32
    %6 = vector.broadcast %cst_5 : f32 to vector<8x128xf32>
    %7 = arith.maximumf %5, %6 : vector<8x128xf32>
    %c0_6 = arith.constant 0 : index
    %c0_7 = arith.constant 0 : index
    %8 = vector.load %arg11[%c0_6, %c0_7] : memref<128x128xf32, #tpu.memory_space<vmem>>, vector<128x128xf32>
    %cst_8 = arith.constant dense<0.000000e+00> : vector<8x128xf32>
    %9 = tpu.matmul %7, %8, %cst_8 {dimension_numbers = #tpu.dot_dimension_numbers<[1], [0], [0], [1], [0, 0, 1, 1], [], []>} : vector<8x128xf32>, vector<128x128xf32>, vector<8x128xf32> -> vector<8x128xf32>
    %c0_9 = arith.constant 0 : index
    %c0_10 = arith.constant 0 : index
    %10 = vector.load %arg12[%c0_9, %c0_10] : memref<1x128xf32, #tpu.memory_space<vmem>>, vector<1x128xf32>
    %11 = vector.broadcast %10 : vector<1x128xf32> to vector<8x128xf32>
    %12 = arith.addf %9, %11 : vector<8x128xf32>
    %c0_11 = arith.constant 0 : index
    %c0_12 = arith.constant 0 : index
    %13 = vector.load %arg13[%c0_11, %c0_12] : memref<128x128xf32, #tpu.memory_space<vmem>>, vector<128x128xf32>
    %cst_13 = arith.constant dense<0.000000e+00> : vector<8x128xf32>
    %14 = tpu.matmul %7, %13, %cst_13 {dimension_numbers = #tpu.dot_dimension_numbers<[1], [0], [0], [1], [0, 0, 1, 1], [], []>} : vector<8x128xf32>, vector<128x128xf32>, vector<8x128xf32> -> vector<8x128xf32>
    %c0_14 = arith.constant 0 : index
    %c0_15 = arith.constant 0 : index
    %15 = vector.load %arg14[%c0_14, %c0_15] : memref<1x128xf32, #tpu.memory_space<vmem>>, vector<1x128xf32>
    %16 = vector.broadcast %15 : vector<1x128xf32> to vector<8x128xf32>
    %17 = arith.addf %14, %16 : vector<8x128xf32>
    %c0_16 = arith.constant 0 : index
    %c0_17 = arith.constant 0 : index
    %18 = vector.load %arg5[%c0_16, %c0_17] : memref<8x128xf32, #tpu.memory_space<vmem>>, vector<8x128xf32>
    %cst_18 = arith.constant 5.000000e-01 : f32
    %19 = vector.broadcast %cst_18 : f32 to vector<8x128xf32>
    %20 = arith.mulf %19, %17 : vector<8x128xf32>
    %21 = math.exp %20 : vector<8x128xf32>
    %22 = arith.mulf %18, %21 : vector<8x128xf32>
    %23 = arith.addf %12, %22 : vector<8x128xf32>
    %cst_19 = arith.constant 1.000000e+00 : f32
    %24 = vector.broadcast %cst_19 : f32 to vector<8x128xf32>
    %25 = arith.addf %24, %17 : vector<8x128xf32>
    %26 = arith.mulf %12, %12 : vector<8x128xf32>
    %27 = arith.subf %25, %26 : vector<8x128xf32>
    %28 = math.exp %17 : vector<8x128xf32>
    %29 = arith.subf %27, %28 : vector<8x128xf32>
    %cst_20 = arith.constant dense<0.000000e+00> : vector<8xf32>
    %30 = vector.multi_reduction <add>, %29, %cst_20 [1] : vector<8x128xf32> to vector<8xf32>
    %31 = vector.shape_cast %30 : vector<8xf32> to vector<8x1xf32>
    %cst_21 = arith.constant -1.000000e-03 : f32
    %32 = vector.broadcast %cst_21 : f32 to vector<8x1xf32>
    %33 = arith.mulf %32, %31 : vector<8x1xf32>
    %cst_22 = arith.constant dense<0.000000e+00> : vector<1xf32>
    %34 = vector.multi_reduction <add>, %33, %cst_22 [0] : vector<8x1xf32> to vector<1xf32>
    %35 = vector.shape_cast %34 : vector<1xf32> to vector<1x1xf32>
    %cst_23 = arith.constant 8.000000e+00 : f32
    %36 = vector.broadcast %cst_23 : f32 to vector<1x1xf32>
    %37 = arith.divf %35, %36 : vector<1x1xf32>
    %c0_24 = arith.constant 0 : index
    %c0_25 = arith.constant 0 : index
    %38 = vector.load %arg33[%c0_24, %c0_25] : memref<1x1xf32, #tpu.memory_space<vmem>>, vector<1x1xf32>
    tpu.vector_store %arg33[%c0_24, %c0_25], %37 {strides = array<i32>} : memref<1x1xf32, #tpu.memory_space<vmem>>, vector<1x1xf32>,
    %c0_26 = arith.constant 0 : index
    %c0_27 = arith.constant 0 : index
    %39 = vector.load %arg15[%c0_26, %c0_27] : memref<128x256xf32, #tpu.memory_space<vmem>>, vector<128x256xf32>
    %cst_28 = arith.constant dense<0.000000e+00> : vector<8x256xf32>
    %40 = tpu.matmul %23, %39, %cst_28 {dimension_numbers = #tpu.dot_dimension_numbers<[1], [0], [0], [1], [0, 0, 1, 1], [], []>} : vector<8x128xf32>, vector<128x256xf32>, vector<8x256xf32> -> vector<8x256xf32>
    %c0_29 = arith.constant 0 : index
    %c0_30 = arith.constant 0 : index
    %41 = vector.load %arg16[%c0_29, %c0_30] : memref<1x256xf32, #tpu.memory_space<vmem>>, vector<1x256xf32>
    %42 = vector.broadcast %41 : vector<1x256xf32> to vector<8x256xf32>
    %43 = arith.addf %40, %42 : vector<8x256xf32>
    %cst_31 = arith.constant 0.000000e+00 : f32
    %44 = vector.broadcast %cst_31 : f32 to vector<8x256xf32>
    %45 = arith.cmpf oge, %43, %44 : vector<8x256xf32>
    %cst_32 = arith.constant 2.000000e-01 : f32
    %46 = vector.broadcast %cst_32 : f32 to vector<8x256xf32>
    %47 = arith.mulf %46, %43 : vector<8x256xf32>
    %48 = arith.select %45, %43, %47 : vector<8x256xi1>, vector<8x256xf32>
    %c0_33 = arith.constant 0 : index
    %c0_34 = arith.constant 0 : index
    %49 = vector.load %arg17[%c0_33, %c0_34] : memref<1x256xf32, #tpu.memory_space<vmem>>, vector<1x256xf32>
    %c0_35 = arith.constant 0 : index
    %c0_36 = arith.constant 0 : index
    %50 = vector.load %arg18[%c0_35, %c0_36] : memref<1x256xf32, #tpu.memory_space<vmem>>, vector<1x256xf32>
    %cst_37 = arith.constant dense<0.000000e+00> : vector<256xf32>
    %51 = vector.multi_reduction <add>, %48, %cst_37 [0] : vector<8x256xf32> to vector<256xf32>
    %52 = vector.shape_cast %51 : vector<256xf32> to vector<1x256xf32>
    %cst_38 = arith.constant 8.000000e+00 : f32
    %53 = vector.broadcast %cst_38 : f32 to vector<1x256xf32>
    %54 = arith.divf %52, %53 : vector<1x256xf32>
    %55 = vector.broadcast %54 : vector<1x256xf32> to vector<8x256xf32>
    %56 = arith.subf %48, %55 : vector<8x256xf32>
    %57 = arith.mulf %56, %56 : vector<8x256xf32>
    %cst_39 = arith.constant dense<0.000000e+00> : vector<256xf32>
    %58 = vector.multi_reduction <add>, %57, %cst_39 [0] : vector<8x256xf32> to vector<256xf32>
    %59 = vector.shape_cast %58 : vector<256xf32> to vector<1x256xf32>
    %cst_40 = arith.constant 8.000000e+00 : f32
    %60 = vector.broadcast %cst_40 : f32 to vector<1x256xf32>
    %61 = arith.divf %59, %60 : vector<1x256xf32>
    %62 = vector.broadcast %54 : vector<1x256xf32> to vector<8x256xf32>
    %63 = arith.subf %48, %62 : vector<8x256xf32>
    %cst_41 = arith.constant 9.99999974E-6 : f32
    %64 = vector.broadcast %cst_41 : f32 to vector<1x256xf32>
    %65 = arith.addf %61, %64 : vector<1x256xf32>
    %66 = math.rsqrt %65 : vector<1x256xf32>
    %67 = vector.broadcast %66 : vector<1x256xf32> to vector<8x256xf32>
    %68 = arith.mulf %63, %67 : vector<8x256xf32>
    %69 = vector.broadcast %49 : vector<1x256xf32> to vector<8x256xf32>
    %70 = arith.mulf %68, %69 : vector<8x256xf32>
    %71 = vector.broadcast %50 : vector<1x256xf32> to vector<8x256xf32>
    %72 = arith.addf %70, %71 : vector<8x256xf32>
    %c0_42 = arith.constant 0 : index
    %c0_43 = arith.constant 0 : index
    %73 = vector.load %arg19[%c0_42, %c0_43] : memref<256x256xf32, #tpu.memory_space<vmem>>, vector<256x256xf32>
    %cst_44 = arith.constant dense<0.000000e+00> : vector<8x256xf32>
    %74 = tpu.matmul %72, %73, %cst_44 {dimension_numbers = #tpu.dot_dimension_numbers<[1], [0], [0], [1], [0, 0, 1, 1], [], []>} : vector<8x256xf32>, vector<256x256xf32>, vector<8x256xf32> -> vector<8x256xf32>
    %c0_45 = arith.constant 0 : index
    %c0_46 = arith.constant 0 : index
    %75 = vector.load %arg20[%c0_45, %c0_46] : memref<1x256xf32, #tpu.memory_space<vmem>>, vector<1x256xf32>
    %76 = vector.broadcast %75 : vector<1x256xf32> to vector<8x256xf32>
    %77 = arith.addf %74, %76 : vector<8x256xf32>
    %cst_47 = arith.constant 0.000000e+00 : f32
    %78 = vector.broadcast %cst_47 : f32 to vector<8x256xf32>
    %79 = arith.cmpf oge, %77, %78 : vector<8x256xf32>
    %cst_48 = arith.constant 2.000000e-01 : f32
    %80 = vector.broadcast %cst_48 : f32 to vector<8x256xf32>
    %81 = arith.mulf %80, %77 : vector<8x256xf32>
    %82 = arith.select %79, %77, %81 : vector<8x256xi1>, vector<8x256xf32>
    %c0_49 = arith.constant 0 : index
    %c0_50 = arith.constant 0 : index
    %83 = vector.load %arg21[%c0_49, %c0_50] : memref<1x256xf32, #tpu.memory_space<vmem>>, vector<1x256xf32>
    %c0_51 = arith.constant 0 : index
    %c0_52 = arith.constant 0 : index
    %84 = vector.load %arg22[%c0_51, %c0_52] : memref<1x256xf32, #tpu.memory_space<vmem>>, vector<1x256xf32>
    %cst_53 = arith.constant dense<0.000000e+00> : vector<256xf32>
    %85 = vector.multi_reduction <add>, %82, %cst_53 [0] : vector<8x256xf32> to vector<256xf32>
    %86 = vector.shape_cast %85 : vector<256xf32> to vector<1x256xf32>
    %cst_54 = arith.constant 8.000000e+00 : f32
    %87 = vector.broadcast %cst_54 : f32 to vector<1x256xf32>
    %88 = arith.divf %86, %87 : vector<1x256xf32>
    %89 = vector.broadcast %88 : vector<1x256xf32> to vector<8x256xf32>
    %90 = arith.subf %82, %89 : vector<8x256xf32>
    %91 = arith.mulf %90, %90 : vector<8x256xf32>
    %cst_55 = arith.constant dense<0.000000e+00> : vector<256xf32>
    %92 = vector.multi_reduction <add>, %91, %cst_55 [0] : vector<8x256xf32> to vector<256xf32>
    %93 = vector.shape_cast %92 : vector<256xf32> to vector<1x256xf32>
    %cst_56 = arith.constant 8.000000e+00 : f32
    %94 = vector.broadcast %cst_56 : f32 to vector<1x256xf32>
    %95 = arith.divf %93, %94 : vector<1x256xf32>
    %96 = vector.broadcast %88 : vector<1x256xf32> to vector<8x256xf32>
    %97 = arith.subf %82, %96 : vector<8x256xf32>
    %cst_57 = arith.constant 9.99999974E-6 : f32
    %98 = vector.broadcast %cst_57 : f32 to vector<1x256xf32>
    %99 = arith.addf %95, %98 : vector<1x256xf32>
    %100 = math.rsqrt %99 : vector<1x256xf32>
    %101 = vector.broadcast %100 : vector<1x256xf32> to vector<8x256xf32>
    %102 = arith.mulf %97, %101 : vector<8x256xf32>
    %103 = vector.broadcast %83 : vector<1x256xf32> to vector<8x256xf32>
    %104 = arith.mulf %102, %103 : vector<8x256xf32>
    %105 = vector.broadcast %84 : vector<1x256xf32> to vector<8x256xf32>
    %106 = arith.addf %104, %105 : vector<8x256xf32>
    %c0_58 = arith.constant 0 : index
    %c0_59 = arith.constant 0 : index
    %107 = vector.load %arg23[%c0_58, %c0_59] : memref<256x512xf32, #tpu.memory_space<vmem>>, vector<256x512xf32>
    %cst_60 = arith.constant dense<0.000000e+00> : vector<8x512xf32>
    %108 = tpu.matmul %106, %107, %cst_60 {dimension_numbers = #tpu.dot_dimension_numbers<[1], [0], [0], [1], [0, 0, 1, 1], [], []>} : vector<8x256xf32>, vector<256x512xf32>, vector<8x512xf32> -> vector<8x512xf32>
    %c0_61 = arith.constant 0 : index
    %c0_62 = arith.constant 0 : index
    %109 = vector.load %arg24[%c0_61, %c0_62] : memref<1x512xf32, #tpu.memory_space<vmem>>, vector<1x512xf32>
    %110 = vector.broadcast %109 : vector<1x512xf32> to vector<8x512xf32>
    %111 = arith.addf %108, %110 : vector<8x512xf32>
    %112 = math.exp %111 : vector<8x512xf32>
    %c0_63 = arith.constant 0 : index
    %c0_64 = arith.constant 0 : index
    %113 = vector.load %arg25[%c0_63, %c0_64] : memref<256x512xf32, #tpu.memory_space<vmem>>, vector<256x512xf32>
    %cst_65 = arith.constant dense<0.000000e+00> : vector<8x512xf32>
    %114 = tpu.matmul %106, %113, %cst_65 {dimension_numbers = #tpu.dot_dimension_numbers<[1], [0], [0], [1], [0, 0, 1, 1], [], []>} : vector<8x256xf32>, vector<256x512xf32>, vector<8x512xf32> -> vector<8x512xf32>
    %c0_66 = arith.constant 0 : index
    %c0_67 = arith.constant 0 : index
    %115 = vector.load %arg26[%c0_66, %c0_67] : memref<1x512xf32, #tpu.memory_space<vmem>>, vector<1x512xf32>
    %116 = vector.broadcast %115 : vector<1x512xf32> to vector<8x512xf32>
    %117 = arith.addf %114, %116 : vector<8x512xf32>
    %c0_68 = arith.constant 0 : index
    %c0_69 = arith.constant 0 : index
    %118 = vector.load %arg27[%c0_68, %c0_69] : memref<256x512xf32, #tpu.memory_space<vmem>>, vector<256x512xf32>
    %cst_70 = arith.constant dense<0.000000e+00> : vector<8x512xf32>
    %119 = tpu.matmul %106, %118, %cst_70 {dimension_numbers = #tpu.dot_dimension_numbers<[1], [0], [0], [1], [0, 0, 1, 1], [], []>} : vector<8x256xf32>, vector<256x512xf32>, vector<8x512xf32> -> vector<8x512xf32>
    %c0_71 = arith.constant 0 : index
    %c0_72 = arith.constant 0 : index
    %120 = vector.load %arg28[%c0_71, %c0_72] : memref<1x512xf32, #tpu.memory_space<vmem>>, vector<1x512xf32>
    %121 = vector.broadcast %120 : vector<1x512xf32> to vector<8x512xf32>
    %122 = arith.addf %119, %121 : vector<8x512xf32>
    %cst_73 = arith.constant 0.000000e+00 : f32
    %123 = vector.broadcast %cst_73 : f32 to vector<8x512xf32>
    %124 = arith.subf %123, %122 : vector<8x512xf32>
    %125 = math.exp %124 : vector<8x512xf32>
    %cst_74 = arith.constant 1.000000e+00 : f32
    %126 = vector.broadcast %cst_74 : f32 to vector<8x512xf32>
    %127 = arith.addf %126, %125 : vector<8x512xf32>
    %cst_75 = arith.constant 1.000000e+00 : f32
    %128 = vector.broadcast %cst_75 : f32 to vector<8x512xf32>
    %129 = arith.divf %128, %127 : vector<8x512xf32>
    %c0_76 = arith.constant 0 : index
    %c0_77 = arith.constant 0 : index
    %130 = vector.load %arg29[%c0_76, %c0_77] : memref<256x512xf32, #tpu.memory_space<vmem>>, vector<256x512xf32>
    %cst_78 = arith.constant dense<0.000000e+00> : vector<8x512xf32>
    %131 = tpu.matmul %106, %130, %cst_78 {dimension_numbers = #tpu.dot_dimension_numbers<[1], [0], [0], [1], [0, 0, 1, 1], [], []>} : vector<8x256xf32>, vector<256x512xf32>, vector<8x512xf32> -> vector<8x512xf32>
    %c0_79 = arith.constant 0 : index
    %c0_80 = arith.constant 0 : index
    %132 = vector.load %arg30[%c0_79, %c0_80] : memref<1x512xf32, #tpu.memory_space<vmem>>, vector<1x512xf32>
    %133 = vector.broadcast %132 : vector<1x512xf32> to vector<8x512xf32>
    %134 = arith.addf %131, %133 : vector<8x512xf32>
    %c0_81 = arith.constant 0 : index
    %c0_82 = arith.constant 0 : index
    %135 = vector.load %arg6[%c0_81, %c0_82] : memref<8x512xf32, #tpu.memory_space<vmem>>, vector<8x512xf32>
    %cst_83 = arith.constant 5.000000e-01 : f32
    %136 = vector.broadcast %cst_83 : f32 to vector<8x512xf32>
    %137 = arith.mulf %136, %134 : vector<8x512xf32>
    %138 = math.exp %137 : vector<8x512xf32>
    %139 = arith.mulf %135, %138 : vector<8x512xf32>
    %c0_84 = arith.constant 0 : index
    %c0_85 = arith.constant 0 : index
    %140 = vector.load %arg7[%c0_84, %c0_85] : memref<8x512xf32, #tpu.memory_space<vmem>>, vector<8x512xf32>
    %cst_86 = arith.constant 5.000000e-01 : f32
    %141 = vector.broadcast %cst_86 : f32 to vector<8x512xf32>
    %142 = arith.mulf %141, %117 : vector<8x512xf32>
    %143 = math.exp %142 : vector<8x512xf32>
    %144 = arith.mulf %140, %143 : vector<8x512xf32>
    %145 = arith.addf %112, %144 : vector<8x512xf32>
    %c0_87 = arith.constant 0 : index
    %c0_88 = arith.constant 0 : index
    %146 = vector.load %arg8[%c0_87, %c0_88] : memref<8x512xf32, #tpu.memory_space<vmem>>, vector<8x512xf32>
    %147 = arith.cmpf olt, %146, %129 : vector<8x512xf32>
    %148 = arith.extui %147 : vector<8x512xi1> to vector<8x512xi32>
    %149 = arith.sitofp %148 : vector<8x512xi32> to vector<8x512xf32>
    %150 = arith.mulf %139, %149 : vector<8x512xf32>
    %cst_89 = arith.constant 1.000000e+00 : f32
    %151 = vector.broadcast %cst_89 : f32 to vector<8x512xf32>
    %152 = arith.subf %151, %149 : vector<8x512xf32>
    %153 = arith.mulf %145, %152 : vector<8x512xf32>
    %154 = arith.addf %150, %153 : vector<8x512xf32>
    %c0_90 = arith.constant 0 : index
    %c0_91 = arith.constant 0 : index
    %155 = vector.load %arg3[%c0_90, %c0_91] : memref<8x512xf32, #tpu.memory_space<vmem>>, vector<8x512xf32>
    %156 = arith.subf %154, %155 : vector<8x512xf32>
    %157 = math.absf %156 : vector<8x512xf32>
    %cst_92 = arith.constant 1.000000e+00 : f32
    %158 = vector.broadcast %cst_92 : f32 to vector<8x512xf32>
    %159 = arith.cmpf olt, %157, %158 : vector<8x512xf32>
    %cst_93 = arith.constant 5.000000e-01 : f32
    %160 = vector.broadcast %cst_93 : f32 to vector<8x512xf32>
    %161 = arith.mulf %160, %156 : vector<8x512xf32>
    %162 = arith.mulf %161, %156 : vector<8x512xf32>
    %cst_94 = arith.constant 5.000000e-01 : f32
    %163 = vector.broadcast %cst_94 : f32 to vector<8x512xf32>
    %164 = arith.subf %157, %163 : vector<8x512xf32>
    %165 = arith.select %159, %162, %164 : vector<8x512xi1>, vector<8x512xf32>
    %cst_95 = arith.constant dense<0.000000e+00> : vector<8xf32>
    %166 = vector.multi_reduction <add>, %165, %cst_95 [1] : vector<8x512xf32> to vector<8xf32>
    %167 = vector.shape_cast %166 : vector<8xf32> to vector<8x1xf32>
    %cst_96 = arith.constant dense<0.000000e+00> : vector<1xf32>
    %168 = vector.multi_reduction <add>, %167, %cst_96 [0] : vector<8x1xf32> to vector<1xf32>
    %169 = vector.shape_cast %168 : vector<1xf32> to vector<1x1xf32>
    %cst_97 = arith.constant 4.096000e+03 : f32
    %170 = vector.broadcast %cst_97 : f32 to vector<1x1xf32>
    %171 = arith.divf %169, %170 : vector<1x1xf32>
    %c0_98 = arith.constant 0 : index
    %c0_99 = arith.constant 0 : index
    %172 = vector.load %arg32[%c0_98, %c0_99] : memref<1x1xf32, #tpu.memory_space<vmem>>, vector<1x1xf32>
    tpu.vector_store %arg32[%c0_98, %c0_99], %171 {strides = array<i32>} : memref<1x1xf32, #tpu.memory_space<vmem>>, vector<1x1xf32>,
    %173 = arith.mulf %23, %23 : vector<8x128xf32>
    %cst_100 = arith.constant dense<0.000000e+00> : vector<8xf32>
    %174 = vector.multi_reduction <add>, %173, %cst_100 [1] : vector<8x128xf32> to vector<8xf32>
    %175 = vector.shape_cast %174 : vector<8xf32> to vector<8x1xf32>
    %176 = math.sqrt %175 : vector<8x1xf32>
    %cst_101 = arith.constant 9.99999996E-13 : f32
    %177 = vector.broadcast %cst_101 : f32 to vector<8x1xf32>
    %178 = arith.maximumf %176, %177 : vector<8x1xf32>
    %179 = vector.broadcast %178 : vector<8x1xf32> to vector<8x128xf32>
    %180 = arith.divf %23, %179 : vector<8x128xf32>
    %c0_102 = arith.constant 0 : index
    %c0_103 = arith.constant 0 : index
    %181 = vector.load %arg2[%c0_102, %c0_103] : memref<8x128xf32, #tpu.memory_space<vmem>>, vector<8x128xf32>
    %cst_104 = arith.constant dense<0.000000e+00> : vector<8x8xf32>
    %182 = tpu.matmul %180, %181, %cst_104 {dimension_numbers = #tpu.dot_dimension_numbers<[1], [1], [0], [0], [0, 0, 1, 0], [], []>} : vector<8x128xf32>, vector<8x128xf32>, vector<8x8xf32> -> vector<8x8xf32>
    %cst_105 = arith.constant 5.000000e+00 : f32
    %183 = vector.broadcast %cst_105 : f32 to vector<8x8xf32>
    %184 = arith.mulf %182, %183 : vector<8x8xf32>
    %cst_106 = arith.constant dense<0.000000e+00> : vector<8x8xf32>
    %185 = tpu.matmul %181, %180, %cst_106 {dimension_numbers = #tpu.dot_dimension_numbers<[1], [1], [0], [0], [0, 0, 1, 0], [], []>} : vector<8x128xf32>, vector<8x128xf32>, vector<8x8xf32> -> vector<8x8xf32>
    %cst_107 = arith.constant 5.000000e+00 : f32
    %186 = vector.broadcast %cst_107 : f32 to vector<8x8xf32>
    %187 = arith.mulf %185, %186 : vector<8x8xf32>
    %c0_108 = arith.constant 0 : index
    %c0_109 = arith.constant 0 : index
    %188 = vector.load %arg4[%c0_108, %c0_109] : memref<8x8xf32, #tpu.memory_space<vmem>>, vector<8x8xf32>
    %cst_110 = arith.constant dense<0xFF800000> : vector<8xf32>
    %189 = vector.multi_reduction <maximumf>, %184, %cst_110 [1] : vector<8x8xf32> to vector<8xf32>
    %190 = vector.shape_cast %189 : vector<8xf32> to vector<8x1xf32>
    %191 = vector.broadcast %190 : vector<8x1xf32> to vector<8x8xf32>
    %192 = arith.subf %184, %191 : vector<8x8xf32>
    %193 = math.exp %192 : vector<8x8xf32>
    %cst_111 = arith.constant dense<0.000000e+00> : vector<8xf32>
    %194 = vector.multi_reduction <add>, %193, %cst_111 [1] : vector<8x8xf32> to vector<8xf32>
    %195 = vector.shape_cast %194 : vector<8xf32> to vector<8x1xf32>
    %196 = math.log %195 : vector<8x1xf32>
    %197 = vector.broadcast %196 : vector<8x1xf32> to vector<8x8xf32>
    %198 = arith.subf %192, %197 : vector<8x8xf32>
    %199 = arith.mulf %198, %188 : vector<8x8xf32>
    %cst_112 = arith.constant dense<0.000000e+00> : vector<8xf32>
    %200 = vector.multi_reduction <add>, %199, %cst_112 [1] : vector<8x8xf32> to vector<8xf32>
    %201 = vector.shape_cast %200 : vector<8xf32> to vector<8x1xf32>
    %cst_113 = arith.constant 0.000000e+00 : f32
    %202 = vector.broadcast %cst_113 : f32 to vector<8x1xf32>
    %203 = arith.subf %202, %201 : vector<8x1xf32>
    %cst_114 = arith.constant dense<0.000000e+00> : vector<1xf32>
    %204 = vector.multi_reduction <add>, %203, %cst_114 [0] : vector<8x1xf32> to vector<1xf32>
    %205 = vector.shape_cast %204 : vector<1xf32> to vector<1x1xf32>
    %cst_115 = arith.constant 8.000000e+00 : f32
    %206 = vector.broadcast %cst_115 : f32 to vector<1x1xf32>
    %207 = arith.divf %205, %206 : vector<1x1xf32>
    %cst_116 = arith.constant dense<0xFF800000> : vector<8xf32>
    %208 = vector.multi_reduction <maximumf>, %187, %cst_116 [1] : vector<8x8xf32> to vector<8xf32>
    %209 = vector.shape_cast %208 : vector<8xf32> to vector<8x1xf32>
    %210 = vector.broadcast %209 : vector<8x1xf32> to vector<8x8xf32>
    %211 = arith.subf %187, %210 : vector<8x8xf32>
    %212 = math.exp %211 : vector<8x8xf32>
    %cst_117 = arith.constant dense<0.000000e+00> : vector<8xf32>
    %213 = vector.multi_reduction <add>, %212, %cst_117 [1] : vector<8x8xf32> to vector<8xf32>
    %214 = vector.shape_cast %213 : vector<8xf32> to vector<8x1xf32>
    %215 = math.log %214 : vector<8x1xf32>
    %216 = vector.broadcast %215 : vector<8x1xf32> to vector<8x8xf32>
    %217 = arith.subf %211, %216 : vector<8x8xf32>
    %218 = arith.mulf %217, %188 : vector<8x8xf32>
    %cst_118 = arith.constant dense<0.000000e+00> : vector<8xf32>
    %219 = vector.multi_reduction <add>, %218, %cst_118 [1] : vector<8x8xf32> to vector<8xf32>
    %220 = vector.shape_cast %219 : vector<8xf32> to vector<8x1xf32>
    %cst_119 = arith.constant 0.000000e+00 : f32
    %221 = vector.broadcast %cst_119 : f32 to vector<8x1xf32>
    %222 = arith.subf %221, %220 : vector<8x1xf32>
    %cst_120 = arith.constant dense<0.000000e+00> : vector<1xf32>
    %223 = vector.multi_reduction <add>, %222, %cst_120 [0] : vector<8x1xf32> to vector<1xf32>
    %224 = vector.shape_cast %223 : vector<1xf32> to vector<1x1xf32>
    %cst_121 = arith.constant 8.000000e+00 : f32
    %225 = vector.broadcast %cst_121 : f32 to vector<1x1xf32>
    %226 = arith.divf %224, %225 : vector<1x1xf32>
    %227 = arith.addf %207, %226 : vector<1x1xf32>
    %cst_122 = arith.constant 5.000000e-01 : f32
    %228 = vector.broadcast %cst_122 : f32 to vector<1x1xf32>
    %229 = arith.mulf %228, %227 : vector<1x1xf32>
    %c0_123 = arith.constant 0 : index
    %c0_124 = arith.constant 0 : index
    %230 = vector.load %arg31[%c0_123, %c0_124] : memref<1x1xf32, #tpu.memory_space<vmem>>, vector<1x1xf32>
    tpu.vector_store %arg31[%c0_123, %c0_124], %229 {strides = array<i32>} : memref<1x1xf32, #tpu.memory_space<vmem>>, vector<1x1xf32>,
    return
  }
  func.func @transform_0(%arg0: i32) -> (i32, i32) {
    %c0_i32 = arith.constant 0 : i32
    %c0_i32_0 = arith.constant 0 : i32
    %c0_i32_1 = arith.constant 0 : i32
    return %c0_i32, %c0_i32_0 : i32, i32
  }
  func.func @transform_1(%arg0: i32) -> (i32, i32) {
    %c0_i32 = arith.constant 0 : i32
    %c0_i32_0 = arith.constant 0 : i32
    %c0_i32_1 = arith.constant 0 : i32
    return %c0_i32, %c0_i32_0 : i32, i32
  }
  func.func @transform_2(%arg0: i32) -> (i32, i32) {
    %c0_i32 = arith.constant 0 : i32
    %c0_i32_0 = arith.constant 0 : i32
    %c0_i32_1 = arith.constant 0 : i32
    return %c0_i32, %c0_i32_0 : i32, i32
  }
  func.func @transform_3(%arg0: i32) -> (i32, i32) {
    %c0_i32 = arith.constant 0 : i32
    %c0_i32_0 = arith.constant 0 : i32
    %c0_i32_1 = arith.constant 0 : i32
    return %c0_i32, %c0_i32_0 : i32, i32
  }
  func.func @transform_4(%arg0: i32) -> (i32, i32) {
    %c0_i32 = arith.constant 0 : i32
    %c0_i32_0 = arith.constant 0 : i32
    %c0_i32_1 = arith.constant 0 : i32
    return %c0_i32, %c0_i32_0 : i32, i32
  }
  func.func @transform_5(%arg0: i32) -> (i32, i32) {
    %c0_i32 = arith.constant 0 : i32
    %c0_i32_0 = arith.constant 0 : i32
    %c0_i32_1 = arith.constant 0 : i32
    return %c0_i32, %c0_i32_0 : i32, i32
  }
  func.func @transform_6(%arg0: i32) -> (i32, i32) {
    %c0_i32 = arith.constant 0 : i32
    %c0_i32_0 = arith.constant 0 : i32
    %c0_i32_1 = arith.constant 0 : i32
    return %c0_i32, %c0_i32_0 : i32, i32
  }
  func.func @transform_7(%arg0: i32) -> (i32, i32) {
    %c0_i32 = arith.constant 0 : i32
    %c0_i32_0 = arith.constant 0 : i32
    %c0_i32_1 = arith.constant 0 : i32
    return %c0_i32, %c0_i32_0 : i32, i32
  }
  func.func @transform_8(%arg0: i32) -> (i32, i32) {
    %c0_i32 = arith.constant 0 : i32
    %c0_i32_0 = arith.constant 0 : i32
    %c0_i32_1 = arith.constant 0 : i32
    return %c0_i32, %c0_i32_0 : i32, i32
  }
  func.func @transform_9(%arg0: i32) -> (i32, i32) {
    %c0_i32 = arith.constant 0 : i32
    %c0_i32_0 = arith.constant 0 : i32
    %c0_i32_1 = arith.constant 0 : i32
    return %c0_i32, %c0_i32_0 : i32, i32
  }
  func.func @transform_10(%arg0: i32) -> (i32, i32) {
    %c0_i32 = arith.constant 0 : i32
    %c0_i32_0 = arith.constant 0 : i32
    %c0_i32_1 = arith.constant 0 : i32
    return %c0_i32, %c0_i32_0 : i32, i32
  }
  func.func @transform_11(%arg0: i32) -> (i32, i32) {
    %c0_i32 = arith.constant 0 : i32
    %c0_i32_0 = arith.constant 0 : i32
    %c0_i32_1 = arith.constant 0 : i32
    return %c0_i32, %c0_i32_0 : i32, i32
  }
  func.func @transform_12(%arg0: i32) -> (i32, i32) {
    %c0_i32 = arith.constant 0 : i32
    %c0_i32_0 = arith.constant 0 : i32
    %c0_i32_1 = arith.constant 0 : i32
    return %c0_i32, %c0_i32_0 : i32, i32
  }
  func.func @transform_13(%arg0: i32) -> (i32, i32) {
    %c0_i32 = arith.constant 0 : i32
    %c0_i32_0 = arith.constant 0 : i32
    %c0_i32_1 = arith.constant 0 : i32
    return %c0_i32, %c0_i32_0 : i32, i32
  }
  func.func @transform_14(%arg0: i32) -> (i32, i32) {
    %c0_i32 = arith.constant 0 : i32
    %c0_i32_0 = arith.constant 0 : i32
    %c0_i32_1 = arith.constant 0 : i32
    return %c0_i32, %c0_i32_0 : i32, i32
  }
  func.func @transform_15(%arg0: i32) -> (i32, i32) {
    %c0_i32 = arith.constant 0 : i32
    %c0_i32_0 = arith.constant 0 : i32
    %c0_i32_1 = arith.constant 0 : i32
    return %c0_i32, %c0_i32_0 : i32, i32
  }
  func.func @transform_16(%arg0: i32) -> (i32, i32) {
    %c0_i32 = arith.constant 0 : i32
    %c0_i32_0 = arith.constant 0 : i32
    %c0_i32_1 = arith.constant 0 : i32
    return %c0_i32, %c0_i32_0 : i32, i32
  }
  func.func @transform_17(%arg0: i32) -> (i32, i32) {
    %c0_i32 = arith.constant 0 : i32
    %c0_i32_0 = arith.constant 0 : i32
    %c0_i32_1 = arith.constant 0 : i32
    return %c0_i32, %c0_i32_0 : i32, i32
  }
  func.func @transform_18(%arg0: i32) -> (i32, i32) {
    %c0_i32 = arith.constant 0 : i32
    %c0_i32_0 = arith.constant 0 : i32
    %c0_i32_1 = arith.constant 0 : i32
    return %c0_i32, %c0_i32_0 : i32, i32
  }
  func.func @transform_19(%arg0: i32) -> (i32, i32) {
    %c0_i32 = arith.constant 0 : i32
    %c0_i32_0 = arith.constant 0 : i32
    %c0_i32_1 = arith.constant 0 : i32
    return %c0_i32, %c0_i32_0 : i32, i32
  }
  func.func @transform_20(%arg0: i32) -> (i32, i32) {
    %c0_i32 = arith.constant 0 : i32
    %c0_i32_0 = arith.constant 0 : i32
    %c0_i32_1 = arith.constant 0 : i32
    return %c0_i32, %c0_i32_0 : i32, i32
  }
  func.func @transform_21(%arg0: i32) -> (i32, i32) {
    %c0_i32 = arith.constant 0 : i32
    %c0_i32_0 = arith.constant 0 : i32
    %c0_i32_1 = arith.constant 0 : i32
    return %c0_i32, %c0_i32_0 : i32, i32
  }
  func.func @transform_22(%arg0: i32) -> (i32, i32) {
    %c0_i32 = arith.constant 0 : i32
    %c0_i32_0 = arith.constant 0 : i32
    %c0_i32_1 = arith.constant 0 : i32
    return %c0_i32, %c0_i32_0 : i32, i32
  }
  func.func @transform_23(%arg0: i32) -> (i32, i32) {
    %c0_i32 = arith.constant 0 : i32
    %c0_i32_0 = arith.constant 0 : i32
    %c0_i32_1 = arith.constant 0 : i32
    return %c0_i32, %c0_i32_0 : i32, i32
  }
  func.func @transform_24(%arg0: i32) -> (i32, i32) {
    %c0_i32 = arith.constant 0 : i32
    %c0_i32_0 = arith.constant 0 : i32
    %c0_i32_1 = arith.constant 0 : i32
    return %c0_i32, %c0_i32_0 : i32, i32
  }
  func.func @transform_25(%arg0: i32) -> (i32, i32) {
    %c0_i32 = arith.constant 0 : i32
    %c0_i32_0 = arith.constant 0 : i32
    %c0_i32_1 = arith.constant 0 : i32
    return %c0_i32, %c0_i32_0 : i32, i32
  }
  func.func @transform_26(%arg0: i32) -> (i32, i32) {
    %c0_i32 = arith.constant 0 : i32
    %c0_i32_0 = arith.constant 0 : i32
    %c0_i32_1 = arith.constant 0 : i32
    return %c0_i32, %c0_i32_0 : i32, i32
  }
  func.func @transform_27(%arg0: i32) -> (i32, i32) {
    %c0_i32 = arith.constant 0 : i32
    %c0_i32_0 = arith.constant 0 : i32
    %c0_i32_1 = arith.constant 0 : i32
    return %c0_i32, %c0_i32_0 : i32, i32
  }
  func.func @transform_28(%arg0: i32) -> (i32, i32) {
    %c0_i32 = arith.constant 0 : i32
    %c0_i32_0 = arith.constant 0 : i32
    %c0_i32_1 = arith.constant 0 : i32
    return %c0_i32, %c0_i32_0 : i32, i32
  }
  func.func @transform_29(%arg0: i32) -> (i32, i32) {
    %c0_i32 = arith.constant 0 : i32
    %c0_i32_0 = arith.constant 0 : i32
    %c0_i32_1 = arith.constant 0 : i32
    return %c0_i32, %c0_i32_0 : i32, i32
  }
  func.func @transform_30(%arg0: i32) -> (i32, i32) {
    %c0_i32 = arith.constant 0 : i32
    %c0_i32_0 = arith.constant 0 : i32
    %c0_i32_1 = arith.constant 0 : i32
    return %c0_i32, %c0_i32_0 : i32, i32
  }
  func.func @transform_31(%arg0: i32) -> (i32, i32) {
    %c0_i32 = arith.constant 0 : i32
    %c0_i32_0 = arith.constant 0 : i32
    %c0_i32_1 = arith.constant 0 : i32
    return %c0_i32, %c0_i32_0 : i32, i32
  }
  func.func @transform_32(%arg0: i32) -> (i32, i32) {
    %c0_i32 = arith.constant 0 : i32
    %c0_i32_0 = arith.constant 0 : i32
    %c0_i32_1 = arith.constant 0 : i32
    return %c0_i32, %c0_i32_0 : i32, i32
  }
}

</mosaic_0001>

<bundles_post_ra>
// kernel: tpu_custom_call.1
= control target key start
LH: loop header
LB: loop body
LE: loop exit
PB: predicated region body
PF: predicated region fallthrough
CT: control target
= control target key end

     0   :  { %s4120_s6 = smov 1   ;;  %s4121_s10 = smov 2   ;;  %s4641_s0 = inlined_call_operand.smem [shape: u32[33], index: -1, kind: input, shape index: {}] }
   0x1   :  { %s4189_s5 = sld [smem:[%s4641_s0]]   ;;  %s4122_s14 = smov 3  }
   0x2   :  { %s4194_s9 = sld [smem:[%s4641_s0 + %s4120_s6]]   ;;  %s4123_s18 = smov 4  }
   0x3   :  { %s4199_s13 = sld [smem:[%s4641_s0 + %s4121_s10]]   ;;  %s4124_s22 = smov 5  }
   0x4   :  { %s4204_s17 = sld [smem:[%s4641_s0 + %s4122_s14]]   ;;  %s4125_s26 = smov 6  }
   0x5   :  { %s4209_s21 = sld [smem:[%s4641_s0 + %s4123_s18]]   ;;  %s4126_s30 = smov 7  }
   0x6   :  { %s4214_s25 = sld [smem:[%s4641_s0 + %s4124_s22]]   ;;  %s4127_s4 = smov 8  }
   0x7   :  { %s4219_s29 = sld [smem:[%s4641_s0 + %s4125_s26]]   ;;  %s4128_s10 = smov 9  }
   0x8   :  { %s4224_s3 = sld [smem:[%s4641_s0 + %s4126_s30]]   ;;  %s4129_s15 = smov 10  }
   0x9   :  { %s4229_s8 = sld [smem:[%s4641_s0 + %s4127_s4]]   ;;  %s4130_s20 = smov 11  }
   0xa   :  { %4645 = sst [smem:[#allocation44_spill]] %s4204_s17  ;;  %s4131_s26 = smov 12  }
   0xb   :  { %s4234_s14 = sld [smem:[%s4641_s0 + %s4128_s10]]   ;;  %s4132_s1 = smov 13  }
   0xc   :  { %s4239_s19 = sld [smem:[%s4641_s0 + %s4129_s15]]   ;;  %s4133_s7 = smov 14  }
   0xd   :  { %s4244_s24 = sld [smem:[%s4641_s0 + %s4130_s20]]   ;;  %s4134_s15 = smov 15  }
   0xe   :  { %s4249_s30 = sld [smem:[%s4641_s0 + %s4131_s26]]   ;;  %s4135_s22 = smov 16  }
   0xf   :  { %s4254_s6 = sld [smem:[%s4641_s0 + %s4132_s1]]   ;;  %s4136_s28 = smov 17  }
  0x10   :  { %s4259_s12 = sld [smem:[%s4641_s0 + %s4133_s7]]   ;;  %s4137_s7 = smov 18  }
  0x11   :  { %s4264_s20 = sld [smem:[%s4641_s0 + %s4134_s15]]   ;;  %s4138_s15 = smov 19  }
  0x12   :  { %s4269_s27 = sld [smem:[%s4641_s0 + %s4135_s22]]   ;;  %s4139_s22 = smov 20  }
  0x13   :  { %4646 = sst [smem:[#allocation45_spill]] %s4244_s24 }
  0x14   :  { %s4274_s4 = sld [smem:[%s4641_s0 + %s4136_s28]]   ;;  %s4140_s28 = smov 21  }
  0x15   :  { %4647 = sst [smem:[#allocation46_spill]] %s4254_s6 }
  0x16   :  { %s4279_s17 = sld [smem:[%s4641_s0 + %s4137_s7]]   ;;  %s4141_s7 = smov 22  }
  0x17   :  { %4648 = sst [smem:[#allocation47_spill]] %s4264_s20 }
  0x18   :  { %4649 = sst [smem:[#allocation48_spill]] %s4269_s27 }
  0x19   :  { %s4284_s20 = sld [smem:[%s4641_s0 + %s4138_s15]]   ;;  %s4142_s15 = smov 23  }
  0x1a   :  { %4650 = sst [smem:[#allocation49_spill]] %s4274_s4 }
  0x1b   :  { %s4289_s27 = sld [smem:[%s4641_s0 + %s4139_s22]]   ;;  %s4143_s22 = smov 24  }
  0x1c   :  { %4651 = sst [smem:[#allocation50_spill]] %s4279_s17 }
  0x1d   :  { %s4294_s4 = sld [smem:[%s4641_s0 + %s4140_s28]]   ;;  %s4144_s28 = smov 25  }
  0x1e   :  { %s4299_s6 = sld [smem:[%s4641_s0 + %s4141_s7]]   ;;  %s4145_s7 = smov 26  }
  0x1f   :  { %4652 = sst [smem:[#allocation51_spill]] %s4284_s20 }
  0x20   :  { %s4304_s20 = sld [smem:[%s4641_s0 + %s4142_s15]]   ;;  %s4146_s15 = smov 27  }
  0x21   :  { %4653 = sst [smem:[#allocation52_spill]] %s4289_s27 }
  0x22   :  { %s4309_s27 = sld [smem:[%s4641_s0 + %s4143_s22]]   ;;  %s4147_s22 = smov 28  }
  0x23   :  { %4654 = sst [smem:[#allocation53_spill]] %s4294_s4 }
  0x24   :  { %s4314_s4 = sld [smem:[%s4641_s0 + %s4144_s28]]   ;;  %s4148_s28 = smov 29  }
  0x25   :  { %s4319_s24 = sld [smem:[%s4641_s0 + %s4145_s7]]   ;;  %s4149_s7 = smov 30  }
  0x26   :  { %4655 = sst [smem:[#allocation54_spill]] %s4304_s20 }
  0x27   :  { %s4324_s20 = sld [smem:[%s4641_s0 + %s4146_s15]]   ;;  %s4150_s15 = smov 31  }
  0x28   :  { %4656 = sst [smem:[#allocation55_spill]] %s4309_s27 }
  0x29   :  { %s4329_s27 = sld [smem:[%s4641_s0 + %s4147_s22]]   ;;  %s4151_s22 = smov 32  }
  0x2a   :  { %4657 = sst [smem:[#allocation56_spill]] %s4314_s4 }
  0x2b   :  { %s4334_s4 = sld [smem:[%s4641_s0 + %s4148_s28]]  }
  0x2c   :  { %s4339_s17 = sld [smem:[%s4641_s0 + %s4149_s7]]  }
  0x2d   :  { %4658 = sst [smem:[#allocation57_spill]] %s4324_s20 }
  0x2e   :  { %s4344_s20 = sld [smem:[%s4641_s0 + %s4150_s15]]  }
  0x2f   :  { %4659 = sst [smem:[#allocation58_spill]] %s4329_s27 }
  0x30   :  { %s4349_s27 = sld [smem:[%s4641_s0 + %s4151_s22]]  }
  0x31   :  { %71 = vsyncpa [#allocation3], 0 }
  0x32   :  { %72 = vsyncpa [#allocation6], 0 }
  0x33   :  { %73 = vsyncpa [#allocation9], 0 }
  0x34   :  { %74 = vsyncpa [#allocation12], 0 }
  0x35   :  { %75 = vsyncpa [#allocation15], 0 }
  0x36   :  { %76 = vsyncpa [#allocation18], 0 }
  0x37   :  { %77 = vsyncpa [#allocation21], 0 }
  0x38   :  { %78 = vsyncpa [#allocation24], 0 }
  0x39   :  { %79 = vsyncpa [#allocation27], 0 }
  0x3a   :  { %80 = vsyncpa [#allocation4], 0 }
  0x3b   :  { %81 = vsyncpa [#allocation31], 0  ;;  %s4152_s28 = smov [#allocation5]   ;;  %s4153_s2 = smov [#allocation8]  }
  0x3c   :  { %s98_s1 = sshll.u32 %s4152_s28, 4  ;;  %s120_s7 = sshll.u32 %s4153_s2, 4  ;;  %s99_s1 = int_to_ptr.vmem [resolvable:$true] %s98_s1  ;;  %s121_s7 = int_to_ptr.vmem [resolvable:$true] %s120_s7 }
  0x3d   :  { %s3658_s0 = scalar_lea.hbm %s4194_s9, 128 }
  0x3e   :  { %p3659_p0 = scmp.ne.s32.totalorder %s4194_s9, %s3658_s0  ;;  %p3662_p1 = scmp.lt.u32.totalorder %s3658_s0, %s4194_s9 }
  0x40   :  { %p3664_p2 = pnand %p3662_p1, %p3659_p0 }
  0x42   :  { %3667 = shalt.err (!%p3664_p2)
}
  0x43   :  { %s3668_s10 = scalar_lea.vmem %s99_s1, 128  ;;  %p3673_p4 = scmp.lt.s32.totalorder %s99_s1, %s99_s1 }
  0x44   :  { %p3669_p3 = scmp.ne.s32.totalorder %s99_s1, %s3668_s10  ;;  %p3674_p5 = scmp.lt.s32.totalorder %s3668_s10, %s3668_s10 }
  0x46   :  { %p3675_p6 = por %p3674_p5, %p3673_p4 }
  0x48   :  { %p3676_p7 = pnand %p3675_p6, %p3669_p3 }
  0x4a   :  { %3679 = shalt.err (!%p3676_p7)
}
  0x4b   :  { %101 = dma.hbm_to_vmem [thread:$0]  %s4194_s9, 128, %s99_s1, [#allocation6]  }
  0x4c   :  { %s3680_s11 = scalar_lea.hbm %s4209_s21, 128 }
  0x4d   :  { %p3681_p8 = scmp.ne.s32.totalorder %s4209_s21, %s3680_s11  ;;  %p3684_p9 = scmp.lt.u32.totalorder %s3680_s11, %s4209_s21 }
  0x4f   :  { %p3686_p10 = pnand %p3684_p9, %p3681_p8 }
  0x51   :  { %3689 = shalt.err (!%p3686_p10)
}
  0x52   :  { %s3690_s15 = scalar_lea.vmem %s121_s7, 128  ;;  %p3695_p12 = scmp.lt.s32.totalorder %s121_s7, %s121_s7 }
  0x53   :  { %p3691_p11 = scmp.ne.s32.totalorder %s121_s7, %s3690_s15  ;;  %p3696_p13 = scmp.lt.s32.totalorder %s3690_s15, %s3690_s15 }
  0x55   :  { %p3697_p0 = por %p3696_p13, %p3695_p12 }
  0x57   :  { %p3698_p1 = pnand %p3697_p0, %p3691_p11 }
  0x59   :  { %3701 = shalt.err (!%p3698_p1)
}
  0x5a   :  { %123 = dma.hbm_to_vmem [thread:$0]  %s4209_s21, 128, %s121_s7, [#allocation9]  }
  0x5b   :  { %s4154_s16 = smov [#allocation11]   ;;  %s4155_s9 = smov [#allocation14]  }
  0x5c   :  { %s140_s18 = sshll.u32 %s4154_s16, 4  ;;  %s159_s22 = sshll.u32 %s4155_s9, 4  ;;  %s141_s18 = int_to_ptr.vmem [resolvable:$true] %s140_s18  ;;  %s4359_s22 = int_to_ptr.vmem [resolvable:$true] %s159_s22 }
  0x5d   :  { %s3702_s23 = scalar_lea.hbm %s4219_s29, 512 }
  0x5e   :  { %p3703_p2 = scmp.ne.s32.totalorder %s4219_s29, %s3702_s23  ;;  %p3706_p3 = scmp.lt.u32.totalorder %s3702_s23, %s4219_s29 }
  0x60   :  { %p3708_p4 = pnand %p3706_p3, %p3703_p2 }
  0x62   :  { %3711 = shalt.err (!%p3708_p4)
}
  0x63   :  { %s3712_s26 = scalar_lea.vmem %s141_s18, 512  ;;  %p3717_p6 = scmp.lt.s32.totalorder %s141_s18, %s141_s18 }
  0x64   :  { %p3713_p5 = scmp.ne.s32.totalorder %s141_s18, %s3712_s26  ;;  %p3718_p7 = scmp.lt.s32.totalorder %s3712_s26, %s3712_s26 }
  0x66   :  { %p3719_p8 = por %p3718_p7, %p3717_p6 }
  0x68   :  { %p3720_p9 = pnand %p3719_p8, %p3713_p5 }
  0x6a   :  { %3723 = shalt.err (!%p3720_p9)
}
  0x6b   :  { %143 = dma.hbm_to_vmem [thread:$0]  %s4219_s29, 512, %s141_s18, [#allocation12]  }
  0x6c   :  { %s3724_s21 = scalar_lea.hbm %s4229_s8, 2048 }
  0x6d   :  { %p3725_p10 = scmp.ne.s32.totalorder %s4229_s8, %s3724_s21  ;;  %p3728_p11 = scmp.lt.u32.totalorder %s3724_s21, %s4229_s8 }
  0x6f   :  { %p3730_p12 = pnand %p3728_p11, %p3725_p10 }
  0x71   :  { %3733 = shalt.err (!%p3730_p12)
}
  0x72   :  { %s3734_s28 = scalar_lea.vmem %s4359_s22, 2048  ;;  %p3739_p0 = scmp.lt.s32.totalorder %s4359_s22, %s4359_s22 }
  0x73   :  { %p3735_p13 = scmp.ne.s32.totalorder %s4359_s22, %s3734_s28  ;;  %p3740_p1 = scmp.lt.s32.totalorder %s3734_s28, %s3734_s28 }
  0x75   :  { %p3741_p2 = por %p3740_p1, %p3739_p0 }
  0x77   :  { %p3742_p3 = pnand %p3741_p2, %p3735_p13 }
  0x79   :  { %3745 = shalt.err (!%p3742_p3)
}
  0x7a   :  { %s4156_s1 = smov 128   ;;  %s4157_s29 = smov 8  }
  0x7b   :  { %165 = dma.hbm_to_vmem [thread:$0]  %s4229_s8, 2048, %s4359_s22, [#allocation15], %s4156_s1, %s4156_s1, %s4157_s29  }
  0x7c   :  { %s4158_s2 = smov [#allocation17]   ;;  %s4159_s0 = smov [#allocation20]  }
  0x7d   :  { %s181_s7 = sshll.u32 %s4158_s2, 4  ;;  %s209_s10 = sshll.u32 %s4159_s0, 4  ;;  %s182_s7 = int_to_ptr.vmem [resolvable:$true] %s181_s7  ;;  %s4377_s10 = int_to_ptr.vmem [resolvable:$true] %s209_s10 }
  0x7e   :  { %s3746_s11 = scalar_lea.hbm %s4239_s19, 2048 }
  0x7f   :  { %p3747_p4 = scmp.ne.s32.totalorder %s4239_s19, %s3746_s11  ;;  %p3750_p5 = scmp.lt.u32.totalorder %s3746_s11, %s4239_s19 }
  0x81   :  { %p3752_p6 = pnand %p3750_p5, %p3747_p4 }
  0x83   :  { %3755 = shalt.err (!%p3752_p6)
}
  0x84   :  { %s3756_s15 = scalar_lea.vmem %s182_s7, 2048  ;;  %p3761_p8 = scmp.lt.s32.totalorder %s182_s7, %s182_s7 }
  0x85   :  { %p3757_p7 = scmp.ne.s32.totalorder %s182_s7, %s3756_s15  ;;  %p3762_p9 = scmp.lt.s32.totalorder %s3756_s15, %s3756_s15 }
  0x87   :  { %p3763_p10 = por %p3762_p9, %p3761_p8 }
  0x89   :  { %p3764_p11 = pnand %p3763_p10, %p3757_p7 }
  0x8b   :  { %3767 = shalt.err (!%p3764_p11)
}
  0x8c   :  { %187 = dma.hbm_to_vmem [thread:$0]  %s4239_s19, 2048, %s182_s7, [#allocation18], %s4156_s1, %s4156_s1, %s4157_s29  }
  0x8d   :  { %s3768_s8 = scalar_lea.hbm %s4259_s12, 4096 }
  0x8e   :  { %p3769_p12 = scmp.ne.s32.totalorder %s4259_s12, %s3768_s8  ;;  %p3772_p13 = scmp.lt.u32.totalorder %s3768_s8, %s4259_s12 }
  0x90   :  { %p3774_p0 = pnand %p3772_p13, %p3769_p12 }
  0x92   :  { %3777 = shalt.err (!%p3774_p0)
}
  0x93   :  { %s3778_s16 = scalar_lea.vmem %s4377_s10, 4096  ;;  %p3783_p2 = scmp.lt.s32.totalorder %s4377_s10, %s4377_s10 }
  0x94   :  { %p3779_p1 = scmp.ne.s32.totalorder %s4377_s10, %s3778_s16  ;;  %p3784_p3 = scmp.lt.s32.totalorder %s3778_s16, %s3778_s16 }
  0x96   :  { %p3785_p4 = por %p3784_p3, %p3783_p2 }
  0x98   :  { %p3786_p5 = pnand %p3785_p4, %p3779_p1 }
  0x9a   :  { %3789 = shalt.err (!%p3786_p5)
}
  0x9b   :  { %s4160_s18 = smov 256   ;;  %s4161_s19 = smov 16  }
  0x9c   :  { %215 = dma.hbm_to_vmem [thread:$0]  %s4259_s12, 4096, %s4377_s10, [#allocation21], %s4160_s18, %s4160_s18, %s4161_s19  }
  0x9d   :  { %s4162_s9 = smov [#allocation23]   ;;  %s3790_s23 = scalar_lea.hbm %s4299_s6, 16384 }
  0x9e   :  { %s245_s22 = sshll.u32 %s4162_s9, 4  ;;  %p3791_p6 = scmp.ne.s32.totalorder %s4299_s6, %s3790_s23  ;;  %s246_s22 = int_to_ptr.vmem [resolvable:$true] %s245_s22 }
  0x9f   :  { %p3794_p7 = scmp.lt.u32.totalorder %s3790_s23, %s4299_s6 }
  0xa1   :  { %p3796_p8 = pnand %p3794_p7, %p3791_p6 }
  0xa3   :  { %3799 = shalt.err (!%p3796_p8)
}
  0xa4   :  { %s3800_s26 = scalar_lea.vmem %s246_s22, 16384  ;;  %p3805_p10 = scmp.lt.s32.totalorder %s246_s22, %s246_s22 }
  0xa5   :  { %p3801_p9 = scmp.ne.s32.totalorder %s246_s22, %s3800_s26  ;;  %p3806_p11 = scmp.lt.s32.totalorder %s3800_s26, %s3800_s26 }
  0xa7   :  { %p3807_p12 = por %p3806_p11, %p3805_p10 }
  0xa9   :  { %p3808_p13 = pnand %p3807_p12, %p3801_p9 }
  0xab   :  { %3811 = shalt.err (!%p3808_p13)
}
  0xac   :  { %s4163_s21 = smov 512   ;;  %s4164_s12 = smov 32  }
  0xad   :  { %251 = dma.hbm_to_vmem [thread:$0]  %s4299_s6, 16384, %s246_s22, [#allocation24], %s4163_s21, %s4163_s21, %s4164_s12  }
  0xae   :  { %s4165_s28 = smov [#allocation26]   ;;  %s4166_s7 = smov [#allocation2]  }
  0xaf   :  { %s273_s2 = sshll.u32 %s4165_s28, 4  ;;  %s88_s0 = sshll.u32 %s4166_s7, 4  ;;  %s274_s2 = int_to_ptr.vmem [resolvable:$true] %s273_s2  ;;  %s89_s0 = int_to_ptr.vmem [resolvable:$true] %s88_s0 }
  0xb0   :  { %s3812_s10 = scalar_lea.hbm %s4319_s24, 16384 }
  0xb1   :  { %p3813_p0 = scmp.ne.s32.totalorder %s4319_s24, %s3812_s10  ;;  %p3816_p1 = scmp.lt.u32.totalorder %s3812_s10, %s4319_s24 }
  0xb3   :  { %p3818_p2 = pnand %p3816_p1, %p3813_p0 }
  0xb5   :  { %3821 = shalt.err (!%p3818_p2)
}
  0xb6   :  { %s3822_s11 = scalar_lea.vmem %s274_s2, 16384  ;;  %p3827_p4 = scmp.lt.s32.totalorder %s274_s2, %s274_s2 }
  0xb7   :  { %p3823_p3 = scmp.ne.s32.totalorder %s274_s2, %s3822_s11  ;;  %p3828_p5 = scmp.lt.s32.totalorder %s3822_s11, %s3822_s11 }
  0xb9   :  { %p3829_p6 = por %p3828_p5, %p3827_p4 }
  0xbb   :  { %p3830_p7 = pnand %p3829_p6, %p3823_p3 }
  0xbd   :  { %3833 = shalt.err (!%p3830_p7)
}
  0xbe   :  { %279 = dma.hbm_to_vmem [thread:$0]  %s4319_s24, 16384, %s274_s2, [#allocation27], %s4163_s21, %s4163_s21, %s4164_s12  }
  0xbf   :  { %s3834_s6 = scalar_lea.hbm %s4189_s5, 128 }
  0xc0   :  { %p3835_p8 = scmp.ne.s32.totalorder %s4189_s5, %s3834_s6  ;;  %p3838_p9 = scmp.lt.u32.totalorder %s3834_s6, %s4189_s5 }
  0xc2   :  { %p3840_p10 = pnand %p3838_p9, %p3835_p8 }
  0xc4   :  { %3843 = shalt.err (!%p3840_p10)
}
  0xc5   :  { %s3844_s15 = scalar_lea.vmem %s89_s0, 128  ;;  %p3849_p12 = scmp.lt.s32.totalorder %s89_s0, %s89_s0 }
  0xc6   :  { %p3845_p11 = scmp.ne.s32.totalorder %s89_s0, %s3844_s15  ;;  %p3850_p13 = scmp.lt.s32.totalorder %s3844_s15, %s3844_s15 }
  0xc8   :  { %p3851_p0 = por %p3850_p13, %p3849_p12 }
  0xca   :  { %p3852_p1 = pnand %p3851_p0, %p3845_p11 }
  0xcc   :  { %3855 = shalt.err (!%p3852_p1)
}
  0xcd   :  { %91 = dma.hbm_to_vmem [thread:$0]  %s4189_s5, 128, %s89_s0, [#allocation3]  }
  0xce   :  { %s4167_s8 = smov [#allocation7]   ;;  %s4168_s16 = smov [#allocation10]  }
  0xcf   :  { %s108_s24 = sshll.u32 %s4167_s8, 4  ;;  %s130_s9 = sshll.u32 %s4168_s16, 4  ;;  %s109_s24 = int_to_ptr.vmem [resolvable:$true] %s108_s24  ;;  %s131_s9 = int_to_ptr.vmem [resolvable:$true] %s130_s9 }
  0xd0   :  { %s3856_s22 = scalar_lea.hbm %s4199_s13, 512 }
  0xd1   :  { %p3857_p2 = scmp.ne.s32.totalorder %s4199_s13, %s3856_s22  ;;  %p3860_p3 = scmp.lt.u32.totalorder %s3856_s22, %s4199_s13 }
  0xd3   :  { %p3862_p4 = pnand %p3860_p3, %p3857_p2 }
  0xd5   :  { %3865 = shalt.err (!%p3862_p4)
}
  0xd6   :  { %s3866_s23 = scalar_lea.vmem %s109_s24, 512  ;;  %p3871_p6 = scmp.lt.s32.totalorder %s109_s24, %s109_s24 }
  0xd7   :  { %p3867_p5 = scmp.ne.s32.totalorder %s109_s24, %s3866_s23  ;;  %p3872_p7 = scmp.lt.s32.totalorder %s3866_s23, %s3866_s23 }
  0xd9   :  { %p3873_p8 = por %p3872_p7, %p3871_p6 }
  0xdb   :  { %p3874_p9 = pnand %p3873_p8, %p3867_p5 }
  0xdd   :  { %3877 = shalt.err (!%p3874_p9)
}
  0xde   :  { %111 = dma.hbm_to_vmem [thread:$0]  %s4199_s13, 512, %s109_s24, [#allocation6]  }
  0xdf   :  { %s3878_s5 = scalar_lea.hbm %s4214_s25, 512 }
  0xe0   :  { %p3879_p10 = scmp.ne.s32.totalorder %s4214_s25, %s3878_s5  ;;  %p3882_p11 = scmp.lt.u32.totalorder %s3878_s5, %s4214_s25 }
  0xe2   :  { %p3884_p12 = pnand %p3882_p11, %p3879_p10 }
  0xe4   :  { %3887 = shalt.err (!%p3884_p12)
}
  0xe5   :  { %s3888_s26 = scalar_lea.vmem %s131_s9, 512  ;;  %p3893_p0 = scmp.lt.s32.totalorder %s131_s9, %s131_s9 }
  0xe6   :  { %p3889_p13 = scmp.ne.s32.totalorder %s131_s9, %s3888_s26  ;;  %p3894_p1 = scmp.lt.s32.totalorder %s3888_s26, %s3888_s26 }
  0xe8   :  { %p3895_p2 = por %p3894_p1, %p3893_p0 }
  0xea   :  { %p3896_p3 = pnand %p3895_p2, %p3889_p13 }
  0xec   :  { %3899 = shalt.err (!%p3896_p3)
}
  0xed   :  { %133 = dma.hbm_to_vmem [thread:$0]  %s4214_s25, 512, %s131_s9, [#allocation9]  }
  0xee   :  { %s4169_s28 = smov [#allocation13]   ;;  %s4170_s2 = smov [#allocation16]  }
  0xef   :  { %s150_s13 = sshll.u32 %s4169_s28, 4  ;;  %s172_s7 = sshll.u32 %s4170_s2, 4  ;;  %s151_s13 = int_to_ptr.vmem [resolvable:$true] %s150_s13  ;;  %s173_s7 = int_to_ptr.vmem [resolvable:$true] %s172_s7 }
  0xf0   :  { %s3900_s0 = scalar_lea.hbm %s4224_s3, 512 }
  0xf1   :  { %p3901_p4 = scmp.ne.s32.totalorder %s4224_s3, %s3900_s0  ;;  %p3904_p5 = scmp.lt.u32.totalorder %s3900_s0, %s4224_s3 }
  0xf3   :  { %p3906_p6 = pnand %p3904_p5, %p3901_p4 }
  0xf5   :  { %3909 = shalt.err (!%p3906_p6)
}
  0xf6   :  { %s3910_s10 = scalar_lea.vmem %s151_s13, 512  ;;  %p3915_p8 = scmp.lt.s32.totalorder %s151_s13, %s151_s13 }
  0xf7   :  { %p3911_p7 = scmp.ne.s32.totalorder %s151_s13, %s3910_s10  ;;  %p3916_p9 = scmp.lt.s32.totalorder %s3910_s10, %s3910_s10 }
  0xf9   :  { %p3917_p10 = por %p3916_p9, %p3915_p8 }
  0xfb   :  { %p3918_p11 = pnand %p3917_p10, %p3911_p7 }
  0xfd   :  { %3921 = shalt.err (!%p3918_p11)
}
  0xfe   :  { %153 = dma.hbm_to_vmem [thread:$0]  %s4224_s3, 512, %s151_s13, [#allocation12]  }
  0xff   :  { %s3922_s25 = scalar_lea.hbm %s4234_s14, 16 }
 0x100   :  { %p3923_p12 = scmp.ne.s32.totalorder %s4234_s14, %s3922_s25  ;;  %p3926_p13 = scmp.lt.u32.totalorder %s3922_s25, %s4234_s14 }
 0x102   :  { %p3928_p0 = pnand %p3926_p13, %p3923_p12 }
 0x104   :  { %3931 = shalt.err (!%p3928_p0)
}
 0x105   :  { %s3932_s11 = scalar_lea.vmem %s173_s7, 16  ;;  %s3936_s6 = scalar_lea.vmem %s173_s7, 32 }
 0x106   :  { %p3933_p1 = scmp.ne.s32.totalorder %s173_s7, %s3932_s11  ;;  %p3937_p2 = scmp.lt.s32.totalorder %s173_s7, %s173_s7 }
 0x107   :  { %p3938_p3 = scmp.lt.s32.totalorder %s3936_s6, %s3932_s11 }
 0x109   :  { %p3939_p4 = por %p3938_p3, %p3937_p2 }
 0x10b   :  { %p3940_p5 = pnand %p3939_p4, %p3933_p1 }
 0x10d   :  { %3943 = shalt.err (!%p3940_p5)
}
 0x10e   :  { %175 = dma.hbm_to_vmem [thread:$0]  %s4234_s14, 16, %s173_s7, [#allocation15]  }
 0x10f   :  { %s4171_s3 = smov [#allocation19]   ;;  %s4172_s8 = smov [#allocation22]  }
 0x110   :  { %s195_s15 = sshll.u32 %s4171_s3, 4  ;;  %s227_s24 = sshll.u32 %s4172_s8, 4  ;;  %s196_s15 = int_to_ptr.vmem [resolvable:$true] %s195_s15  ;;  %s228_s24 = int_to_ptr.vmem [resolvable:$true] %s227_s24 }
 0x111   :  { %s3944_s16 = scalar_lea.hbm %s4249_s30, 2048 }
 0x112   :  { %p3945_p6 = scmp.ne.s32.totalorder %s4249_s30, %s3944_s16  ;;  %p3948_p7 = scmp.lt.u32.totalorder %s3944_s16, %s4249_s30 }
 0x114   :  { %p3950_p8 = pnand %p3948_p7, %p3945_p6 }
 0x116   :  { %3953 = shalt.err (!%p3950_p8)
}
 0x117   :  { %s3954_s9 = scalar_lea.vmem %s196_s15, 2048  ;;  %p3959_p10 = scmp.lt.s32.totalorder %s196_s15, %s196_s15 }
 0x118   :  { %p3955_p9 = scmp.ne.s32.totalorder %s196_s15, %s3954_s9  ;;  %p3960_p11 = scmp.lt.s32.totalorder %s3954_s9, %s3954_s9 }
 0x11a   :  { %p3961_p12 = por %p3960_p11, %p3959_p10 }
 0x11c   :  { %p3962_p13 = pnand %p3961_p12, %p3955_p9 }
 0x11e   :  { %3965 = shalt.err (!%p3962_p13)
}
 0x11f   :  { %s4660_s14 = sld [smem:[#allocation50_spill]] }
 0x120   :  { %201 = dma.hbm_to_vmem [thread:$0]  %s4249_s30, 2048, %s196_s15, [#allocation18], %s4156_s1, %s4156_s1, %s4157_s29  }
 0x125   :  { %s3966_s22 = scalar_lea.hbm %s4660_s14, 8192 }
 0x126   :  { %p3967_p0 = scmp.ne.s32.totalorder %s4660_s14, %s3966_s22  ;;  %p3970_p1 = scmp.lt.u32.totalorder %s3966_s22, %s4660_s14 }
 0x128   :  { %p3972_p2 = pnand %p3970_p1, %p3967_p0 }
 0x12a   :  { %3975 = shalt.err (!%p3972_p2)
}
 0x12b   :  { %s3976_s23 = scalar_lea.vmem %s228_s24, 8192  ;;  %p3981_p4 = scmp.lt.s32.totalorder %s228_s24, %s228_s24 }
 0x12c   :  { %p3977_p3 = scmp.ne.s32.totalorder %s228_s24, %s3976_s23  ;;  %p3982_p5 = scmp.lt.s32.totalorder %s3976_s23, %s3976_s23 }
 0x12e   :  { %p3983_p6 = por %p3982_p5, %p3981_p4 }
 0x130   :  { %p3984_p7 = pnand %p3983_p6, %p3977_p3 }
 0x132   :  { %3987 = shalt.err (!%p3984_p7)
}
 0x133   :  { %s4661_s5 = sld [smem:[#allocation55_spill]]  ;;  %s4173_s30 = smov [#allocation25]  }
 0x134   :  { %233 = dma.hbm_to_vmem [thread:$0]  %s4660_s14, 8192, %s228_s24, [#allocation21], %s4160_s18, %s4160_s18, %s4161_s19  }
 0x135   :  { %s259_s1 = sshll.u32 %s4173_s30, 4  ;;  %s4174_s29 = smov [#allocation28]   ;;  %s260_s1 = int_to_ptr.vmem [resolvable:$true] %s259_s1 }
 0x136   :  { %s287_s26 = sshll.u32 %s4174_s29, 4  ;;  %s288_s26 = int_to_ptr.vmem [resolvable:$true] %s287_s26 }
 0x139   :  { %s3988_s28 = scalar_lea.hbm %s4661_s5, 16384 }
 0x13a   :  { %p3989_p8 = scmp.ne.s32.totalorder %s4661_s5, %s3988_s28  ;;  %p3992_p9 = scmp.lt.u32.totalorder %s3988_s28, %s4661_s5 }
 0x13c   :  { %p3994_p10 = pnand %p3992_p9, %p3989_p8 }
 0x13e   :  { %3997 = shalt.err (!%p3994_p10)
}
 0x13f   :  { %s3998_s13 = scalar_lea.vmem %s260_s1, 16384  ;;  %p4003_p12 = scmp.lt.s32.totalorder %s260_s1, %s260_s1 }
 0x140   :  { %p3999_p11 = scmp.ne.s32.totalorder %s260_s1, %s3998_s13  ;;  %p4004_p13 = scmp.lt.s32.totalorder %s3998_s13, %s3998_s13 }
 0x142   :  { %p4005_p0 = por %p4004_p13, %p4003_p12 }
 0x144   :  { %p4006_p1 = pnand %p4005_p0, %p3999_p11 }
 0x146   :  { %4009 = shalt.err (!%p4006_p1)
}
 0x147   :  { %s4662_s18 = sld [smem:[#allocation58_spill]] }
 0x148   :  { %265 = dma.hbm_to_vmem [thread:$0]  %s4661_s5, 16384, %s260_s1, [#allocation24], %s4163_s21, %s4163_s21, %s4164_s12  }
 0x14d   :  { %s4010_s19 = scalar_lea.hbm %s4662_s18, 16384 }
 0x14e   :  { %p4011_p2 = scmp.ne.s32.totalorder %s4662_s18, %s4010_s19  ;;  %p4014_p3 = scmp.lt.u32.totalorder %s4010_s19, %s4662_s18 }
 0x150   :  { %p4016_p4 = pnand %p4014_p3, %p4011_p2 }
 0x152   :  { %4019 = shalt.err (!%p4016_p4)
}
 0x153   :  { %s4020_s2 = scalar_lea.vmem %s288_s26, 16384  ;;  %p4025_p6 = scmp.lt.s32.totalorder %s288_s26, %s288_s26 }
 0x154   :  { %p4021_p5 = scmp.ne.s32.totalorder %s288_s26, %s4020_s2  ;;  %p4026_p7 = scmp.lt.s32.totalorder %s4020_s2, %s4020_s2 }
 0x156   :  { %p4027_p8 = por %p4026_p7, %p4025_p6 }
 0x158   :  { %p4028_p9 = pnand %p4027_p8, %p4021_p5 }
 0x15a   :  { %4031 = shalt.err (!%p4028_p9)
}
 0x15b   :  { %293 = dma.hbm_to_vmem [thread:$0]  %s4662_s18, 16384, %s288_s26, [#allocation27], %s4163_s21, %s4163_s21, %s4164_s12  }
 0x15c   :  { %4098 = dma.done.wait [#allocation3], 128  }
 0x15d   :  { %4099 = vsyncadd [#allocation3], 4294967168 }
 0x15e   :  { %4100 = dma.done.wait [#allocation6], 640  }
 0x15f   :  { %4101 = vsyncadd [#allocation6], 4294966656 }
 0x160   :  { %4102 = dma.done.wait [#allocation9], 640  }
 0x161   :  { %4103 = vsyncadd [#allocation9], 4294966656 }
 0x162   :  { %4104 = dma.done.wait [#allocation12], 1024  }
 0x163   :  { %4105 = vsyncadd [#allocation12], 4294966272 }
 0x164   :  { %4106 = dma.done.wait [#allocation15], 2064  }
 0x165   :  { %4107 = vsyncadd [#allocation15], 4294965232 }
 0x166   :  { %4108 = dma.done.wait [#allocation18], 4096  }
 0x167   :  { %4109 = vsyncadd [#allocation18], 4294963200 }
 0x168   :  { %4110 = dma.done.wait [#allocation21], 12288  }
 0x169   :  { %4111 = vsyncadd [#allocation21], 4294955008 }
 0x16a   :  { %4112 = dma.done.wait [#allocation24], 32768  }
 0x16b   :  { %4113 = vsyncadd [#allocation24], 4294934528 }
 0x16c   :  { %4114 = dma.done.wait [#allocation27], 32768  }
 0x16d   :  { %4115 = vsyncadd [#allocation27], 4294934528  ;;  %v4175_v0 = vmov 0.0|0.0   ;;  %vm4176_vm0 = vmmov 0   ;;  %v4177_v1 = vmov 0.0   ;;  %v348_v2 = vld [vmem:[#allocation14] sm:$0xff] }
 0x16e   :  { %2853 = vmatprep.subr.bf16.mxu1 %v4175_v0  ;;  %2770 = vmatprep.mubr.msk.f32.mxu1 %vm4176_vm0, %v4177_v1  ;;  %v349_v3 = vld [vmem:[#allocation14 + $0x8] sm:$0xff]  ;;  %v350_v4 = vld [vmem:[#allocation14 + $0x10] sm:$0xff]  ;;  %v351_v6 = vld [vmem:[#allocation14 + $0x18] sm:$0xff]  ;;  %s4663_s21 = sld [smem:[#allocation45_spill]]  ;;  %s4664_s12 = sld [smem:[#allocation46_spill]]  ;;  %vm2538_vm11 = vcmask 64512  }
 0x16f   :  { %2901 = vmatprep.subr.bf16.mxu0 %v4175_v0  ;;  %2840 = vmatprep.mubr.msk.f32.mxu0 %vm4176_vm0, %v4177_v1  ;;  %v2854_v5 = vpack.c.bf16 %v349_v3, %v348_v2  ;;  %v2857_v7 = vpack.c.bf16 %v351_v6, %v350_v4  ;;  %v352_v8 = vld [vmem:[#allocation14 + $0x20] sm:$0xff]  ;;  %v353_v9 = vld [vmem:[#allocation14 + $0x28] sm:$0xff]  ;;  %v537_v14 = vld [vmem:[#allocation19 + $0x10] sm:$0xff]  ;;  %s4665_s7 = sld [smem:[#allocation47_spill]]  ;;  %s4666_s0 = sld [smem:[#allocation48_spill]] }
 0x170   :  { %v535_v10 = vld [vmem:[#allocation19] sm:$0xff]  ;;  %v536_v11 = vld [vmem:[#allocation19 + $0x8] sm:$0xff]  ;;  %v2860_v12 = vpack.c.bf16 %v353_v9, %v352_v8  ;;  %v355_v16 = vld [vmem:[#allocation14 + $0x38] sm:$0xff]  ;;  %s4667_s10 = sld [smem:[#allocation49_spill]]  ;;  %s4668_s25 = sld [smem:[#allocation51_spill]] }
 0x171   :  { %2855 = vmatpush3.bf16.msra.mxu1 %v2854_v5  ;;  %v2902_v13 = vpack.c.bf16 %v536_v11, %v535_v10  ;;  %v354_v15 = vld [vmem:[#allocation14 + $0x30] sm:$0xff]  ;;  %v538_v17 = vld [vmem:[#allocation19 + $0x18] sm:$0xff]  ;;  %v539_v19 = vld [vmem:[#allocation19 + $0x20] sm:$0xff]  ;;  %s4669_s11 = sld [smem:[#allocation52_spill]]  ;;  %s4670_s6 = sld [smem:[#allocation53_spill]] }
 0x172   :  { %2856 = vmatprep.subr.bf16.mxu1 %v4175_v0  ;;  %v2905_v18 = vpack.c.bf16 %v538_v17, %v537_v14  ;;  %v540_v20 = vld [vmem:[#allocation19 + $0x28] sm:$0xff]  ;;  %v2863_v21 = vpack.c.bf16 %v355_v16, %v354_v15  ;;  %v356_v22 = vld [vmem:[#allocation14 + $0x40] sm:$0xff]  ;;  %v541_v25 = vld [vmem:[#allocation19 + $0x30] sm:$0xff]  ;;  %s4671_s3 = sld [smem:[#allocation54_spill]]  ;;  %s4672_s15 = sld [smem:[#allocation56_spill]] }
 0x173   :  { %2903 = vmatpush3.bf16.msra.mxu0 %v2902_v13  ;;  %v357_v23 = vld [vmem:[#allocation14 + $0x48] sm:$0xff]  ;;  %v2908_v24 = vpack.c.bf16 %v540_v20, %v539_v19  ;;  %v542_v26 = vld [vmem:[#allocation19 + $0x38] sm:$0xff]  ;;  %v358_v28 = vld [vmem:[#allocation14 + $0x50] sm:$0xff]  ;;  %s4673_s8 = sld [smem:[#allocation57_spill]]  ;;  %s4178_s24 = smov [#allocation30]  }
 0x174   :  { %2904 = vmatprep.subr.bf16.mxu0 %v4175_v0  ;;  %v2866_v27 = vpack.c.bf16 %v357_v23, %v356_v22  ;;  %v359_v29 = vld [vmem:[#allocation14 + $0x58] sm:$0xff]  ;;  %v2911_v30 = vpack.c.bf16 %v542_v26, %v541_v25  ;;  %v543_v31 = vld [vmem:[#allocation19 + $0x40] sm:$0xff]  ;;  %v544_v32 = vld [vmem:[#allocation19 + $0x48] sm:$0xff]  ;;  %s2606_s16 = sshll.u32 %s4178_s24, 4  ;;  %s4179_s9 = smov [#allocation29]   ;;  %s2607_s16 = int_to_ptr.vmem [resolvable:$true] %s2606_s16 }
 0x175   :  { %2858 = vmatpush3.bf16.msra.mxu1 %v2857_v7  ;;  %v2869_v33 = vpack.c.bf16 %v359_v29, %v358_v28  ;;  %v360_v34 = vld [vmem:[#allocation14 + $0x60] sm:$0xff]  ;;  %v361_v35 = vld [vmem:[#allocation14 + $0x68] sm:$0xff]  ;;  %v2914_v36 = vpack.c.bf16 %v544_v32, %v543_v31  ;;  %v545_v37 = vld [vmem:[#allocation19 + $0x50] sm:$0xff]  ;;  %s2596_s14 = sshll.u32 %s4179_s9, 4  ;;  %s4180_s22 = smov [#allocation32]   ;;  %s4611_s14 = int_to_ptr.vmem [resolvable:$true] %s2596_s14 }
 0x176   :  { %2859 = vmatprep.subr.bf16.mxu1 %v4175_v0  ;;  %v546_v38 = vld [vmem:[#allocation19 + $0x58] sm:$0xff]  ;;  %v2872_v39 = vpack.c.bf16 %v361_v35, %v360_v34  ;;  %v362_v40 = vld [vmem:[#allocation14 + $0x70] sm:$0xff]  ;;  %v547_v43 = vld [vmem:[#allocation19 + $0x60] sm:$0xff]  ;;  %s2616_s23 = sshll.u32 %s4180_s22, 4  ;;  %s4032_s5 = scalar_lea.vmem %s2607_s16, 16  ;;  %s4617_s23 = int_to_ptr.vmem [resolvable:$true] %s2616_s23 }
 0x177   :  { %2906 = vmatpush3.bf16.msra.mxu0 %v2905_v18  ;;  %v363_v41 = vld [vmem:[#allocation14 + $0x78] sm:$0xff]  ;;  %v2917_v42 = vpack.c.bf16 %v546_v38, %v545_v37  ;;  %v548_v44 = vld [vmem:[#allocation19 + $0x68] sm:$0xff]  ;;  %v442_v46 = vld [vmem:[#allocation17] sm:$0xff]  ;;  %p4033_p10 = scmp.ne.s32.totalorder %s2607_s16, %s4032_s5  ;;  %s4036_s30 = scalar_lea.vmem %s2607_s16, 32 }
 0x178   :  { %2907 = vmatprep.subr.bf16.mxu0 %v4175_v0  ;;  %v2875_v45 = vpack.c.bf16 %v363_v41, %v362_v40  ;;  %v443_v47 = vld [vmem:[#allocation17 + $0x8] sm:$0xff]  ;;  %v2920_v48 = vpack.c.bf16 %v548_v44, %v547_v43  ;;  %v444_v51 = vld [vmem:[#allocation17 + $0x10] sm:$0xff]  ;;  %v445_v52 = vld [vmem:[#allocation17 + $0x18] sm:$0xff]  ;;  %p4037_p11 = scmp.lt.s32.totalorder %s2607_s16, %s2607_s16  ;;  %p4038_p12 = scmp.lt.s32.totalorder %s4036_s30, %s4032_s5 }
 0x179   :  { %2861 = vmatpush3.bf16.msra.mxu1 %v2860_v12  ;;  %v347_v49 = vld [vmem:[#allocation2] sm:$0xff]  ;;  %v2878_v50 = vpack.c.bf16 %v443_v47, %v442_v46  ;;  %v2881_v53 = vpack.c.bf16 %v445_v52, %v444_v51  ;;  %v448_v57 = vld [vmem:[#allocation17 + $0x30] sm:$0xff]  ;;  %v449_v58 = vld [vmem:[#allocation17 + $0x38] sm:$0xff] }
 0x17a   :  { %2862 = vmatprep.subr.bf16.mxu1 %v4175_v0  ;;  %v446_v54 = vld [vmem:[#allocation17 + $0x20] sm:$0xff]  ;;  %v447_v55 = vld [vmem:[#allocation17 + $0x28] sm:$0xff]  ;;  %v2887_v59 = vpack.c.bf16 %v449_v58, %v448_v57  ;;  %v452_v63 = vld [vmem:[#allocation17 + $0x50] sm:$0xff]  ;;  %p4039_p13 = por %p4038_p12, %p4037_p11 }
 0x17b   :  { %2909 = vmatpush3.bf16.msra.mxu0 %v2908_v24  ;;  %v2884_v56 = vpack.c.bf16 %v447_v55, %v446_v54  ;;  %v450_v60 = vld [vmem:[#allocation17 + $0x40] sm:$0xff]  ;;  %v451_v61 = vld [vmem:[#allocation17 + $0x48] sm:$0xff]  ;;  %v453_v2 = vld [vmem:[#allocation17 + $0x58] sm:$0xff] }
 0x17c   :  { %2910 = vmatprep.subr.bf16.mxu0 %v4175_v0  ;;  %v2890_v62 = vpack.c.bf16 %v451_v61, %v450_v60  ;;  %v2893_v3 = vpack.c.bf16 %v453_v2, %v452_v63  ;;  %v454_v4 = vld [vmem:[#allocation17 + $0x60] sm:$0xff]  ;;  %v455_v5 = vld [vmem:[#allocation17 + $0x68] sm:$0xff]  ;;  %v456_v7 = vld [vmem:[#allocation17 + $0x70] sm:$0xff]  ;;  %p4040_p0 = pnand %p4039_p13, %p4033_p10 }
 0x17d   :  { %2864 = vmatpush3.bf16.msra.mxu1 %v2863_v21  ;;  %v2896_v6 = vpack.c.bf16 %v455_v5, %v454_v4  ;;  %v457_v8 = vld [vmem:[#allocation17 + $0x78] sm:$0xff]  ;;  %v549_v9 = vld [vmem:[#allocation19 + $0x70] sm:$0xff]  ;;  %v654_v13 = vld [vmem:[#allocation20 + $0x8] sm:$0xff] }
 0x17e   :  { %2865 = vmatprep.subr.bf16.mxu1 %v4175_v0  ;;  %v2899_v10 = vpack.c.bf16 %v457_v8, %v456_v7  ;;  %v550_v11 = vld [vmem:[#allocation19 + $0x78] sm:$0xff]  ;;  %v653_v17 = vld [vmem:[#allocation20] sm:$0xff]  ;;  %v655_v18 = vld [vmem:[#allocation20 + $0x10] sm:$0xff] }
 0x17f   :  { %2912 = vmatpush3.bf16.msra.mxu0 %v2911_v30  ;;  %v2923_v12 = vpack.c.bf16 %v550_v11, %v549_v9  ;;  %v656_v14 = vld [vmem:[#allocation20 + $0x18] sm:$0xff]  ;;  %v658_v20 = vld [vmem:[#allocation20 + $0x28] sm:$0xff]  ;;  %v2927_v23 = vpack.c.bf16 %v655_v18, %v653_v17  ;;  %v657_v26 = vld [vmem:[#allocation20 + $0x20] sm:$0xff] }
 0x180   :  { %2913 = vmatprep.subr.bf16.mxu0 %v4175_v0  ;;  %v2925_v15 = vpack.c.bf16 %v656_v14, %v654_v13  ;;  %v2672_v16 = vld [vmem:[#allocation16] ss:$0 sm:$0xff]  ;;  %v662_v28 = vld [vmem:[#allocation20 + $0x48] sm:$0xff]  ;;  %v661_v32 = vld [vmem:[#allocation20 + $0x40] sm:$0xff] }
 0x181   :  { %2867 = vmatpush3.bf16.msra.mxu1 %v2866_v27  ;;  %v660_v21 = vld [vmem:[#allocation20 + $0x38] sm:$0xff]  ;;  %v659_v27 = vld [vmem:[#allocation20 + $0x30] sm:$0xff]  ;;  %v666_v35 = vld [vmem:[#allocation20 + $0x68] sm:$0xff] }
 0x182   :  { %2868 = vmatprep.subr.bf16.mxu1 %v4175_v0  ;;  %v2929_v25 = vpack.c.bf16 %v660_v21, %v658_v20  ;;  %v664_v29 = vld [vmem:[#allocation20 + $0x58] sm:$0xff]  ;;  %v2931_v30 = vpack.c.bf16 %v659_v27, %v657_v26  ;;  %v665_v38 = vld [vmem:[#allocation20 + $0x60] sm:$0xff]  ;;  %v670_v41 = vld [vmem:[#allocation20 + $0x88] sm:$0xff] }
 0x183   :  { %2915 = vmatpush3.bf16.msra.mxu0 %v2914_v36  ;;  %v2933_v31 = vpack.c.bf16 %v664_v29, %v662_v28  ;;  %v668_v36 = vld [vmem:[#allocation20 + $0x78] sm:$0xff]  ;;  %v669_v44 = vld [vmem:[#allocation20 + $0x80] sm:$0xff]  ;;  %v674_v47 = vld [vmem:[#allocation20 + $0xa8] sm:$0xff] }
 0x184   :  { %2916 = vmatprep.subr.bf16.mxu0 %v4175_v0  ;;  %v2937_v37 = vpack.c.bf16 %v668_v36, %v666_v35  ;;  %v675_v51 = vld [vmem:[#allocation20 + $0xb0] sm:$0xff]  ;;  %v678_v52 = vld [vmem:[#allocation20 + $0xc8] sm:$0xff]  ;;  %v2674_v4 = vld [vmem:[%s4664_s12] ss:$0 sm:$0xff] }
 0x185   :  { %2870 = vmatpush3.bf16.msra.mxu1 %v2869_v33  ;;  %v663_v33 = vld [vmem:[#allocation20 + $0x50] sm:$0xff]  ;;  %v682_v58 = vld [vmem:[#allocation20 + $0xe8] sm:$0xff]  ;;  %v847_v29 = vld [vmem:[#allocation22 + $0x38] sm:$0xff] }
 0x186   :  { %2871 = vmatprep.subr.bf16.mxu1 %v4175_v0  ;;  %v2935_v34 = vpack.c.bf16 %v663_v33, %v661_v32  ;;  %v679_v57 = vld [vmem:[#allocation20 + $0xd0] sm:$0xff]  ;;  %v845_v28 = vld [vmem:[#allocation22 + $0x28] sm:$0xff]  ;;  %v844_v32 = vld [vmem:[#allocation22 + $0x20] sm:$0xff] }
 0x187   :  { %2918 = vmatpush3.bf16.msra.mxu0 %v2917_v42  ;;  %v672_v42 = vld [vmem:[#allocation20 + $0x98] sm:$0xff]  ;;  %v683_v63 = vld [vmem:[#allocation20 + $0xf0] sm:$0xff]  ;;  %v849_v35 = vld [vmem:[#allocation22 + $0x48] sm:$0xff] }
 0x188   :  { %2919 = vmatprep.subr.bf16.mxu0 %v4175_v0  ;;  %v2941_v43 = vpack.c.bf16 %v672_v42, %v670_v41  ;;  %v628_v18 = vld [vmem:[#allocation8] sm:$0xff]  ;;  %v853_v41 = vld [vmem:[#allocation22 + $0x68] sm:$0xff] }
 0x189   :  { %2873 = vmatpush3.bf16.msra.mxu1 %v2872_v39  ;;  %v667_v39 = vld [vmem:[#allocation20 + $0x70] sm:$0xff]  ;;  %v851_v36 = vld [vmem:[#allocation22 + $0x58] sm:$0xff] }
 0x18a   :  { %2874 = vmatprep.subr.bf16.mxu1 %v4175_v0  ;;  %v2939_v40 = vpack.c.bf16 %v667_v39, %v665_v38  ;;  %v842_v27 = vld [vmem:[#allocation22 + $0x10] sm:$0xff]  ;;  %v848_v38 = vld [vmem:[#allocation22 + $0x40] sm:$0xff]  ;;  %v855_v42 = vld [vmem:[#allocation22 + $0x78] sm:$0xff] }
 0x18b   :  { %2921 = vmatpush3.bf16.msra.mxu0 %v2920_v48  ;;  %v676_v48 = vld [vmem:[#allocation20 + $0xb8] sm:$0xff]  ;;  %v846_v33 = vld [vmem:[#allocation22 + $0x30] sm:$0xff] }
 0x18c   :  { %2922 = vmatprep.subr.bf16.mxu0 %v4175_v0  ;;  %v850_v39 = vld [vmem:[#allocation22 + $0x50] sm:$0xff] }
 0x18d   :  { %2876 = vmatpush3.bf16.msra.mxu1 %v2875_v45  ;;  %v671_v45 = vld [vmem:[#allocation20 + $0x90] sm:$0xff] }
 0x18e   :  { %2877 = vmatprep.subr.bf16.mxu1 %v4175_v0  ;;  %v2943_v46 = vpack.c.bf16 %v671_v45, %v669_v44  ;;  %v852_v44 = vld [vmem:[#allocation22 + $0x60] sm:$0xff]  ;;  %v854_v45 = vld [vmem:[#allocation22 + $0x70] sm:$0xff] }
 0x18f   :  { %2924 = vmatpush3.bf16.msra.mxu0 %v2923_v12 }
 0x190   :  { %2771 = vmatmul.mubr.f32.vlgmr.msra.gmra.mrb[0].mxu1 %v347_v49  ;;  %v673_v49 = vld [vmem:[#allocation20 + $0xa0] sm:$0xff] }
 0x191   :  { %2879 = vmatpush3.bf16.msra.mxu1 %v2878_v50  ;;  %2805 = vmatprep.mubr.msk.f32.mxu1 %vm4176_vm0, %v4177_v1  ;;  %v2945_v50 = vpack.c.bf16 %v676_v48, %v674_v47  ;;  %v2947_v54 = vpack.c.bf16 %v675_v51, %v673_v49  ;;  %v857_v47 = vld [vmem:[#allocation22 + $0x88] sm:$0xff]  ;;  %v859_v48 = vld [vmem:[#allocation22 + $0x98] sm:$0xff]  ;;  %v858_v51 = vld [vmem:[#allocation22 + $0x90] sm:$0xff] }
 0x192   :  { %2880 = vmatprep.subr.bf16.mxu1 %v4175_v0  ;;  %v2973_v49 = vpack.c.bf16 %v859_v48, %v857_v47  ;;  %v899_v47 = vld [vmem:[#allocation22 + $0x1d8] sm:$0xff] }
 0x195   :  { %2882 = vmatpush3.bf16.msra.mxu1 %v2881_v53  ;;  %v680_v53 = vld [vmem:[#allocation20 + $0xd8] sm:$0xff] }
 0x196   :  { %2883 = vmatprep.subr.bf16.mxu1 %v4175_v0  ;;  %v2949_v55 = vpack.c.bf16 %v680_v53, %v678_v52  ;;  %v861_v53 = vld [vmem:[#allocation22 + $0xa8] sm:$0xff] }
 0x199   :  { %2885 = vmatpush3.bf16.msra.mxu1 %v2884_v56  ;;  %v677_v56 = vld [vmem:[#allocation20 + $0xc0] sm:$0xff] }
 0x19a   :  { %2886 = vmatprep.subr.bf16.mxu1 %v4175_v0  ;;  %v2951_v60 = vpack.c.bf16 %v679_v57, %v677_v56  ;;  %v860_v56 = vld [vmem:[#allocation22 + $0xa0] sm:$0xff]  ;;  %v862_v57 = vld [vmem:[#allocation22 + $0xb0] sm:$0xff] }
 0x19d   :  { %2888 = vmatpush3.bf16.msra.mxu1 %v2887_v59  ;;  %v684_v59 = vld [vmem:[#allocation20 + $0xf8] sm:$0xff] }
 0x19e   :  { %2889 = vmatprep.subr.bf16.mxu1 %v4175_v0  ;;  %v2953_v61 = vpack.c.bf16 %v684_v59, %v682_v58  ;;  %v2979_v58 = vpack.c.bf16 %v862_v57, %v860_v56  ;;  %v865_v59 = vld [vmem:[#allocation22 + $0xc8] sm:$0xff]  ;;  %v902_v56 = vld [vmem:[#allocation22 + $0x1f0] sm:$0xff] }
 0x1a1   :  { %2891 = vmatpush3.bf16.msra.mxu1 %v2890_v62  ;;  %v681_v62 = vld [vmem:[#allocation20 + $0xe0] sm:$0xff] }
 0x1a2   :  { %2892 = vmatprep.subr.bf16.mxu1 %v4175_v0  ;;  %v2955_v2 = vpack.c.bf16 %v683_v63, %v681_v62  ;;  %v864_v62 = vld [vmem:[#allocation22 + $0xc0] sm:$0xff]  ;;  %v866_v63 = vld [vmem:[#allocation22 + $0xd0] sm:$0xff] }
 0x1a5   :  { %2894 = vmatpush3.bf16.msra.mxu1 %v2893_v3  ;;  %v2673_v3 = vld [vmem:[%s4663_s21] ss:$0 sm:$0xff] }
 0x1a6   :  { %2895 = vmatprep.subr.bf16.mxu1 %v4175_v0 }
 0x1a9   :  { %2897 = vmatpush3.bf16.msra.mxu1 %v2896_v6 }
 0x1aa   :  { %2898 = vmatprep.subr.bf16.mxu1 %v4175_v0 }
 0x1ad   :  { %2900 = vmatpush3.bf16.msra.mxu1 %v2899_v10 }
 0x1ae   :  { %2926 = vmatprep.subr.bf16.mxu1 %v2925_v15 }
 0x263   :  { %v437_v19 = vpop.f32.mrb[0].mxu1 }
 0x264   :  { %v438_v22 = vadd.f32 %v2672_v16, %v437_v19  ;;  %v2772_v0 = vpop.f32.mrb[1].mxu1 }
 0x266   :  { %v441_v24 = vmax.f32 %v438_v22, 0.0 }
 0x268   :  { %2806 = vmatmul.mubr.f32.vlgmr.msra.gmra.mrb[2].mxu1 %v441_v24  ;;  %2841 = vmatmul.mubr.f32.vlgmr.msra.gmra.mrb[0].mxu0 %v441_v24  ;;  %v843_v24 = vld [vmem:[#allocation22 + $0x18] sm:$0xff] }
 0x269   :  { %2928 = vmatpush1.bf16.msra.mxu1 %v2927_v23  ;;  %761 = vmatprep.mubr.f32.mxu1 %v4177_v1  ;;  %v841_v23 = vld [vmem:[#allocation22 + $0x8] sm:$0xff] }
 0x26a   :  { %2930 = vmatprep.subr.bf16.mxu1 %v2929_v25  ;;  %v840_v25 = vld [vmem:[#allocation22] sm:$0xff]  ;;  %v2957_v26 = vpack.c.bf16 %v843_v24, %v841_v23  ;;  %v883_v23 = vld [vmem:[#allocation22 + $0x158] sm:$0xff] }
 0x26c   :  { %2958 = vmatprep.subr.bf16.mxu0 %v2957_v26  ;;  %v882_v26 = vld [vmem:[#allocation22 + $0x150] sm:$0xff] }
 0x26d   :  { %2932 = vmatpush1.bf16.msra.mxu1 %v2931_v30  ;;  %v2959_v30 = vpack.c.bf16 %v842_v27, %v840_v25  ;;  %v880_v25 = vld [vmem:[#allocation22 + $0x140] sm:$0xff] }
 0x26e   :  { %2934 = vmatprep.subr.bf16.mxu1 %v2933_v31  ;;  %v2961_v31 = vpack.c.bf16 %v847_v29, %v845_v28  ;;  %v2999_v27 = vpack.c.bf16 %v882_v26, %v880_v25  ;;  %v885_v28 = vld [vmem:[#allocation22 + $0x168] sm:$0xff]  ;;  %v887_v29 = vld [vmem:[#allocation22 + $0x178] sm:$0xff] }
 0x26f   :  { %2960 = vmatpush1.bf16.msra.mxu0 %v2959_v30  ;;  %v3001_v30 = vpack.c.bf16 %v887_v29, %v885_v28 }
 0x270   :  { %2962 = vmatprep.subr.bf16.mxu0 %v2961_v31  ;;  %v884_v31 = vld [vmem:[#allocation22 + $0x160] sm:$0xff] }
 0x271   :  { %2936 = vmatpush1.bf16.msra.mxu1 %v2935_v34  ;;  %v2963_v34 = vpack.c.bf16 %v846_v33, %v844_v32  ;;  %v886_v32 = vld [vmem:[#allocation22 + $0x170] sm:$0xff] }
 0x272   :  { %2938 = vmatprep.subr.bf16.mxu1 %v2937_v37  ;;  %v2965_v37 = vpack.c.bf16 %v851_v36, %v849_v35  ;;  %v3003_v33 = vpack.c.bf16 %v886_v32, %v884_v31  ;;  %v891_v35 = vld [vmem:[#allocation22 + $0x198] sm:$0xff] }
 0x273   :  { %2964 = vmatpush1.bf16.msra.mxu0 %v2963_v34  ;;  %v889_v34 = vld [vmem:[#allocation22 + $0x188] sm:$0xff] }
 0x274   :  { %2966 = vmatprep.subr.bf16.mxu0 %v2965_v37  ;;  %v3005_v36 = vpack.c.bf16 %v891_v35, %v889_v34  ;;  %v888_v37 = vld [vmem:[#allocation22 + $0x180] sm:$0xff] }
 0x275   :  { %2940 = vmatpush1.bf16.msra.mxu1 %v2939_v40  ;;  %v2967_v40 = vpack.c.bf16 %v850_v39, %v848_v38  ;;  %v890_v38 = vld [vmem:[#allocation22 + $0x190] sm:$0xff] }
 0x276   :  { %2942 = vmatprep.subr.bf16.mxu1 %v2941_v43  ;;  %v2969_v43 = vpack.c.bf16 %v855_v42, %v853_v41  ;;  %v3007_v39 = vpack.c.bf16 %v890_v38, %v888_v37  ;;  %v895_v41 = vld [vmem:[#allocation22 + $0x1b8] sm:$0xff] }
 0x277   :  { %2968 = vmatpush1.bf16.msra.mxu0 %v2967_v40  ;;  %v893_v40 = vld [vmem:[#allocation22 + $0x1a8] sm:$0xff] }
 0x278   :  { %2970 = vmatprep.subr.bf16.mxu0 %v2969_v43  ;;  %v3009_v42 = vpack.c.bf16 %v895_v41, %v893_v40  ;;  %v892_v43 = vld [vmem:[#allocation22 + $0x1a0] sm:$0xff] }
 0x279   :  { %2944 = vmatpush1.bf16.msra.mxu1 %v2943_v46  ;;  %v2971_v46 = vpack.c.bf16 %v854_v45, %v852_v44  ;;  %v894_v44 = vld [vmem:[#allocation22 + $0x1b0] sm:$0xff] }
 0x27a   :  { %2946 = vmatprep.subr.bf16.mxu1 %v2945_v50  ;;  %v856_v50 = vld [vmem:[#allocation22 + $0x80] sm:$0xff]  ;;  %v3011_v45 = vpack.c.bf16 %v894_v44, %v892_v43 }
 0x27b   :  { %2972 = vmatpush1.bf16.msra.mxu0 %v2971_v46  ;;  %v2975_v52 = vpack.c.bf16 %v858_v51, %v856_v50  ;;  %v897_v46 = vld [vmem:[#allocation22 + $0x1c8] sm:$0xff]  ;;  %v898_v50 = vld [vmem:[#allocation22 + $0x1d0] sm:$0xff] }
 0x27c   :  { %2974 = vmatprep.subr.bf16.mxu0 %v2973_v49  ;;  %v3013_v48 = vpack.c.bf16 %v899_v47, %v897_v46  ;;  %v896_v49 = vld [vmem:[#allocation22 + $0x1c0] sm:$0xff] }
 0x27d   :  { %2948 = vmatpush1.bf16.msra.mxu1 %v2947_v54  ;;  %v863_v54 = vld [vmem:[#allocation22 + $0xb8] sm:$0xff]  ;;  %v3015_v51 = vpack.c.bf16 %v898_v50, %v896_v49 }
 0x27e   :  { %2950 = vmatprep.subr.bf16.mxu1 %v2949_v55  ;;  %v2977_v55 = vpack.c.bf16 %v863_v54, %v861_v53  ;;  %v903_v53 = vld [vmem:[#allocation22 + $0x1f8] sm:$0xff]  ;;  %v900_v54 = vld [vmem:[#allocation22 + $0x1e0] sm:$0xff] }
 0x27f   :  { %2976 = vmatpush1.bf16.msra.mxu0 %v2975_v52  ;;  %v901_v52 = vld [vmem:[#allocation22 + $0x1e8] sm:$0xff]  ;;  %v3019_v57 = vpack.c.bf16 %v902_v56, %v900_v54 }
 0x280   :  { %2978 = vmatprep.subr.bf16.mxu0 %v2977_v55  ;;  %v3017_v55 = vpack.c.bf16 %v903_v53, %v901_v52 }
 0x281   :  { %2952 = vmatpush1.bf16.msra.mxu1 %v2951_v60  ;;  %v867_v60 = vld [vmem:[#allocation22 + $0xd8] sm:$0xff] }
 0x282   :  { %2954 = vmatprep.subr.bf16.mxu1 %v2953_v61  ;;  %v2981_v61 = vpack.c.bf16 %v867_v60, %v865_v59  ;;  %v1064_v59 = vld [vmem:[#allocation23 + $0x28] sm:$0xff]  ;;  %v1062_v60 = vld [vmem:[#allocation23 + $0x18] sm:$0xff] }
 0x283   :  { %2980 = vmatpush1.bf16.msra.mxu0 %v2979_v58  ;;  %v1060_v58 = vld [vmem:[#allocation23 + $0x8] sm:$0xff] }
 0x284   :  { %2982 = vmatprep.subr.bf16.mxu0 %v2981_v61  ;;  %v3021_v61 = vpack.c.bf16 %v1064_v59, %v1060_v58 }
 0x285   :  { %2956 = vmatpush1.bf16.msra.mxu1 %v2955_v2  ;;  %v2983_v2 = vpack.c.bf16 %v866_v63, %v864_v62  ;;  %v1066_v62 = vld [vmem:[#allocation23 + $0x38] sm:$0xff]  ;;  %v1059_v63 = vld [vmem:[#allocation23] sm:$0xff] }
 0x286   :  { %3022 = vmatprep.subr.bf16.mxu1 %v3021_v61  ;;  %v774_v61 = vld [vmem:[%s4666_s0] sm:$0x3] }
 0x287   :  { %2984 = vmatpush1.bf16.msra.mxu0 %v2983_v2  ;;  %v1063_v2 = vld [vmem:[#allocation23 + $0x20] sm:$0xff] }
 0x33b   :  { %v531_v5 = vpop.f32.mrb[2].mxu1  ;;  %v624_v6 = vpop.f32.mrb[0].mxu0 }
 0x33c   :  { %v532_v7 = vadd.f32 %v2673_v3, %v531_v5  ;;  %v625_v8 = vadd.f32 %v2674_v4, %v624_v6  ;;  %v2807_v9 = vpop.f32.mrb[3].mxu1  ;;  %v2842_v10 = vpop.f32.mrb[1].mxu0  ;;  %v869_v3 = vld [vmem:[#allocation22 + $0xe8] sm:$0xff]  ;;  %v871_v4 = vld [vmem:[#allocation22 + $0xf8] sm:$0xff]  ;;  %v868_v6 = vld [vmem:[#allocation22 + $0xe0] sm:$0xff] }
 0x33d   :  { %v2985_v5 = vpack.c.bf16 %v871_v4, %v869_v3  ;;  %v873_v9 = vld [vmem:[#allocation22 + $0x108] sm:$0xff]  ;;  %v875_v10 = vld [vmem:[#allocation22 + $0x118] sm:$0xff]  ;;  %v3085_v4 = vpack.c.bf16 %v1066_v62, %v1062_v60  ;;  %v775_v62 = vld [vmem:[%s4667_s10] sm:$0x3] }
 0x33e   :  { %v635_v11 = vmul.f32 %v532_v7, %v532_v7  ;;  %v629_v12 = vmul.f32 0.5, %v625_v8  ;;  %v634_v13 = vadd.f32 1.0, %v625_v8  ;;  %v637_v14 = vmul.f32 1.442695, %v625_v8  ;;  %v1068_v3 = vld [vmem:[#allocation23 + $0x48] sm:$0xff] }
 0x33f   :  { %2986 = vmatprep.subr.bf16.mxu0 %v2985_v5  ;;  %v3023_v5 = vpack.c.bf16 %v1063_v2, %v1059_v63 }
 0x340   :  { %v630_v15 = vmul.f32 1.442695, %v629_v12  ;;  %3594 = vpow2.f32 %v637_v14  ;;  %v636_v16 = vsub.f32 %v634_v13, %v635_v11  ;;  %v2989_v11 = vpack.c.bf16 %v875_v10, %v873_v9  ;;  %v872_v12 = vld [vmem:[#allocation22 + $0x100] sm:$0xff]  ;;  %v874_v13 = vld [vmem:[#allocation22 + $0x110] sm:$0xff] }
 0x341   :  { %v2991_v14 = vpack.c.bf16 %v874_v13, %v872_v12  ;;  %v1071_v9 = vld [vmem:[#allocation23 + $0x60] sm:$0xff] }
 0x342   :  { %3596 = vpow2.f32 %v630_v15  ;;  %v877_v15 = vld [vmem:[#allocation22 + $0x128] sm:$0xff] }
 0x34a   :  { %v3595_v17 = vpop.eup %3594 }
 0x34b   :  { %v4493_v19 = vsub.f32 %v636_v16, %v3595_v17  ;;  %v879_v16 = vld [vmem:[#allocation22 + $0x138] sm:$0xff] }
 0x34c   :  { %v3597_v20 = vpop.eup %3596  ;;  %v2993_v17 = vpack.c.bf16 %v879_v16, %v877_v15 }
 0x34d   :  { %v632_v21 = vmul.f32 %v3597_v20, %v628_v18  ;;  %v876_v18 = vld [vmem:[#allocation22 + $0x120] sm:$0xff]  ;;  %v878_v20 = vld [vmem:[#allocation22 + $0x130] sm:$0xff] }
 0x34f   :  { %v4495_v22 = vadd.f32 %v632_v21, %v532_v7  ;;  %v870_v7 = vld [vmem:[#allocation22 + $0xf0] sm:$0xff]  ;;  %v2995_v21 = vpack.c.bf16 %v878_v20, %v876_v18 }
 0x350   :  { %v2987_v8 = vpack.c.bf16 %v870_v7, %v868_v6  ;;  %v1072_v6 = vld [vmem:[#allocation23 + $0x68] sm:$0xff] }
 0x351   :  { %762 = vmatmul.mubr.f32.vlgmr.msra.gmra.mrb[4].mxu1 %v4495_v22  ;;  %v2381_v0 = vmul.f32 %v4495_v22, %v4495_v22  ;;  %v3025_v7 = vpack.c.bf16 %v1072_v6, %v1068_v3 }
 0x352   :  { %2988 = vmatpush1.bf16.msra.mxu0 %v2987_v8  ;;  %v1067_v8 = vld [vmem:[#allocation23 + $0x40] sm:$0xff]  ;;  %3024 = vmatpush1.bf16.msra.mxu1 %v3023_v5 }
 0x353   :  { %2382 = vadd.xlane.f32.xlu0 %v2381_v0  ;;  %2990 = vmatprep.subr.bf16.mxu0 %v2989_v11  ;;  %v881_v0 = vld [vmem:[#allocation22 + $0x148] sm:$0xff]  ;;  %v3027_v10 = vpack.c.bf16 %v1071_v9, %v1067_v8  ;;  %v687_v11 = vlaneseq }
 0x354   :  { %v2997_v24 = vpack.c.bf16 %v883_v23, %v881_v0  ;;  %3026 = vmatprep.subr.bf16.mxu1 %v3025_v7 }
 0x355   :  { %v4500_v12 = vshrl.u32 %v687_v11, 7  ;;  %v1065_v11 = vld [vmem:[#allocation23 + $0x30] sm:$0xff] }
 0x356   :  { %2992 = vmatpush1.bf16.msra.mxu0 %v2991_v14  ;;  %3028 = vmatpush1.bf16.msra.mxu1 %v3027_v10  ;;  %v685_v14 = vld [vmem:[%s4665_s7] sm:$0x3]  ;;  %v1061_v10 = vld [vmem:[#allocation23 + $0x10] sm:$0xff] }
 0x357   :  { %2994 = vmatprep.subr.bf16.mxu0 %v2993_v17  ;;  %v4503_v13 = vsub.s32 0, %v4500_v12  ;;  %v4507_v15 = vsub.s32 1, %v4500_v12 }
 0x359   :  { %v690_v16 = vrot.slane %v685_v14, %v4503_v13  ;;  %v694_v17 = vrot.slane %v685_v14, %v4507_v15  ;;  %v818_v63 = vrot.slane %v774_v61, %v4503_v13  ;;  %v822_v3 = vrot.slane %v774_v61, %v4507_v15 }
 0x35a   :  { %2996 = vmatpush1.bf16.msra.mxu0 %v2995_v21  ;;  %v835_v7 = vrot.slane %v775_v62, %v4507_v15  ;;  %v831_v8 = vrot.slane %v775_v62, %v4503_v13  ;;  %v1100_v62 = vld [vmem:[#allocation23 + $0x148] sm:$0xff] }
 0x35b   :  { %2998 = vmatprep.subr.bf16.mxu0 %v2997_v24 }
 0x35e   :  { %3000 = vmatpush1.bf16.msra.mxu0 %v2999_v27 }
 0x35f   :  { %3002 = vmatprep.subr.bf16.mxu0 %v3001_v30 }
 0x362   :  { %3004 = vmatpush1.bf16.msra.mxu0 %v3003_v33 }
 0x363   :  { %3006 = vmatprep.subr.bf16.mxu0 %v3005_v36 }
 0x366   :  { %3008 = vmatpush1.bf16.msra.mxu0 %v3007_v39 }
 0x367   :  { %3010 = vmatprep.subr.bf16.mxu0 %v3009_v42 }
 0x36a   :  { %3012 = vmatpush1.bf16.msra.mxu0 %v3011_v45 }
 0x36b   :  { %3014 = vmatprep.subr.bf16.mxu0 %v3013_v48 }
 0x36e   :  { %3016 = vmatpush1.bf16.msra.mxu0 %v3015_v51 }
 0x36f   :  { %3018 = vmatprep.subr.bf16.mxu0 %v3017_v55 }
 0x372   :  { %3020 = vmatpush1.bf16.msra.mxu0 %v3019_v57 }
 0x373   :  { %3086 = vmatprep.subr.bf16.mxu0 %v3085_v4 }
 0x424   :  { %v763_v18 = vpop.f32.mrb[4].mxu1 }
 0x425   :  { %v764_v20 = vadd.f32 %v763_v18, %v690_v16  ;;  %v765_v21 = vpop.f32.mrb[5].mxu1  ;;  %v1070_v16 = vld [vmem:[#allocation23 + $0x58] sm:$0xff] }
 0x426   :  { %v766_v0 = vadd.f32 %v765_v21, %v694_v17  ;;  %v1074_v17 = vld [vmem:[#allocation23 + $0x78] sm:$0xff] }
 0x427   :  { %vm768_vm1 = vcmp.ge.f32.partialorder %v764_v20, 0.0  ;;  %v770_v23 = vmul.f32 0.2, %v764_v20 }
 0x428   :  { %vm769_vm2 = vcmp.ge.f32.partialorder %v766_v0, 0.0  ;;  %v771_v24 = vmul.f32 0.2, %v766_v0 }
 0x429   :  { %v772_v25 = vsel %vm768_vm1, %v764_v20, %v770_v23  ;;  %v3087_v20 = vpack.c.bf16 %v1065_v11, %v1061_v10  ;;  %v1069_v23 = vld [vmem:[#allocation23 + $0x50] sm:$0xff] }
 0x42a   :  { %v776_v26 = vrot.slane %v772_v25, 4  ;;  %v773_v27 = vsel %vm769_vm2, %v766_v0, %v771_v24  ;;  %v3089_v0 = vpack.c.bf16 %v1074_v17, %v1070_v16  ;;  %v1073_v24 = vld [vmem:[#allocation23 + $0x70] sm:$0xff]  ;;  %v1112_v16 = vld [vmem:[#allocation23 + $0x1a8] sm:$0xff]  ;;  %v1110_v17 = vld [vmem:[#allocation23 + $0x198] sm:$0xff] }
 0x42b   :  { %v782_v28 = vrot.slane %v773_v27, 4  ;;  %v1105_v10 = vld [vmem:[#allocation23 + $0x170] sm:$0xff] }
 0x42c   :  { %v777_v29 = vadd.f32 %v776_v26, %v772_v25  ;;  %v1076_v26 = vld [vmem:[#allocation23 + $0x88] sm:$0xff] }
 0x42d   :  { %v783_v30 = vadd.f32 %v782_v28, %v773_v27  ;;  %v1078_v28 = vld [vmem:[#allocation23 + $0x98] sm:$0xff] }
 0x42e   :  { %v778_v31 = vrot.slane %v777_v29, 2 }
 0x42f   :  { %v784_v32 = vrot.slane %v783_v30, 2 }
 0x430   :  { %v779_v33 = vadd.f32 %v778_v31, %v777_v29  ;;  %v1075_v31 = vld [vmem:[#allocation23 + $0x80] sm:$0xff] }
 0x431   :  { %v785_v34 = vadd.f32 %v784_v32, %v783_v30  ;;  %v1082_v30 = vld [vmem:[#allocation23 + $0xb8] sm:$0xff]  ;;  %v1079_v32 = vld [vmem:[#allocation23 + $0xa0] sm:$0xff] }
 0x432   :  { %v780_v35 = vrot.slane %v779_v33, 1 }
 0x433   :  { %v786_v36 = vrot.slane %v785_v34, 1 }
 0x434   :  { %v781_v37 = vadd.f32 %v780_v35, %v779_v33  ;;  %v3093_v33 = vpack.c.bf16 %v1082_v30, %v1078_v28  ;;  %v1077_v35 = vld [vmem:[#allocation23 + $0x90] sm:$0xff]  ;;  %v1116_v28 = vld [vmem:[#allocation23 + $0x1c8] sm:$0xff]  ;;  %v1118_v30 = vld [vmem:[#allocation23 + $0x1d8] sm:$0xff] }
 0x435   :  { %v787_v38 = vadd.f32 %v786_v36, %v785_v34  ;;  %v3031_v34 = vpack.c.bf16 %v1079_v32, %v1075_v31  ;;  %v1081_v36 = vld [vmem:[#allocation23 + $0xb0] sm:$0xff]  ;;  %v1122_v32 = vld [vmem:[#allocation23 + $0x1f8] sm:$0xff] }
 0x436   :  { %v788_v39 = vmul.f32 0.125, %v781_v37  ;;  %v3095_v37 = vpack.c.bf16 %v1081_v36, %v1077_v35  ;;  %v3113_v35 = vpack.c.bf16 %v1122_v32, %v1118_v30  ;;  %v1156_v30 = vld [vmem:[#allocation23 + $0x308] sm:$0xff]  ;;  %v1158_v32 = vld [vmem:[#allocation23 + $0x318] sm:$0xff] }
 0x437   :  { %v789_v40 = vmul.f32 0.125, %v787_v38  ;;  %v1084_v38 = vld [vmem:[#allocation23 + $0xc8] sm:$0xff] }
 0x438   :  { %v790_v41 = vsub.f32 %v772_v25, %v788_v39  ;;  %v3091_v25 = vpack.c.bf16 %v1073_v24, %v1069_v23  ;;  %v1088_v39 = vld [vmem:[#allocation23 + $0xe8] sm:$0xff] }
 0x439   :  { %v791_v42 = vsub.f32 %v773_v27, %v789_v40  ;;  %v1080_v27 = vld [vmem:[#allocation23 + $0xa8] sm:$0xff]  ;;  %v1086_v40 = vld [vmem:[#allocation23 + $0xd8] sm:$0xff] }
 0x43a   :  { %v792_v43 = vmul.f32 %v790_v41, %v790_v41  ;;  %v3029_v29 = vpack.c.bf16 %v1080_v27, %v1076_v26  ;;  %v1113_v26 = vld [vmem:[#allocation23 + $0x1b0] sm:$0xff] }
 0x43b   :  { %v793_v44 = vmul.f32 %v791_v42, %v791_v42 }
 0x43c   :  { %v794_v45 = vrot.slane %v792_v43, 4  ;;  %3030 = vmatprep.subr.bf16.mxu1 %v3029_v29  ;;  %v1120_v29 = vld [vmem:[#allocation23 + $0x1e8] sm:$0xff] }
 0x43d   :  { %v800_v46 = vrot.slane %v793_v44, 4  ;;  %3032 = vmatpush1.bf16.msra.mxu1 %v3031_v34  ;;  %v3049_v31 = vpack.c.bf16 %v1120_v29, %v1116_v28  ;;  %v1119_v34 = vld [vmem:[#allocation23 + $0x1e0] sm:$0xff]  ;;  %v1153_v28 = vld [vmem:[#allocation23 + $0x2f0] sm:$0xff] }
 0x43e   :  { %v795_v47 = vadd.f32 %v794_v45, %v792_v43  ;;  %v1083_v43 = vld [vmem:[#allocation23 + $0xc0] sm:$0xff] }
 0x43f   :  { %v801_v48 = vadd.f32 %v800_v46, %v793_v44  ;;  %v1087_v44 = vld [vmem:[#allocation23 + $0xe0] sm:$0xff] }
 0x440   :  { %v796_v49 = vrot.slane %v795_v47, 2  ;;  %v3035_v46 = vpack.c.bf16 %v1087_v44, %v1083_v43  ;;  %v1130_v44 = vld [vmem:[#allocation23 + $0x238] sm:$0xff] }
 0x441   :  { %v802_v50 = vrot.slane %v801_v48, 2 }
 0x442   :  { %v797_v51 = vadd.f32 %v796_v49, %v795_v47  ;;  %v1085_v47 = vld [vmem:[#allocation23 + $0xd0] sm:$0xff] }
 0x443   :  { %v803_v52 = vadd.f32 %v802_v50, %v801_v48  ;;  %v1089_v48 = vld [vmem:[#allocation23 + $0xf0] sm:$0xff]  ;;  %v1092_v50 = vld [vmem:[#allocation23 + $0x108] sm:$0xff] }
 0x444   :  { %v798_v53 = vrot.slane %v797_v51, 1  ;;  %v3099_v49 = vpack.c.bf16 %v1089_v48, %v1085_v47 }
 0x445   :  { %v804_v54 = vrot.slane %v803_v52, 1 }
 0x446   :  { %v799_v55 = vadd.f32 %v798_v53, %v797_v51  ;;  %v1096_v51 = vld [vmem:[#allocation23 + $0x128] sm:$0xff] }
 0x447   :  { %v805_v56 = vadd.f32 %v804_v54, %v803_v52  ;;  %v1094_v52 = vld [vmem:[#allocation23 + $0x118] sm:$0xff]  ;;  %v3037_v53 = vpack.c.bf16 %v1096_v51, %v1092_v50  ;;  %v1129_v50 = vld [vmem:[#allocation23 + $0x230] sm:$0xff] }
 0x448   :  { %v806_v57 = vmul.f32 0.125, %v799_v55  ;;  %v1098_v54 = vld [vmem:[#allocation23 + $0x138] sm:$0xff]  ;;  %v1091_v55 = vld [vmem:[#allocation23 + $0x100] sm:$0xff] }
 0x449   :  { %v807_v58 = vmul.f32 0.125, %v805_v56  ;;  %v1095_v56 = vld [vmem:[#allocation23 + $0x120] sm:$0xff] }
 0x44a   :  { %v808_v59 = vadd.f32 1e-05, %v806_v57  ;;  %v3101_v57 = vpack.c.bf16 %v1098_v54, %v1094_v52  ;;  %v1132_v52 = vld [vmem:[#allocation23 + $0x248] sm:$0xff]  ;;  %v1134_v54 = vld [vmem:[#allocation23 + $0x258] sm:$0xff] }
 0x44b   :  { %v809_v60 = vadd.f32 1e-05, %v807_v58  ;;  %v3039_v58 = vpack.c.bf16 %v1095_v56, %v1091_v55  ;;  %v1138_v56 = vld [vmem:[#allocation23 + $0x278] sm:$0xff] }
 0x44c   :  { %3598 = vrsqrt.f32 %v808_v59  ;;  %v1093_v59 = vld [vmem:[#allocation23 + $0x110] sm:$0xff] }
 0x44d   :  { %3600 = vrsqrt.f32 %v809_v60  ;;  %v1097_v60 = vld [vmem:[#allocation23 + $0x130] sm:$0xff] }
 0x44e   :  { %v3103_v61 = vpack.c.bf16 %v1097_v60, %v1093_v59  ;;  %v3121_v59 = vpack.c.bf16 %v1138_v56, %v1134_v54  ;;  %v1172_v54 = vld [vmem:[#allocation23 + $0x388] sm:$0xff]  ;;  %v1174_v56 = vld [vmem:[#allocation23 + $0x398] sm:$0xff] }
 0x456   :  { %v3599_v2 = vpop.eup %3598 }
 0x457   :  { %v3601_v4 = vpop.eup %3600  ;;  %v812_v5 = vmul.f32 %v3599_v2, %v790_v41  ;;  %v3033_v41 = vpack.c.bf16 %v1088_v39, %v1084_v38  ;;  %v1102_v2 = vld [vmem:[#allocation23 + $0x158] sm:$0xff]  ;;  %v1121_v38 = vld [vmem:[#allocation23 + $0x1f0] sm:$0xff] }
 0x458   :  { %v813_v6 = vmul.f32 %v3601_v4, %v791_v42  ;;  %v1090_v42 = vld [vmem:[#allocation23 + $0xf8] sm:$0xff] }
 0x459   :  { %v825_v9 = vmul.f32 %v818_v63, %v812_v5  ;;  %v3097_v45 = vpack.c.bf16 %v1090_v42, %v1086_v40  ;;  %3034 = vmatprep.subr.bf16.mxu1 %v3033_v41  ;;  %v1104_v63 = vld [vmem:[#allocation23 + $0x168] sm:$0xff]  ;;  %v1106_v4 = vld [vmem:[#allocation23 + $0x178] sm:$0xff]  ;;  %v1099_v5 = vld [vmem:[#allocation23 + $0x140] sm:$0xff] }
 0x45a   :  { %v826_v14 = vmul.f32 %v822_v3, %v813_v6  ;;  %3036 = vmatpush1.bf16.msra.mxu1 %v3035_v46  ;;  %v3041_v3 = vpack.c.bf16 %v1104_v63, %v1100_v62  ;;  %v1103_v6 = vld [vmem:[#allocation23 + $0x160] sm:$0xff]  ;;  %v1124_v40 = vld [vmem:[#allocation23 + $0x208] sm:$0xff]  ;;  %v1126_v42 = vld [vmem:[#allocation23 + $0x218] sm:$0xff] }
 0x45b   :  { %v838_v21 = vadd.f32 %v831_v8, %v825_v9  ;;  %3038 = vmatprep.subr.bf16.mxu1 %v3037_v53  ;;  %v3043_v8 = vpack.c.bf16 %v1103_v6, %v1099_v5  ;;  %v1101_v9 = vld [vmem:[#allocation23 + $0x150] sm:$0xff]  ;;  %v1128_v41 = vld [vmem:[#allocation23 + $0x228] sm:$0xff]  ;;  %v1127_v46 = vld [vmem:[#allocation23 + $0x220] sm:$0xff]  ;;  %v3117_v47 = vpack.c.bf16 %v1130_v44, %v1126_v42 }
 0x45c   :  { %v839_v18 = vadd.f32 %v835_v7, %v826_v14  ;;  %v3105_v7 = vpack.c.bf16 %v1106_v4, %v1102_v2  ;;  %v3107_v11 = vpack.c.bf16 %v1105_v10, %v1101_v9  ;;  %v1108_v14 = vld [vmem:[#allocation23 + $0x188] sm:$0xff]  ;;  %v3053_v43 = vpack.c.bf16 %v1128_v41, %v1124_v40  ;;  %v1137_v62 = vld [vmem:[#allocation23 + $0x270] sm:$0xff]  ;;  %v1142_v4 = vld [vmem:[#allocation23 + $0x298] sm:$0xff] }
 0x45d   :  { %v1136_v53 = vld [vmem:[#allocation23 + $0x268] sm:$0xff]  ;;  %v1146_v6 = vld [vmem:[#allocation23 + $0x2b8] sm:$0xff]  ;;  %v1161_v40 = vld [vmem:[#allocation23 + $0x330] sm:$0xff] }
 0x45e   :  { %980 = vmatprep.mubr.f32.mxu0 %v839_v18  ;;  %3040 = vmatpush1.bf16.msra.mxu1 %v3039_v58  ;;  %v3045_v18 = vpack.c.bf16 %v1112_v16, %v1108_v14  ;;  %v3057_v55 = vpack.c.bf16 %v1136_v53, %v1132_v52  ;;  %v1135_v58 = vld [vmem:[#allocation23 + $0x260] sm:$0xff]  ;;  %v1140_v2 = vld [vmem:[#allocation23 + $0x288] sm:$0xff]  ;;  %v3125_v9 = vpack.c.bf16 %v1146_v6, %v1142_v4  ;;  %v1145_v14 = vld [vmem:[#allocation23 + $0x2b0] sm:$0xff] }
 0x45f   :  { %981 = vmatmul.mubr.f32.vlgmr.msra.gmra.mrb[2].mxu0 %v838_v21  ;;  %3042 = vmatprep.subr.bf16.mxu1 %v3041_v3  ;;  %v1107_v21 = vld [vmem:[#allocation23 + $0x180] sm:$0xff]  ;;  %v1144_v3 = vld [vmem:[#allocation23 + $0x2a8] sm:$0xff]  ;;  %v1166_v44 = vld [vmem:[#allocation23 + $0x358] sm:$0xff] }
 0x460   :  { %3088 = vmatpush1.bf16.msra.mxu0 %v3087_v20  ;;  %v1114_v20 = vld [vmem:[#allocation23 + $0x1b8] sm:$0xff]  ;;  %v3061_v5 = vpack.c.bf16 %v1144_v3, %v1140_v2  ;;  %v1164_v42 = vld [vmem:[#allocation23 + $0x348] sm:$0xff]  ;;  %v1169_v52 = vld [vmem:[#allocation23 + $0x370] sm:$0xff] }
 0x461   :  { %3090 = vmatprep.subr.bf16.mxu0 %v3089_v0  ;;  %v1111_v0 = vld [vmem:[#allocation23 + $0x1a0] sm:$0xff]  ;;  %v3109_v23 = vpack.c.bf16 %v1114_v20, %v1110_v17  ;;  %v1148_v17 = vld [vmem:[#allocation23 + $0x2c8] sm:$0xff]  ;;  %v1150_v20 = vld [vmem:[#allocation23 + $0x2d8] sm:$0xff] }
 0x462   :  { %3044 = vmatpush1.bf16.msra.mxu1 %v3043_v8  ;;  %v3047_v24 = vpack.c.bf16 %v1111_v0, %v1107_v21  ;;  %v1143_v8 = vld [vmem:[#allocation23 + $0x2a0] sm:$0xff]  ;;  %v1154_v0 = vld [vmem:[#allocation23 + $0x2f8] sm:$0xff]  ;;  %v1177_v2 = vld [vmem:[#allocation23 + $0x3b0] sm:$0xff] }
 0x463   :  { %3046 = vmatprep.subr.bf16.mxu1 %v3045_v18  ;;  %v1152_v18 = vld [vmem:[#allocation23 + $0x2e8] sm:$0xff]  ;;  %v1182_v6 = vld [vmem:[#allocation23 + $0x3d8] sm:$0xff] }
 0x464   :  { %3092 = vmatpush1.bf16.msra.mxu0 %v3091_v25  ;;  %v1109_v25 = vld [vmem:[#allocation23 + $0x190] sm:$0xff]  ;;  %v3065_v21 = vpack.c.bf16 %v1152_v18, %v1148_v17  ;;  %v1180_v4 = vld [vmem:[#allocation23 + $0x3c8] sm:$0xff] }
 0x465   :  { %3094 = vmatprep.subr.bf16.mxu0 %v3093_v33  ;;  %v3111_v27 = vpack.c.bf16 %v1113_v26, %v1109_v25  ;;  %v1115_v33 = vld [vmem:[#allocation23 + $0x1c0] sm:$0xff]  ;;  %v3129_v25 = vpack.c.bf16 %v1154_v0, %v1150_v20  ;;  %v1185_v17 = vld [vmem:[#allocation23 + $0x3f0] sm:$0xff]  ;;  %v1360_v20 = vld [vmem:[#allocation25 + $0x8] sm:$0xff] }
 0x466   :  { %3048 = vmatpush1.bf16.msra.mxu1 %v3047_v24  ;;  %v3051_v36 = vpack.c.bf16 %v1119_v34, %v1115_v33  ;;  %v1151_v24 = vld [vmem:[#allocation23 + $0x2e0] sm:$0xff]  ;;  %v1162_v34 = vld [vmem:[#allocation23 + $0x338] sm:$0xff] }
 0x467   :  { %3050 = vmatprep.subr.bf16.mxu1 %v3049_v31  ;;  %v1160_v31 = vld [vmem:[#allocation23 + $0x328] sm:$0xff]  ;;  %v1362_v0 = vld [vmem:[#allocation25 + $0x18] sm:$0xff] }
 0x468   :  { %3096 = vmatpush1.bf16.msra.mxu0 %v3095_v37  ;;  %v1117_v37 = vld [vmem:[#allocation23 + $0x1d0] sm:$0xff]  ;;  %v3069_v33 = vpack.c.bf16 %v1160_v31, %v1156_v30 }
 0x469   :  { %3098 = vmatprep.subr.bf16.mxu0 %v3097_v45  ;;  %v3115_v39 = vpack.c.bf16 %v1121_v38, %v1117_v37  ;;  %v1123_v45 = vld [vmem:[#allocation23 + $0x200] sm:$0xff]  ;;  %v3133_v37 = vpack.c.bf16 %v1162_v34, %v1158_v32 }
 0x46a   :  { %3052 = vmatpush1.bf16.msra.mxu1 %v3051_v36  ;;  %v3055_v48 = vpack.c.bf16 %v1127_v46, %v1123_v45  ;;  %v1159_v36 = vld [vmem:[#allocation23 + $0x320] sm:$0xff]  ;;  %v1170_v46 = vld [vmem:[#allocation23 + $0x378] sm:$0xff] }
 0x46b   :  { %3054 = vmatprep.subr.bf16.mxu1 %v3053_v43  ;;  %v1168_v43 = vld [vmem:[#allocation23 + $0x368] sm:$0xff] }
 0x46c   :  { %3100 = vmatpush1.bf16.msra.mxu0 %v3099_v49  ;;  %v1125_v49 = vld [vmem:[#allocation23 + $0x210] sm:$0xff]  ;;  %v3073_v45 = vpack.c.bf16 %v1168_v43, %v1164_v42 }
 0x46d   :  { %3102 = vmatprep.subr.bf16.mxu0 %v3101_v57  ;;  %v3119_v51 = vpack.c.bf16 %v1129_v50, %v1125_v49  ;;  %v1131_v57 = vld [vmem:[#allocation23 + $0x240] sm:$0xff]  ;;  %v3137_v49 = vpack.c.bf16 %v1170_v46, %v1166_v44 }
 0x46e   :  { %3056 = vmatpush1.bf16.msra.mxu1 %v3055_v48  ;;  %v3059_v60 = vpack.c.bf16 %v1135_v58, %v1131_v57  ;;  %v1167_v48 = vld [vmem:[#allocation23 + $0x360] sm:$0xff]  ;;  %v1178_v58 = vld [vmem:[#allocation23 + $0x3b8] sm:$0xff] }
 0x46f   :  { %3058 = vmatprep.subr.bf16.mxu1 %v3057_v55  ;;  %v1176_v55 = vld [vmem:[#allocation23 + $0x3a8] sm:$0xff] }
 0x470   :  { %3104 = vmatpush1.bf16.msra.mxu0 %v3103_v61  ;;  %v1133_v61 = vld [vmem:[#allocation23 + $0x250] sm:$0xff]  ;;  %v3077_v57 = vpack.c.bf16 %v1176_v55, %v1172_v54 }
 0x471   :  { %3106 = vmatprep.subr.bf16.mxu0 %v3105_v7  ;;  %v3123_v63 = vpack.c.bf16 %v1137_v62, %v1133_v61  ;;  %v1139_v7 = vld [vmem:[#allocation23 + $0x280] sm:$0xff]  ;;  %v3141_v61 = vpack.c.bf16 %v1178_v58, %v1174_v56 }
 0x472   :  { %3060 = vmatpush1.bf16.msra.mxu1 %v3059_v60  ;;  %v3063_v10 = vpack.c.bf16 %v1143_v8, %v1139_v7  ;;  %v1175_v60 = vld [vmem:[#allocation23 + $0x3a0] sm:$0xff]  ;;  %v1186_v8 = vld [vmem:[#allocation23 + $0x3f8] sm:$0xff] }
 0x473   :  { %3062 = vmatprep.subr.bf16.mxu1 %v3061_v5  ;;  %v1184_v5 = vld [vmem:[#allocation23 + $0x3e8] sm:$0xff] }
 0x474   :  { %3108 = vmatpush1.bf16.msra.mxu0 %v3107_v11  ;;  %v1141_v11 = vld [vmem:[#allocation23 + $0x290] sm:$0xff]  ;;  %v3081_v7 = vpack.c.bf16 %v1184_v5, %v1180_v4 }
 0x475   :  { %3110 = vmatprep.subr.bf16.mxu0 %v3109_v23  ;;  %v3127_v16 = vpack.c.bf16 %v1145_v14, %v1141_v11  ;;  %v1147_v23 = vld [vmem:[#allocation23 + $0x2c0] sm:$0xff]  ;;  %v3145_v11 = vpack.c.bf16 %v1186_v8, %v1182_v6 }
 0x476   :  { %3064 = vmatpush1.bf16.msra.mxu1 %v3063_v10  ;;  %v3067_v26 = vpack.c.bf16 %v1151_v24, %v1147_v23  ;;  %v1183_v10 = vld [vmem:[#allocation23 + $0x3e0] sm:$0xff]  ;;  %v1366_v24 = vld [vmem:[#allocation25 + $0x38] sm:$0xff] }
 0x477   :  { %3066 = vmatprep.subr.bf16.mxu1 %v3065_v21  ;;  %v1364_v21 = vld [vmem:[#allocation25 + $0x28] sm:$0xff] }
 0x478   :  { %3112 = vmatpush1.bf16.msra.mxu0 %v3111_v27  ;;  %v1149_v27 = vld [vmem:[#allocation23 + $0x2d0] sm:$0xff]  ;;  %v3149_v23 = vpack.c.bf16 %v1364_v21, %v1360_v20 }
 0x479   :  { %3114 = vmatprep.subr.bf16.mxu0 %v3113_v35  ;;  %v3131_v29 = vpack.c.bf16 %v1153_v28, %v1149_v27  ;;  %v1155_v35 = vld [vmem:[#allocation23 + $0x300] sm:$0xff] }
 0x47a   :  { %3068 = vmatpush1.bf16.msra.mxu1 %v3067_v26  ;;  %v3071_v38 = vpack.c.bf16 %v1159_v36, %v1155_v35  ;;  %v904_v26 = vld [vmem:[%s4668_s25] sm:$0x3] }
 0x47b   :  { %3070 = vmatprep.subr.bf16.mxu1 %v3069_v33  ;;  %v909_v27 = vrot.slane %v904_v26, %v4503_v13  ;;  %v913_v28 = vrot.slane %v904_v26, %v4507_v15  ;;  %v1361_v26 = vld [vmem:[#allocation25 + $0x10] sm:$0xff] }
 0x47c   :  { %3116 = vmatpush1.bf16.msra.mxu0 %v3115_v39  ;;  %v1157_v39 = vld [vmem:[#allocation23 + $0x310] sm:$0xff] }
 0x47d   :  { %3118 = vmatprep.subr.bf16.mxu0 %v3117_v47  ;;  %v3135_v41 = vpack.c.bf16 %v1161_v40, %v1157_v39  ;;  %v1163_v47 = vld [vmem:[#allocation23 + $0x340] sm:$0xff] }
 0x47e   :  { %3072 = vmatpush1.bf16.msra.mxu1 %v3071_v38  ;;  %v3075_v50 = vpack.c.bf16 %v1167_v48, %v1163_v47 }
 0x47f   :  { %3074 = vmatprep.subr.bf16.mxu1 %v3073_v45 }
 0x480   :  { %3120 = vmatpush1.bf16.msra.mxu0 %v3119_v51  ;;  %v1165_v51 = vld [vmem:[#allocation23 + $0x350] sm:$0xff] }
 0x481   :  { %3122 = vmatprep.subr.bf16.mxu0 %v3121_v59  ;;  %v3139_v53 = vpack.c.bf16 %v1169_v52, %v1165_v51  ;;  %v1171_v59 = vld [vmem:[#allocation23 + $0x380] sm:$0xff] }
 0x482   :  { %3076 = vmatpush1.bf16.msra.mxu1 %v3075_v50  ;;  %v3079_v62 = vpack.c.bf16 %v1175_v60, %v1171_v59 }
 0x483   :  { %3078 = vmatprep.subr.bf16.mxu1 %v3077_v57 }
 0x484   :  { %3124 = vmatpush1.bf16.msra.mxu0 %v3123_v63  ;;  %v1173_v63 = vld [vmem:[#allocation23 + $0x390] sm:$0xff] }
 0x485   :  { %3126 = vmatprep.subr.bf16.mxu0 %v3125_v9  ;;  %v3143_v3 = vpack.c.bf16 %v1177_v2, %v1173_v63  ;;  %v1179_v9 = vld [vmem:[#allocation23 + $0x3c0] sm:$0xff] }
 0x486   :  { %3080 = vmatpush1.bf16.msra.mxu1 %v3079_v62  ;;  %v3083_v14 = vpack.c.bf16 %v1183_v10, %v1179_v9  ;;  %v993_v9 = vld [vmem:[%s4669_s11] sm:$0x3] }
 0x487   :  { %3082 = vmatprep.subr.bf16.mxu1 %v3081_v7  ;;  %v994_v10 = vld [vmem:[%s4670_s6] sm:$0x3] }
 0x488   :  { %3128 = vmatpush1.bf16.msra.mxu0 %v3127_v16  ;;  %v1181_v16 = vld [vmem:[#allocation23 + $0x3d0] sm:$0xff]  ;;  %v1054_v21 = vrot.slane %v994_v10, %v4507_v15 }
 0x489   :  { %3130 = vmatprep.subr.bf16.mxu0 %v3129_v25  ;;  %v3147_v18 = vpack.c.bf16 %v1185_v17, %v1181_v16  ;;  %v3213_v25 = vpack.c.bf16 %v1366_v24, %v1362_v0  ;;  %v1041_v16 = vrot.slane %v993_v9, %v4507_v15  ;;  %v1359_v0 = vld [vmem:[#allocation25] sm:$0xff]  ;;  %v1050_v24 = vrot.slane %v994_v10, %v4503_v13 }
 0x48a   :  { %3084 = vmatpush1.bf16.msra.mxu1 %v3083_v14 }
 0x48b   :  { %3150 = vmatprep.subr.bf16.mxu1 %v3149_v23 }
 0x48c   :  { %3132 = vmatpush1.bf16.msra.mxu0 %v3131_v29 }
 0x48d   :  { %3134 = vmatprep.subr.bf16.mxu0 %v3133_v37 }
 0x490   :  { %3136 = vmatpush1.bf16.msra.mxu0 %v3135_v41 }
 0x491   :  { %3138 = vmatprep.subr.bf16.mxu0 %v3137_v49 }
 0x494   :  { %3140 = vmatpush1.bf16.msra.mxu0 %v3139_v53 }
 0x495   :  { %3142 = vmatprep.subr.bf16.mxu0 %v3141_v61 }
 0x498   :  { %3144 = vmatpush1.bf16.msra.mxu0 %v3143_v3 }
 0x499   :  { %3146 = vmatprep.subr.bf16.mxu0 %v3145_v11  ;;  %v1037_v11 = vrot.slane %v993_v9, %v4503_v13 }
 0x49c   :  { %3148 = vmatpush1.bf16.msra.mxu0 %v3147_v18 }
 0x49d   :  { %3214 = vmatprep.subr.bf16.mxu0 %v3213_v25  ;;  %v1363_v25 = vld [vmem:[#allocation25 + $0x20] sm:$0xff] }
 0x532   :  { %v982_v29 = vpop.f32.mrb[2].mxu0 }
 0x533   :  { %v983_v30 = vadd.f32 %v982_v29, %v909_v27  ;;  %v984_v31 = vpop.f32.mrb[3].mxu0  ;;  %v1365_v27 = vld [vmem:[#allocation25 + $0x30] sm:$0xff]  ;;  %v1368_v29 = vld [vmem:[#allocation25 + $0x48] sm:$0xff] }
 0x534   :  { %v985_v32 = vadd.f32 %v984_v31, %v913_v28  ;;  %v1370_v31 = vld [vmem:[#allocation25 + $0x58] sm:$0xff] }
 0x535   :  { %vm987_vm3 = vcmp.ge.f32.partialorder %v983_v30, 0.0  ;;  %v989_v33 = vmul.f32 0.2, %v983_v30 }
 0x536   :  { %vm988_vm4 = vcmp.ge.f32.partialorder %v985_v32, 0.0  ;;  %v990_v34 = vmul.f32 0.2, %v985_v32 }
 0x537   :  { %v991_v35 = vsel %vm987_vm3, %v983_v30, %v989_v33  ;;  %v1372_v30 = vld [vmem:[#allocation25 + $0x68] sm:$0xff] }
 0x538   :  { %v995_v36 = vrot.slane %v991_v35, 4  ;;  %v992_v37 = vsel %vm988_vm4, %v985_v32, %v990_v34  ;;  %v1374_v32 = vld [vmem:[#allocation25 + $0x78] sm:$0xff]  ;;  %v3151_v34 = vpack.c.bf16 %v1363_v25, %v1359_v0  ;;  %v1404_v0 = vld [vmem:[#allocation25 + $0x168] sm:$0xff] }
 0x539   :  { %v1001_v38 = vrot.slane %v992_v37, 4 }
 0x53a   :  { %v996_v39 = vadd.f32 %v995_v36, %v991_v35  ;;  %v1367_v36 = vld [vmem:[#allocation25 + $0x40] sm:$0xff] }
 0x53b   :  { %v1002_v40 = vadd.f32 %v1001_v38, %v992_v37 }
 0x53c   :  { %v997_v41 = vrot.slane %v996_v39, 2 }
 0x53d   :  { %v1003_v42 = vrot.slane %v1002_v40, 2 }
 0x53e   :  { %v998_v43 = vadd.f32 %v997_v41, %v996_v39  ;;  %v1369_v39 = vld [vmem:[#allocation25 + $0x50] sm:$0xff]  ;;  %v1376_v41 = vld [vmem:[#allocation25 + $0x88] sm:$0xff] }
 0x53f   :  { %v1004_v44 = vadd.f32 %v1003_v42, %v1002_v40  ;;  %v1373_v40 = vld [vmem:[#allocation25 + $0x70] sm:$0xff]  ;;  %v3153_v42 = vpack.c.bf16 %v1372_v30, %v1368_v29 }
 0x540   :  { %v999_v45 = vrot.slane %v998_v43, 1 }
 0x541   :  { %v1005_v46 = vrot.slane %v1004_v44, 1 }
 0x542   :  { %v1000_v47 = vadd.f32 %v999_v45, %v998_v43  ;;  %v3217_v43 = vpack.c.bf16 %v1374_v32, %v1370_v31  ;;  %v1378_v45 = vld [vmem:[#allocation25 + $0x98] sm:$0xff]  ;;  %v1401_v31 = vld [vmem:[#allocation25 + $0x150] sm:$0xff] }
 0x543   :  { %v1006_v48 = vadd.f32 %v1005_v46, %v1004_v44  ;;  %v1380_v44 = vld [vmem:[#allocation25 + $0xa8] sm:$0xff]  ;;  %v1382_v46 = vld [vmem:[#allocation25 + $0xb8] sm:$0xff]  ;;  %v1405_v32 = vld [vmem:[#allocation25 + $0x170] sm:$0xff] }
 0x544   :  { %v1007_v49 = vmul.f32 0.125, %v1000_v47 }
 0x545   :  { %v1008_v50 = vmul.f32 0.125, %v1006_v48  ;;  %v3219_v48 = vpack.c.bf16 %v1373_v40, %v1369_v39  ;;  %v3235_v40 = vpack.c.bf16 %v1405_v32, %v1401_v31  ;;  %v1439_v31 = vld [vmem:[#allocation25 + $0x280] sm:$0xff] }
 0x546   :  { %v1009_v51 = vsub.f32 %v991_v35, %v1007_v49  ;;  %v3215_v35 = vpack.c.bf16 %v1365_v27, %v1361_v26  ;;  %v1375_v49 = vld [vmem:[#allocation25 + $0x80] sm:$0xff] }
 0x547   :  { %v1010_v52 = vsub.f32 %v992_v37, %v1008_v50  ;;  %v1371_v37 = vld [vmem:[#allocation25 + $0x60] sm:$0xff] }
 0x548   :  { %v1011_v53 = vmul.f32 %v1009_v51, %v1009_v51  ;;  %v3155_v47 = vpack.c.bf16 %v1371_v37, %v1367_v36  ;;  %v1379_v50 = vld [vmem:[#allocation25 + $0xa0] sm:$0xff]  ;;  %v1410_v36 = vld [vmem:[#allocation25 + $0x198] sm:$0xff] }
 0x549   :  { %v1012_v54 = vmul.f32 %v1010_v52, %v1010_v52  ;;  %v1399_v27 = vld [vmem:[#allocation25 + $0x140] sm:$0xff]  ;;  %v1414_v37 = vld [vmem:[#allocation25 + $0x1b8] sm:$0xff] }
 0x54a   :  { %v1013_v55 = vrot.slane %v1011_v53, 4  ;;  %v1443_v32 = vld [vmem:[#allocation25 + $0x2a0] sm:$0xff] }
 0x54b   :  { %v1019_v56 = vrot.slane %v1012_v54, 4 }
 0x54c   :  { %v1014_v57 = vadd.f32 %v1013_v55, %v1011_v53  ;;  %v1377_v53 = vld [vmem:[#allocation25 + $0x90] sm:$0xff]  ;;  %v1384_v55 = vld [vmem:[#allocation25 + $0xc8] sm:$0xff] }
 0x54d   :  { %v1020_v58 = vadd.f32 %v1019_v56, %v1012_v54  ;;  %v1381_v54 = vld [vmem:[#allocation25 + $0xb0] sm:$0xff]  ;;  %v1388_v56 = vld [vmem:[#allocation25 + $0xe8] sm:$0xff] }
 0x54e   :  { %v1015_v59 = vrot.slane %v1014_v57, 2 }
 0x54f   :  { %v1021_v60 = vrot.slane %v1020_v58, 2 }
 0x550   :  { %v1016_v61 = vadd.f32 %v1015_v59, %v1014_v57  ;;  %v1386_v57 = vld [vmem:[#allocation25 + $0xd8] sm:$0xff]  ;;  %v3159_v59 = vpack.c.bf16 %v1379_v50, %v1375_v49 }
 0x551   :  { %v1022_v62 = vadd.f32 %v1021_v60, %v1020_v58  ;;  %v1390_v58 = vld [vmem:[#allocation25 + $0xf8] sm:$0xff]  ;;  %v3223_v60 = vpack.c.bf16 %v1381_v54, %v1377_v53  ;;  %v1415_v53 = vld [vmem:[#allocation25 + $0x1c0] sm:$0xff] }
 0x552   :  { %v1017_v63 = vrot.slane %v1016_v61, 1  ;;  %v1418_v49 = vld [vmem:[#allocation25 + $0x1d8] sm:$0xff]  ;;  %v1419_v54 = vld [vmem:[#allocation25 + $0x1e0] sm:$0xff] }
 0x553   :  { %v1023_v2 = vrot.slane %v1022_v62, 1  ;;  %v1422_v50 = vld [vmem:[#allocation25 + $0x1f8] sm:$0xff] }
 0x554   :  { %v1018_v3 = vadd.f32 %v1017_v63, %v1016_v61  ;;  %v1383_v61 = vld [vmem:[#allocation25 + $0xc0] sm:$0xff]  ;;  %v3161_v63 = vpack.c.bf16 %v1388_v56, %v1384_v55  ;;  %v3241_v56 = vpack.c.bf16 %v1422_v50, %v1418_v49  ;;  %v1449_v49 = vld [vmem:[#allocation25 + $0x2d0] sm:$0xff] }
 0x555   :  { %v1024_v4 = vadd.f32 %v1023_v2, %v1022_v62  ;;  %v1387_v62 = vld [vmem:[#allocation25 + $0xe0] sm:$0xff]  ;;  %v3225_v2 = vpack.c.bf16 %v1390_v58, %v1386_v57  ;;  %v1417_v57 = vld [vmem:[#allocation25 + $0x1d0] sm:$0xff] }
 0x556   :  { %v1025_v5 = vmul.f32 0.125, %v1018_v3  ;;  %v1385_v3 = vld [vmem:[#allocation25 + $0xd0] sm:$0xff]  ;;  %v3163_v9 = vpack.c.bf16 %v1387_v62, %v1383_v61  ;;  %v1426_v61 = vld [vmem:[#allocation25 + $0x218] sm:$0xff] }
 0x557   :  { %v1026_v6 = vmul.f32 0.125, %v1024_v4  ;;  %v1389_v4 = vld [vmem:[#allocation25 + $0xf0] sm:$0xff]  ;;  %v1430_v62 = vld [vmem:[#allocation25 + $0x238] sm:$0xff] }
 0x558   :  { %v1027_v7 = vadd.f32 1e-05, %v1025_v5  ;;  %v1392_v5 = vld [vmem:[#allocation25 + $0x108] sm:$0xff]  ;;  %v3227_v10 = vpack.c.bf16 %v1389_v4, %v1385_v3  ;;  %v1421_v58 = vld [vmem:[#allocation25 + $0x1f0] sm:$0xff]  ;;  %v1423_v3 = vld [vmem:[#allocation25 + $0x200] sm:$0xff] }
 0x559   :  { %v1028_v8 = vadd.f32 1e-05, %v1026_v6  ;;  %v1396_v6 = vld [vmem:[#allocation25 + $0x128] sm:$0xff]  ;;  %v1427_v4 = vld [vmem:[#allocation25 + $0x220] sm:$0xff]  ;;  %v1453_v50 = vld [vmem:[#allocation25 + $0x2f0] sm:$0xff] }
 0x55a   :  { %3602 = vrsqrt.f32 %v1027_v7  ;;  %v1394_v7 = vld [vmem:[#allocation25 + $0x118] sm:$0xff] }
 0x55b   :  { %3604 = vrsqrt.f32 %v1028_v8  ;;  %v1398_v8 = vld [vmem:[#allocation25 + $0x138] sm:$0xff] }
 0x564   :  { %v3603_v14 = vpop.eup %3602 }
 0x565   :  { %v3605_v17 = vpop.eup %3604  ;;  %v1031_v18 = vmul.f32 %v3603_v14, %v1009_v51  ;;  %v3157_v51 = vpack.c.bf16 %v1380_v44, %v1376_v41  ;;  %v1395_v14 = vld [vmem:[#allocation25 + $0x120] sm:$0xff]  ;;  %v3237_v44 = vpack.c.bf16 %v1414_v37, %v1410_v36  ;;  %v1441_v36 = vld [vmem:[#allocation25 + $0x290] sm:$0xff] }
 0x566   :  { %v1032_v20 = vmul.f32 %v3605_v17, %v1010_v52  ;;  %v3221_v52 = vpack.c.bf16 %v1382_v46, %v1378_v45  ;;  %v3229_v17 = vpack.c.bf16 %v1398_v8, %v1394_v7  ;;  %v1407_v41 = vld [vmem:[#allocation25 + $0x180] sm:$0xff]  ;;  %v1409_v45 = vld [vmem:[#allocation25 + $0x190] sm:$0xff] }
 0x567   :  { %v1044_v23 = vmul.f32 %v1037_v11, %v1031_v18  ;;  %v1391_v11 = vld [vmem:[#allocation25 + $0x100] sm:$0xff]  ;;  %v1393_v18 = vld [vmem:[#allocation25 + $0x110] sm:$0xff] }
 0x568   :  { %v1045_v28 = vmul.f32 %v1041_v16, %v1032_v20  ;;  %v3165_v16 = vpack.c.bf16 %v1396_v6, %v1392_v5  ;;  %v1397_v20 = vld [vmem:[#allocation25 + $0x130] sm:$0xff]  ;;  %v3167_v25 = vpack.c.bf16 %v1395_v14, %v1391_v11  ;;  %v3245_v6 = vpack.c.bf16 %v1430_v62, %v1426_v61  ;;  %v1434_v11 = vld [vmem:[#allocation25 + $0x258] sm:$0xff] }
 0x569   :  { %v4528_v38 = vadd.f32 %v1050_v24, %v1044_v23  ;;  %v1402_v23 = vld [vmem:[#allocation25 + $0x158] sm:$0xff]  ;;  %v3231_v26 = vpack.c.bf16 %v1397_v20, %v1393_v18  ;;  %v1413_v46 = vld [vmem:[#allocation25 + $0x1b0] sm:$0xff]  ;;  %v1431_v18 = vld [vmem:[#allocation25 + $0x240] sm:$0xff] }
 0x56a   :  { %v4526_v33 = vadd.f32 %v1054_v21, %v1045_v28  ;;  %v1400_v21 = vld [vmem:[#allocation25 + $0x148] sm:$0xff]  ;;  %v1406_v24 = vld [vmem:[#allocation25 + $0x178] sm:$0xff]  ;;  %v1403_v28 = vld [vmem:[#allocation25 + $0x160] sm:$0xff] }
 0x56b   :  { %v3169_v29 = vpack.c.bf16 %v1404_v0, %v1400_v21  ;;  %v3233_v30 = vpack.c.bf16 %v1406_v24, %v1402_v23  ;;  %v3171_v39 = vpack.c.bf16 %v1403_v28, %v1399_v27  ;;  %v1425_v7 = vld [vmem:[#allocation25 + $0x210] sm:$0xff]  ;;  %v1438_v14 = vld [vmem:[#allocation25 + $0x278] sm:$0xff]  ;;  %v1435_v20 = vld [vmem:[#allocation25 + $0x260] sm:$0xff] }
 0x56c   :  { %1273 = vmatprep.mubr.f32.mxu1 %v4526_v33  ;;  %1344 = vmatprep.mubr.f32.mxu0 %v4526_v33  ;;  %v1429_v8 = vld [vmem:[#allocation25 + $0x230] sm:$0xff]  ;;  %v3249_v0 = vpack.c.bf16 %v1438_v14, %v1434_v11  ;;  %v1442_v27 = vld [vmem:[#allocation25 + $0x298] sm:$0xff] }
 0x56d   :  { %1274 = vmatmul.mubr.f32.vlgmr.msra.gmra.mrb[6].mxu1 %v4528_v38  ;;  %1345 = vmatmul.mubr.f32.vlgmr.msra.gmra.mrb[4].mxu0 %v4528_v38  ;;  %v1433_v23 = vld [vmem:[#allocation25 + $0x250] sm:$0xff]  ;;  %v1446_v28 = vld [vmem:[#allocation25 + $0x2b8] sm:$0xff] }
 0x56e   :  { %3152 = vmatpush1.bf16.msra.mxu1 %v3151_v34  ;;  %3216 = vmatpush1.bf16.msra.mxu0 %v3215_v35  ;;  %v1408_v34 = vld [vmem:[#allocation25 + $0x188] sm:$0xff]  ;;  %v1437_v24 = vld [vmem:[#allocation25 + $0x270] sm:$0xff] }
 0x56f   :  { %1573 = vmatprep.mubr.f32.mxu1 %v4526_v33  ;;  %1644 = vmatprep.mubr.f32.mxu0 %v4526_v33  ;;  %v1412_v35 = vld [vmem:[#allocation25 + $0x1a8] sm:$0xff]  ;;  %v1445_v37 = vld [vmem:[#allocation25 + $0x2b0] sm:$0xff] }
 0x570   :  { %3154 = vmatprep.subr.bf16.mxu1 %v3153_v42  ;;  %3218 = vmatprep.subr.bf16.mxu0 %v3217_v43  ;;  %v1411_v42 = vld [vmem:[#allocation25 + $0x1a0] sm:$0xff]  ;;  %v3173_v43 = vpack.c.bf16 %v1412_v35, %v1408_v34  ;;  %v3253_v35 = vpack.c.bf16 %v1446_v28, %v1442_v27  ;;  %v1457_v61 = vld [vmem:[#allocation25 + $0x310] sm:$0xff] }
 0x571   :  { %v1461_v62 = vld [vmem:[#allocation25 + $0x330] sm:$0xff] }
 0x572   :  { %3156 = vmatpush1.bf16.msra.mxu1 %v3155_v47  ;;  %3220 = vmatpush1.bf16.msra.mxu0 %v3219_v48  ;;  %v1416_v47 = vld [vmem:[#allocation25 + $0x1c8] sm:$0xff]  ;;  %v1465_v11 = vld [vmem:[#allocation25 + $0x350] sm:$0xff] }
 0x573   :  { %3158 = vmatprep.subr.bf16.mxu1 %v3157_v51  ;;  %3222 = vmatprep.subr.bf16.mxu0 %v3221_v52  ;;  %v1420_v48 = vld [vmem:[#allocation25 + $0x1e8] sm:$0xff]  ;;  %v3175_v51 = vpack.c.bf16 %v1411_v42, %v1407_v41  ;;  %v3239_v52 = vpack.c.bf16 %v1413_v46, %v1409_v45  ;;  %v1450_v41 = vld [vmem:[#allocation25 + $0x2d8] sm:$0xff]  ;;  %v1447_v45 = vld [vmem:[#allocation25 + $0x2c0] sm:$0xff] }
 0x574   :  { %v3177_v55 = vpack.c.bf16 %v1420_v48, %v1416_v47  ;;  %v1454_v42 = vld [vmem:[#allocation25 + $0x2f8] sm:$0xff]  ;;  %v1451_v46 = vld [vmem:[#allocation25 + $0x2e0] sm:$0xff]  ;;  %v1469_v14 = vld [vmem:[#allocation25 + $0x370] sm:$0xff] }
 0x575   :  { %v3257_v48 = vpack.c.bf16 %v1454_v42, %v1450_v41  ;;  %v1473_v27 = vld [vmem:[#allocation25 + $0x390] sm:$0xff] }
 0x576   :  { %3160 = vmatpush1.bf16.msra.mxu1 %v3159_v59  ;;  %3224 = vmatpush1.bf16.msra.mxu0 %v3223_v60  ;;  %v1424_v59 = vld [vmem:[#allocation25 + $0x208] sm:$0xff]  ;;  %v1477_v28 = vld [vmem:[#allocation25 + $0x3b0] sm:$0xff] }
 0x577   :  { %3162 = vmatprep.subr.bf16.mxu1 %v3161_v63  ;;  %3226 = vmatprep.subr.bf16.mxu0 %v3225_v2  ;;  %v1428_v60 = vld [vmem:[#allocation25 + $0x228] sm:$0xff]  ;;  %v3179_v63 = vpack.c.bf16 %v1419_v54, %v1415_v53  ;;  %v3243_v2 = vpack.c.bf16 %v1421_v58, %v1417_v57  ;;  %v1458_v53 = vld [vmem:[#allocation25 + $0x318] sm:$0xff]  ;;  %v1455_v57 = vld [vmem:[#allocation25 + $0x300] sm:$0xff] }
 0x578   :  { %v3181_v5 = vpack.c.bf16 %v1428_v60, %v1424_v59  ;;  %v1462_v54 = vld [vmem:[#allocation25 + $0x338] sm:$0xff]  ;;  %v1459_v58 = vld [vmem:[#allocation25 + $0x320] sm:$0xff]  ;;  %v1481_v41 = vld [vmem:[#allocation25 + $0x3d0] sm:$0xff] }
 0x579   :  { %v3261_v60 = vpack.c.bf16 %v1462_v54, %v1458_v53  ;;  %v1485_v42 = vld [vmem:[#allocation25 + $0x3f0] sm:$0xff] }
 0x57a   :  { %3164 = vmatpush1.bf16.msra.mxu1 %v3163_v9  ;;  %3228 = vmatpush1.bf16.msra.mxu0 %v3227_v10  ;;  %v1432_v9 = vld [vmem:[#allocation25 + $0x248] sm:$0xff]  ;;  %v1653_v53 = vld [vmem:[#allocation26 + $0x10] sm:$0xff] }
 0x57b   :  { %3166 = vmatprep.subr.bf16.mxu1 %v3165_v16  ;;  %3230 = vmatprep.subr.bf16.mxu0 %v3229_v17  ;;  %v1436_v10 = vld [vmem:[#allocation25 + $0x268] sm:$0xff]  ;;  %v3183_v16 = vpack.c.bf16 %v1427_v4, %v1423_v3  ;;  %v3247_v17 = vpack.c.bf16 %v1429_v8, %v1425_v7  ;;  %v1466_v3 = vld [vmem:[#allocation25 + $0x358] sm:$0xff]  ;;  %v1463_v7 = vld [vmem:[#allocation25 + $0x340] sm:$0xff] }
 0x57c   :  { %v3185_v21 = vpack.c.bf16 %v1436_v10, %v1432_v9  ;;  %v1470_v4 = vld [vmem:[#allocation25 + $0x378] sm:$0xff]  ;;  %v1467_v8 = vld [vmem:[#allocation25 + $0x360] sm:$0xff]  ;;  %v1657_v54 = vld [vmem:[#allocation26 + $0x30] sm:$0xff] }
 0x57d   :  { %v3265_v10 = vpack.c.bf16 %v1470_v4, %v1466_v3  ;;  %v1665_v4 = vld [vmem:[#allocation26 + $0x70] sm:$0xff] }
 0x57e   :  { %3168 = vmatpush1.bf16.msra.mxu1 %v3167_v25  ;;  %3232 = vmatpush1.bf16.msra.mxu0 %v3231_v26  ;;  %v1440_v25 = vld [vmem:[#allocation25 + $0x288] sm:$0xff] }
 0x57f   :  { %3170 = vmatprep.subr.bf16.mxu1 %v3169_v29  ;;  %3234 = vmatprep.subr.bf16.mxu0 %v3233_v30  ;;  %v1444_v26 = vld [vmem:[#allocation25 + $0x2a8] sm:$0xff]  ;;  %v3187_v29 = vpack.c.bf16 %v1435_v20, %v1431_v18  ;;  %v3251_v30 = vpack.c.bf16 %v1437_v24, %v1433_v23  ;;  %v1474_v18 = vld [vmem:[#allocation25 + $0x398] sm:$0xff]  ;;  %v1471_v23 = vld [vmem:[#allocation25 + $0x380] sm:$0xff] }
 0x580   :  { %v3189_v34 = vpack.c.bf16 %v1444_v26, %v1440_v25  ;;  %v1478_v20 = vld [vmem:[#allocation25 + $0x3b8] sm:$0xff]  ;;  %v1475_v24 = vld [vmem:[#allocation25 + $0x3a0] sm:$0xff] }
 0x581   :  { %v3269_v26 = vpack.c.bf16 %v1478_v20, %v1474_v18  ;;  %v1673_v20 = vld [vmem:[#allocation26 + $0xb0] sm:$0xff] }
 0x582   :  { %3172 = vmatpush1.bf16.msra.mxu1 %v3171_v39  ;;  %3236 = vmatpush1.bf16.msra.mxu0 %v3235_v40  ;;  %v1448_v39 = vld [vmem:[#allocation25 + $0x2c8] sm:$0xff] }
 0x583   :  { %3174 = vmatprep.subr.bf16.mxu1 %v3173_v43  ;;  %3238 = vmatprep.subr.bf16.mxu0 %v3237_v44  ;;  %v1452_v40 = vld [vmem:[#allocation25 + $0x2e8] sm:$0xff]  ;;  %v3191_v43 = vpack.c.bf16 %v1443_v32, %v1439_v31  ;;  %v3255_v44 = vpack.c.bf16 %v1445_v37, %v1441_v36  ;;  %v1482_v31 = vld [vmem:[#allocation25 + $0x3d8] sm:$0xff]  ;;  %v1479_v36 = vld [vmem:[#allocation25 + $0x3c0] sm:$0xff] }
 0x584   :  { %v3193_v47 = vpack.c.bf16 %v1452_v40, %v1448_v39  ;;  %v1486_v32 = vld [vmem:[#allocation25 + $0x3f8] sm:$0xff]  ;;  %v1483_v37 = vld [vmem:[#allocation25 + $0x3e0] sm:$0xff] }
 0x585   :  { %v3273_v40 = vpack.c.bf16 %v1486_v32, %v1482_v31  ;;  %v1681_v32 = vld [vmem:[#allocation26 + $0xf0] sm:$0xff] }
 0x586   :  { %3176 = vmatpush1.bf16.msra.mxu1 %v3175_v51  ;;  %3240 = vmatpush1.bf16.msra.mxu0 %v3239_v52  ;;  %v1456_v51 = vld [vmem:[#allocation25 + $0x308] sm:$0xff] }
 0x587   :  { %3178 = vmatprep.subr.bf16.mxu1 %v3177_v55  ;;  %3242 = vmatprep.subr.bf16.mxu0 %v3241_v56  ;;  %v1460_v52 = vld [vmem:[#allocation25 + $0x328] sm:$0xff]  ;;  %v3195_v55 = vpack.c.bf16 %v1451_v46, %v1447_v45  ;;  %v3259_v56 = vpack.c.bf16 %v1453_v50, %v1449_v49  ;;  %v1654_v45 = vld [vmem:[#allocation26 + $0x18] sm:$0xff] }
 0x588   :  { %v3197_v59 = vpack.c.bf16 %v1460_v52, %v1456_v51  ;;  %v1658_v46 = vld [vmem:[#allocation26 + $0x38] sm:$0xff]  ;;  %v1651_v51 = vld [vmem:[#allocation26] sm:$0xff] }
 0x589   :  { %v3341_v50 = vpack.c.bf16 %v1658_v46, %v1654_v45  ;;  %v1655_v52 = vld [vmem:[#allocation26 + $0x20] sm:$0xff]  ;;  %v1689_v46 = vld [vmem:[#allocation26 + $0x130] sm:$0xff] }
 0x58a   :  { %3180 = vmatpush1.bf16.msra.mxu1 %v3179_v63  ;;  %3244 = vmatpush1.bf16.msra.mxu0 %v3243_v2  ;;  %v1464_v63 = vld [vmem:[#allocation25 + $0x348] sm:$0xff] }
 0x58b   :  { %3182 = vmatprep.subr.bf16.mxu1 %v3181_v5  ;;  %3246 = vmatprep.subr.bf16.mxu0 %v3245_v6  ;;  %v1468_v2 = vld [vmem:[#allocation25 + $0x368] sm:$0xff]  ;;  %v3199_v5 = vpack.c.bf16 %v1459_v58, %v1455_v57  ;;  %v3263_v6 = vpack.c.bf16 %v1461_v62, %v1457_v61  ;;  %v1662_v57 = vld [vmem:[#allocation26 + $0x58] sm:$0xff]  ;;  %v1659_v61 = vld [vmem:[#allocation26 + $0x40] sm:$0xff] }
 0x58c   :  { %v3201_v9 = vpack.c.bf16 %v1468_v2, %v1464_v63  ;;  %v1666_v58 = vld [vmem:[#allocation26 + $0x78] sm:$0xff]  ;;  %v1663_v62 = vld [vmem:[#allocation26 + $0x60] sm:$0xff]  ;;  %v1661_v63 = vld [vmem:[#allocation26 + $0x50] sm:$0xff] }
 0x58d   :  { %v3345_v3 = vpack.c.bf16 %v1666_v58, %v1662_v57  ;;  %v1697_v58 = vld [vmem:[#allocation26 + $0x170] sm:$0xff] }
 0x58e   :  { %3184 = vmatpush1.bf16.msra.mxu1 %v3183_v16  ;;  %3248 = vmatpush1.bf16.msra.mxu0 %v3247_v17  ;;  %v1472_v16 = vld [vmem:[#allocation25 + $0x388] sm:$0xff] }
 0x58f   :  { %3186 = vmatprep.subr.bf16.mxu1 %v3185_v21  ;;  %3250 = vmatprep.subr.bf16.mxu0 %v3249_v0  ;;  %v1476_v17 = vld [vmem:[#allocation25 + $0x3a8] sm:$0xff]  ;;  %v3203_v21 = vpack.c.bf16 %v1467_v8, %v1463_v7  ;;  %v3267_v0 = vpack.c.bf16 %v1469_v14, %v1465_v11  ;;  %v1670_v7 = vld [vmem:[#allocation26 + $0x98] sm:$0xff]  ;;  %v1667_v14 = vld [vmem:[#allocation26 + $0x80] sm:$0xff] }
 0x590   :  { %v3205_v25 = vpack.c.bf16 %v1476_v17, %v1472_v16  ;;  %v1674_v8 = vld [vmem:[#allocation26 + $0xb8] sm:$0xff]  ;;  %v1671_v16 = vld [vmem:[#allocation26 + $0xa0] sm:$0xff]  ;;  %v1669_v17 = vld [vmem:[#allocation26 + $0x90] sm:$0xff] }
 0x591   :  { %v3349_v18 = vpack.c.bf16 %v1674_v8, %v1670_v7  ;;  %v1705_v8 = vld [vmem:[#allocation26 + $0x1b0] sm:$0xff] }
 0x592   :  { %3188 = vmatpush1.bf16.msra.mxu1 %v3187_v29  ;;  %3252 = vmatpush1.bf16.msra.mxu0 %v3251_v30  ;;  %v1480_v29 = vld [vmem:[#allocation25 + $0x3c8] sm:$0xff] }
 0x593   :  { %3190 = vmatprep.subr.bf16.mxu1 %v3189_v34  ;;  %3254 = vmatprep.subr.bf16.mxu0 %v3253_v35  ;;  %v1484_v30 = vld [vmem:[#allocation25 + $0x3e8] sm:$0xff]  ;;  %v3207_v34 = vpack.c.bf16 %v1475_v24, %v1471_v23  ;;  %v3271_v35 = vpack.c.bf16 %v1477_v28, %v1473_v27  ;;  %v1678_v23 = vld [vmem:[#allocation26 + $0xd8] sm:$0xff]  ;;  %v1675_v28 = vld [vmem:[#allocation26 + $0xc0] sm:$0xff] }
 0x594   :  { %v3209_v39 = vpack.c.bf16 %v1484_v30, %v1480_v29  ;;  %v1682_v24 = vld [vmem:[#allocation26 + $0xf8] sm:$0xff]  ;;  %v1679_v29 = vld [vmem:[#allocation26 + $0xe0] sm:$0xff]  ;;  %v1677_v30 = vld [vmem:[#allocation26 + $0xd0] sm:$0xff] }
 0x595   :  { %v3353_v31 = vpack.c.bf16 %v1682_v24, %v1678_v23  ;;  %v1713_v24 = vld [vmem:[#allocation26 + $0x1f0] sm:$0xff] }
 0x596   :  { %3192 = vmatpush1.bf16.msra.mxu1 %v3191_v43  ;;  %3256 = vmatpush1.bf16.msra.mxu0 %v3255_v44  ;;  %v1652_v43 = vld [vmem:[#allocation26 + $0x8] sm:$0xff] }
 0x597   :  { %3194 = vmatprep.subr.bf16.mxu1 %v3193_v47  ;;  %3258 = vmatprep.subr.bf16.mxu0 %v3257_v48  ;;  %v1656_v44 = vld [vmem:[#allocation26 + $0x28] sm:$0xff]  ;;  %v3211_v47 = vpack.c.bf16 %v1483_v37, %v1479_v36  ;;  %v3275_v48 = vpack.c.bf16 %v1485_v42, %v1481_v41  ;;  %v1686_v36 = vld [vmem:[#allocation26 + $0x118] sm:$0xff]  ;;  %v1683_v42 = vld [vmem:[#allocation26 + $0x100] sm:$0xff] }
 0x598   :  { %v3277_v49 = vpack.c.bf16 %v1656_v44, %v1652_v43  ;;  %v1690_v37 = vld [vmem:[#allocation26 + $0x138] sm:$0xff]  ;;  %v1687_v43 = vld [vmem:[#allocation26 + $0x120] sm:$0xff]  ;;  %v1685_v44 = vld [vmem:[#allocation26 + $0x110] sm:$0xff] }
 0x599   :  { %v3357_v45 = vpack.c.bf16 %v1690_v37, %v1686_v36  ;;  %v1721_v37 = vld [vmem:[#allocation26 + $0x230] sm:$0xff] }
 0x59a   :  { %3196 = vmatpush1.bf16.msra.mxu1 %v3195_v55  ;;  %3260 = vmatpush1.bf16.msra.mxu0 %v3259_v56  ;;  %v1660_v55 = vld [vmem:[#allocation26 + $0x48] sm:$0xff] }
 0x59b   :  { %3198 = vmatprep.subr.bf16.mxu1 %v3197_v59  ;;  %3262 = vmatprep.subr.bf16.mxu0 %v3261_v60  ;;  %v1664_v56 = vld [vmem:[#allocation26 + $0x68] sm:$0xff]  ;;  %v3279_v59 = vpack.c.bf16 %v1655_v52, %v1651_v51  ;;  %v3343_v60 = vpack.c.bf16 %v1657_v54, %v1653_v53  ;;  %v3295_v51 = vpack.c.bf16 %v1687_v43, %v1683_v42  ;;  %v1691_v54 = vld [vmem:[#allocation26 + $0x140] sm:$0xff]  ;;  %v1730_v42 = vld [vmem:[#allocation26 + $0x278] sm:$0xff] }
 0x59c   :  { %v3281_v2 = vpack.c.bf16 %v1664_v56, %v1660_v55  ;;  %v3359_v52 = vpack.c.bf16 %v1689_v46, %v1685_v44  ;;  %v1695_v55 = vld [vmem:[#allocation26 + $0x160] sm:$0xff]  ;;  %v1693_v56 = vld [vmem:[#allocation26 + $0x150] sm:$0xff] }
 0x59d   :  { %v1723_v46 = vld [vmem:[#allocation26 + $0x240] sm:$0xff] }
 0x59e   :  { %3200 = vmatpush1.bf16.msra.mxu1 %v3199_v5  ;;  %3264 = vmatpush1.bf16.msra.mxu0 %v3263_v6  ;;  %v1668_v5 = vld [vmem:[#allocation26 + $0x88] sm:$0xff] }
 0x59f   :  { %3202 = vmatprep.subr.bf16.mxu1 %v3201_v9  ;;  %3266 = vmatprep.subr.bf16.mxu0 %v3265_v10  ;;  %v1672_v6 = vld [vmem:[#allocation26 + $0xa8] sm:$0xff]  ;;  %v3283_v9 = vpack.c.bf16 %v1663_v62, %v1659_v61  ;;  %v3347_v10 = vpack.c.bf16 %v1665_v4, %v1661_v63  ;;  %v1702_v61 = vld [vmem:[#allocation26 + $0x198] sm:$0xff]  ;;  %v3299_v63 = vpack.c.bf16 %v1695_v55, %v1691_v54  ;;  %v1699_v4 = vld [vmem:[#allocation26 + $0x180] sm:$0xff] }
 0x5a0   :  { %v3285_v11 = vpack.c.bf16 %v1672_v6, %v1668_v5  ;;  %v1706_v62 = vld [vmem:[#allocation26 + $0x1b8] sm:$0xff]  ;;  %v1703_v5 = vld [vmem:[#allocation26 + $0x1a0] sm:$0xff]  ;;  %v1701_v6 = vld [vmem:[#allocation26 + $0x190] sm:$0xff] }
 0x5a1   :  { %v3365_v7 = vpack.c.bf16 %v1706_v62, %v1702_v61  ;;  %v1738_v54 = vld [vmem:[#allocation26 + $0x2b8] sm:$0xff]  ;;  %v1737_v62 = vld [vmem:[#allocation26 + $0x2b0] sm:$0xff] }
 0x5a2   :  { %3204 = vmatpush1.bf16.msra.mxu1 %v3203_v21  ;;  %3268 = vmatpush1.bf16.msra.mxu0 %v3267_v0  ;;  %v1676_v21 = vld [vmem:[#allocation26 + $0xc8] sm:$0xff] }
 0x5a3   :  { %3206 = vmatprep.subr.bf16.mxu1 %v3205_v25  ;;  %3270 = vmatprep.subr.bf16.mxu0 %v3269_v26  ;;  %v1680_v0 = vld [vmem:[#allocation26 + $0xe8] sm:$0xff]  ;;  %v3287_v25 = vpack.c.bf16 %v1671_v16, %v1667_v14  ;;  %v3351_v26 = vpack.c.bf16 %v1673_v20, %v1669_v17  ;;  %v1714_v14 = vld [vmem:[#allocation26 + $0x1f8] sm:$0xff]  ;;  %v3303_v16 = vpack.c.bf16 %v1703_v5, %v1699_v4  ;;  %v1707_v20 = vld [vmem:[#allocation26 + $0x1c0] sm:$0xff] }
 0x5a4   :  { %v3289_v27 = vpack.c.bf16 %v1680_v0, %v1676_v21  ;;  %v3367_v17 = vpack.c.bf16 %v1705_v8, %v1701_v6  ;;  %v1711_v21 = vld [vmem:[#allocation26 + $0x1e0] sm:$0xff]  ;;  %v1709_v0 = vld [vmem:[#allocation26 + $0x1d0] sm:$0xff]  ;;  %v1746_v4 = vld [vmem:[#allocation26 + $0x2f8] sm:$0xff] }
 0x5a5   :  { %v1739_v8 = vld [vmem:[#allocation26 + $0x2c0] sm:$0xff] }
 0x5a6   :  { %3208 = vmatpush1.bf16.msra.mxu1 %v3207_v34  ;;  %3272 = vmatpush1.bf16.msra.mxu0 %v3271_v35  ;;  %v1684_v34 = vld [vmem:[#allocation26 + $0x108] sm:$0xff] }
 0x5a7   :  { %3210 = vmatprep.subr.bf16.mxu1 %v3209_v39  ;;  %3274 = vmatprep.subr.bf16.mxu0 %v3273_v40  ;;  %v1688_v35 = vld [vmem:[#allocation26 + $0x128] sm:$0xff]  ;;  %v3291_v39 = vpack.c.bf16 %v1679_v29, %v1675_v28  ;;  %v3355_v40 = vpack.c.bf16 %v1681_v32, %v1677_v30  ;;  %v1722_v28 = vld [vmem:[#allocation26 + $0x238] sm:$0xff]  ;;  %v3307_v29 = vpack.c.bf16 %v1711_v21, %v1707_v20  ;;  %v1715_v32 = vld [vmem:[#allocation26 + $0x200] sm:$0xff] }
 0x5a8   :  { %v3293_v41 = vpack.c.bf16 %v1688_v35, %v1684_v34  ;;  %v3371_v30 = vpack.c.bf16 %v1713_v24, %v1709_v0  ;;  %v1719_v34 = vld [vmem:[#allocation26 + $0x220] sm:$0xff]  ;;  %v1717_v35 = vld [vmem:[#allocation26 + $0x210] sm:$0xff]  ;;  %v1754_v20 = vld [vmem:[#allocation26 + $0x338] sm:$0xff] }
 0x5a9   :  { %v3311_v43 = vpack.c.bf16 %v1719_v34, %v1715_v32  ;;  %v3375_v44 = vpack.c.bf16 %v1721_v37, %v1717_v35  ;;  %v1747_v24 = vld [vmem:[#allocation26 + $0x300] sm:$0xff]  ;;  %v1762_v32 = vld [vmem:[#allocation26 + $0x378] sm:$0xff] }
 0x5aa   :  { %3212 = vmatpush1.bf16.msra.mxu1 %v3211_v47  ;;  %3276 = vmatpush1.bf16.msra.mxu0 %v3275_v48  ;;  %v1692_v47 = vld [vmem:[#allocation26 + $0x148] sm:$0xff]  ;;  %v1755_v37 = vld [vmem:[#allocation26 + $0x340] sm:$0xff] }
 0x5ab   :  { %3278 = vmatprep.subr.bf16.mxu1 %v3277_v49  ;;  %3342 = vmatprep.subr.bf16.mxu0 %v3341_v50  ;;  %v1696_v48 = vld [vmem:[#allocation26 + $0x168] sm:$0xff]  ;;  %v1694_v49 = vld [vmem:[#allocation26 + $0x158] sm:$0xff] }
 0x5ac   :  { %v1698_v50 = vld [vmem:[#allocation26 + $0x178] sm:$0xff]  ;;  %v3297_v53 = vpack.c.bf16 %v1696_v48, %v1692_v47  ;;  %v1727_v47 = vld [vmem:[#allocation26 + $0x260] sm:$0xff]  ;;  %v1725_v48 = vld [vmem:[#allocation26 + $0x250] sm:$0xff] }
 0x5ad   :  { %1574 = vmatmul.mubr.f32.vlgmr.msra.gmra.mrb[8].mxu1 %v4528_v38  ;;  %1645 = vmatmul.mubr.f32.vlgmr.msra.gmra.mrb[6].mxu0 %v4528_v38  ;;  %v3361_v57 = vpack.c.bf16 %v1698_v50, %v1694_v49  ;;  %v1729_v50 = vld [vmem:[#allocation26 + $0x270] sm:$0xff]  ;;  %v3315_v55 = vpack.c.bf16 %v1727_v47, %v1723_v46  ;;  %v1770_v46 = vld [vmem:[#allocation26 + $0x3b8] sm:$0xff] }
 0x5ae   :  { %3280 = vmatpush1.bf16.msra.mxu1 %v3279_v59  ;;  %1865 = vmatprep.mubr.f32.mxu1 %v4526_v33  ;;  %v1700_v59 = vld [vmem:[#allocation26 + $0x188] sm:$0xff] }
 0x5af   :  { %3344 = vmatpush1.bf16.msra.mxu0 %v3343_v60  ;;  %1936 = vmatprep.mubr.f32.mxu0 %v4526_v33  ;;  %v1704_v60 = vld [vmem:[#allocation26 + $0x1a8] sm:$0xff] }
 0x5b0   :  { %3282 = vmatprep.subr.bf16.mxu1 %v3281_v2  ;;  %3346 = vmatprep.subr.bf16.mxu0 %v3345_v3  ;;  %v3363_v2 = vpack.c.bf16 %v1697_v58, %v1693_v56  ;;  %v3301_v3 = vpack.c.bf16 %v1704_v60, %v1700_v59  ;;  %v3379_v56 = vpack.c.bf16 %v1729_v50, %v1725_v48  ;;  %v1731_v58 = vld [vmem:[#allocation26 + $0x280] sm:$0xff]  ;;  %v1733_v60 = vld [vmem:[#allocation26 + $0x290] sm:$0xff] }
 0x5b1   :  { %v1735_v59 = vld [vmem:[#allocation26 + $0x2a0] sm:$0xff]  ;;  %v3383_v6 = vpack.c.bf16 %v1737_v62, %v1733_v60 }
 0x5b2   :  { %3284 = vmatpush1.bf16.msra.mxu1 %v3283_v9  ;;  %v1708_v9 = vld [vmem:[#allocation26 + $0x1c8] sm:$0xff]  ;;  %v3319_v5 = vpack.c.bf16 %v1735_v59, %v1731_v58  ;;  %v1763_v50 = vld [vmem:[#allocation26 + $0x380] sm:$0xff]  ;;  %v1778_v58 = vld [vmem:[#allocation26 + $0x3f8] sm:$0xff] }
 0x5b3   :  { %3348 = vmatpush1.bf16.msra.mxu0 %v3347_v10  ;;  %3286 = vmatprep.subr.bf16.mxu1 %v3285_v11  ;;  %v1712_v10 = vld [vmem:[#allocation26 + $0x1e8] sm:$0xff]  ;;  %v1710_v11 = vld [vmem:[#allocation26 + $0x1d8] sm:$0xff]  ;;  %v1771_v62 = vld [vmem:[#allocation26 + $0x3c0] sm:$0xff] }
 0x5b4   :  { %3350 = vmatprep.subr.bf16.mxu0 %v3349_v18  ;;  %v3305_v18 = vpack.c.bf16 %v1712_v10, %v1708_v9  ;;  %v3369_v23 = vpack.c.bf16 %v1714_v14, %v1710_v11  ;;  %v1743_v9 = vld [vmem:[#allocation26 + $0x2e0] sm:$0xff]  ;;  %v1741_v10 = vld [vmem:[#allocation26 + $0x2d0] sm:$0xff] }
 0x5b5   :  { %v1745_v14 = vld [vmem:[#allocation26 + $0x2f0] sm:$0xff]  ;;  %v3323_v21 = vpack.c.bf16 %v1743_v9, %v1739_v8  ;;  %v1974_v8 = vld [vmem:[#allocation28 + $0x38] sm:$0xff] }
 0x5b6   :  { %3288 = vmatpush1.bf16.msra.mxu1 %v3287_v25  ;;  %v1716_v25 = vld [vmem:[#allocation26 + $0x208] sm:$0xff]  ;;  %v3387_v0 = vpack.c.bf16 %v1745_v14, %v1741_v10  ;;  %v1967_v14 = vld [vmem:[#allocation28] sm:$0xff] }
 0x5b7   :  { %3352 = vmatpush1.bf16.msra.mxu0 %v3351_v26  ;;  %3290 = vmatprep.subr.bf16.mxu1 %v3289_v27  ;;  %v1720_v26 = vld [vmem:[#allocation26 + $0x228] sm:$0xff]  ;;  %v1718_v27 = vld [vmem:[#allocation26 + $0x218] sm:$0xff] }
 0x5b8   :  { %3354 = vmatprep.subr.bf16.mxu0 %v3353_v31  ;;  %v3309_v31 = vpack.c.bf16 %v1720_v26, %v1716_v25  ;;  %v3373_v36 = vpack.c.bf16 %v1722_v28, %v1718_v27  ;;  %v1751_v25 = vld [vmem:[#allocation26 + $0x320] sm:$0xff]  ;;  %v1749_v26 = vld [vmem:[#allocation26 + $0x310] sm:$0xff] }
 0x5b9   :  { %v1753_v28 = vld [vmem:[#allocation26 + $0x330] sm:$0xff]  ;;  %v3327_v34 = vpack.c.bf16 %v1751_v25, %v1747_v24  ;;  %v1978_v24 = vld [vmem:[#allocation28 + $0x58] sm:$0xff] }
 0x5ba   :  { %3292 = vmatpush1.bf16.msra.mxu1 %v3291_v39  ;;  %v1724_v39 = vld [vmem:[#allocation26 + $0x248] sm:$0xff]  ;;  %v3391_v35 = vpack.c.bf16 %v1753_v28, %v1749_v26  ;;  %v1982_v25 = vld [vmem:[#allocation28 + $0x78] sm:$0xff]  ;;  %v1979_v28 = vld [vmem:[#allocation28 + $0x60] sm:$0xff] }
 0x5bb   :  { %3356 = vmatpush1.bf16.msra.mxu0 %v3355_v40  ;;  %3294 = vmatprep.subr.bf16.mxu1 %v3293_v41  ;;  %v1728_v40 = vld [vmem:[#allocation26 + $0x268] sm:$0xff]  ;;  %v1726_v41 = vld [vmem:[#allocation26 + $0x258] sm:$0xff] }
 0x5bc   :  { %3358 = vmatprep.subr.bf16.mxu0 %v3357_v45  ;;  %v3313_v45 = vpack.c.bf16 %v1728_v40, %v1724_v39  ;;  %v3377_v49 = vpack.c.bf16 %v1730_v42, %v1726_v41  ;;  %v1759_v39 = vld [vmem:[#allocation26 + $0x360] sm:$0xff]  ;;  %v1757_v40 = vld [vmem:[#allocation26 + $0x350] sm:$0xff] }
 0x5bd   :  { %v1761_v42 = vld [vmem:[#allocation26 + $0x370] sm:$0xff]  ;;  %v3331_v47 = vpack.c.bf16 %v1759_v39, %v1755_v37  ;;  %v1990_v37 = vld [vmem:[#allocation28 + $0xb8] sm:$0xff] }
 0x5be   :  { %3296 = vmatpush1.bf16.msra.mxu1 %v3295_v51  ;;  %v1732_v51 = vld [vmem:[#allocation26 + $0x288] sm:$0xff]  ;;  %v3395_v48 = vpack.c.bf16 %v1761_v42, %v1757_v40  ;;  %v1983_v42 = vld [vmem:[#allocation28 + $0x80] sm:$0xff] }
 0x5bf   :  { %3360 = vmatpush1.bf16.msra.mxu0 %v3359_v52  ;;  %3298 = vmatprep.subr.bf16.mxu1 %v3297_v53  ;;  %v1736_v52 = vld [vmem:[#allocation26 + $0x2a8] sm:$0xff]  ;;  %v1734_v53 = vld [vmem:[#allocation26 + $0x298] sm:$0xff] }
 0x5c0   :  { %3362 = vmatprep.subr.bf16.mxu0 %v3361_v57  ;;  %v3317_v57 = vpack.c.bf16 %v1736_v52, %v1732_v51  ;;  %v3381_v61 = vpack.c.bf16 %v1738_v54, %v1734_v53  ;;  %v1767_v51 = vld [vmem:[#allocation26 + $0x3a0] sm:$0xff]  ;;  %v1765_v52 = vld [vmem:[#allocation26 + $0x390] sm:$0xff] }
 0x5c1   :  { %v1769_v54 = vld [vmem:[#allocation26 + $0x3b0] sm:$0xff]  ;;  %v3335_v59 = vpack.c.bf16 %v1767_v51, %v1763_v50  ;;  %v1998_v50 = vld [vmem:[#allocation28 + $0xf8] sm:$0xff] }
 0x5c2   :  { %3300 = vmatpush1.bf16.msra.mxu1 %v3299_v63  ;;  %v1740_v63 = vld [vmem:[#allocation26 + $0x2c8] sm:$0xff]  ;;  %v3399_v60 = vpack.c.bf16 %v1769_v54, %v1765_v52  ;;  %v1991_v54 = vld [vmem:[#allocation28 + $0xc0] sm:$0xff] }
 0x5c3   :  { %3364 = vmatpush1.bf16.msra.mxu0 %v3363_v2  ;;  %3302 = vmatprep.subr.bf16.mxu1 %v3301_v3  ;;  %v1744_v2 = vld [vmem:[#allocation26 + $0x2e8] sm:$0xff]  ;;  %v1742_v3 = vld [vmem:[#allocation26 + $0x2d8] sm:$0xff] }
 0x5c4   :  { %3366 = vmatprep.subr.bf16.mxu0 %v3365_v7  ;;  %v3321_v7 = vpack.c.bf16 %v1744_v2, %v1740_v63  ;;  %v3385_v11 = vpack.c.bf16 %v1746_v4, %v1742_v3  ;;  %v1775_v63 = vld [vmem:[#allocation26 + $0x3e0] sm:$0xff]  ;;  %v1773_v2 = vld [vmem:[#allocation26 + $0x3d0] sm:$0xff] }
 0x5c5   :  { %v1777_v4 = vld [vmem:[#allocation26 + $0x3f0] sm:$0xff]  ;;  %v3339_v9 = vpack.c.bf16 %v1775_v63, %v1771_v62 }
 0x5c6   :  { %3304 = vmatpush1.bf16.msra.mxu1 %v3303_v16  ;;  %v1748_v16 = vld [vmem:[#allocation26 + $0x308] sm:$0xff]  ;;  %v3403_v10 = vpack.c.bf16 %v1777_v4, %v1773_v2  ;;  %v2003_v4 = vld [vmem:[#allocation28 + $0x120] sm:$0xff] }
 0x5c7   :  { %3368 = vmatpush1.bf16.msra.mxu0 %v3367_v17  ;;  %3306 = vmatprep.subr.bf16.mxu1 %v3305_v18  ;;  %v1752_v17 = vld [vmem:[#allocation26 + $0x328] sm:$0xff]  ;;  %v1750_v18 = vld [vmem:[#allocation26 + $0x318] sm:$0xff] }
 0x5c8   :  { %3370 = vmatprep.subr.bf16.mxu0 %v3369_v23  ;;  %v3325_v23 = vpack.c.bf16 %v1752_v17, %v1748_v16  ;;  %v3389_v27 = vpack.c.bf16 %v1754_v20, %v1750_v18  ;;  %v1971_v16 = vld [vmem:[#allocation28 + $0x20] sm:$0xff]  ;;  %v1969_v18 = vld [vmem:[#allocation28 + $0x10] sm:$0xff] }
 0x5c9   :  { %v1973_v20 = vld [vmem:[#allocation28 + $0x30] sm:$0xff] }
 0x5ca   :  { %3308 = vmatpush1.bf16.msra.mxu1 %v3307_v29  ;;  %v1756_v29 = vld [vmem:[#allocation26 + $0x348] sm:$0xff]  ;;  %v3471_v26 = vpack.c.bf16 %v1973_v20, %v1969_v18  ;;  %v2007_v18 = vld [vmem:[#allocation28 + $0x140] sm:$0xff] }
 0x5cb   :  { %3372 = vmatpush1.bf16.msra.mxu0 %v3371_v30  ;;  %3310 = vmatprep.subr.bf16.mxu1 %v3309_v31  ;;  %v1760_v30 = vld [vmem:[#allocation26 + $0x368] sm:$0xff]  ;;  %v1758_v31 = vld [vmem:[#allocation26 + $0x358] sm:$0xff]  ;;  %v2011_v20 = vld [vmem:[#allocation28 + $0x160] sm:$0xff] }
 0x5cc   :  { %3374 = vmatprep.subr.bf16.mxu0 %v3373_v36  ;;  %v3329_v36 = vpack.c.bf16 %v1760_v30, %v1756_v29  ;;  %v3393_v41 = vpack.c.bf16 %v1762_v32, %v1758_v31  ;;  %v1977_v29 = vld [vmem:[#allocation28 + $0x50] sm:$0xff]  ;;  %v1984_v32 = vld [vmem:[#allocation28 + $0x88] sm:$0xff] }
 0x5cd   :  { %v1981_v31 = vld [vmem:[#allocation28 + $0x70] sm:$0xff] }
 0x5ce   :  { %3312 = vmatpush1.bf16.msra.mxu1 %v3311_v43  ;;  %v1764_v43 = vld [vmem:[#allocation26 + $0x388] sm:$0xff]  ;;  %v3475_v40 = vpack.c.bf16 %v1981_v31, %v1977_v29  ;;  %v2015_v31 = vld [vmem:[#allocation28 + $0x180] sm:$0xff] }
 0x5cf   :  { %3376 = vmatpush1.bf16.msra.mxu0 %v3375_v44  ;;  %3314 = vmatprep.subr.bf16.mxu1 %v3313_v45  ;;  %v1768_v44 = vld [vmem:[#allocation26 + $0x3a8] sm:$0xff]  ;;  %v1766_v45 = vld [vmem:[#allocation26 + $0x398] sm:$0xff] }
 0x5d0   :  { %3378 = vmatprep.subr.bf16.mxu0 %v3377_v49  ;;  %v3333_v49 = vpack.c.bf16 %v1768_v44, %v1764_v43  ;;  %v3397_v53 = vpack.c.bf16 %v1770_v46, %v1766_v45  ;;  %v1987_v43 = vld [vmem:[#allocation28 + $0xa0] sm:$0xff]  ;;  %v1985_v44 = vld [vmem:[#allocation28 + $0x90] sm:$0xff] }
 0x5d1   :  { %v1989_v46 = vld [vmem:[#allocation28 + $0xb0] sm:$0xff]  ;;  %v3415_v51 = vpack.c.bf16 %v1987_v43, %v1983_v42 }
 0x5d2   :  { %3316 = vmatpush1.bf16.msra.mxu1 %v3315_v55  ;;  %v1772_v55 = vld [vmem:[#allocation26 + $0x3c8] sm:$0xff]  ;;  %v3479_v52 = vpack.c.bf16 %v1989_v46, %v1985_v44  ;;  %v2027_v46 = vld [vmem:[#allocation28 + $0x1e0] sm:$0xff] }
 0x5d3   :  { %3380 = vmatpush1.bf16.msra.mxu0 %v3379_v56  ;;  %3318 = vmatprep.subr.bf16.mxu1 %v3317_v57  ;;  %v1776_v56 = vld [vmem:[#allocation26 + $0x3e8] sm:$0xff]  ;;  %v1774_v57 = vld [vmem:[#allocation26 + $0x3d8] sm:$0xff] }
 0x5d4   :  { %3382 = vmatprep.subr.bf16.mxu0 %v3381_v61  ;;  %v3337_v61 = vpack.c.bf16 %v1776_v56, %v1772_v55  ;;  %v3401_v3 = vpack.c.bf16 %v1778_v58, %v1774_v57  ;;  %v1995_v55 = vld [vmem:[#allocation28 + $0xe0] sm:$0xff]  ;;  %v1993_v56 = vld [vmem:[#allocation28 + $0xd0] sm:$0xff]  ;;  %v2000_v58 = vld [vmem:[#allocation28 + $0x108] sm:$0xff] }
 0x5d5   :  { %v3419_v62 = vpack.c.bf16 %v1995_v55, %v1991_v54  ;;  %v4544_v54 = vpop.xlane.xlu0 %2382 }
 0x5d6   :  { %3320 = vmatpush1.bf16.msra.mxu1 %v3319_v5  ;;  %v1968_v5 = vld [vmem:[#allocation28 + $0x8] sm:$0xff]  ;;  %3606 = vrsqrt.f32 %v4544_v54  ;;  %vm2386_vm5 = vcmp.eq.f32.partialorder %v4544_v54, inf  ;;  %vm2388_vm6 = vcmp.eq.f32.partialorder %v4544_v54, 0.0 }
 0x5d7   :  { %3384 = vmatpush1.bf16.msra.mxu0 %v3383_v6  ;;  %3322 = vmatprep.subr.bf16.mxu1 %v3321_v7  ;;  %v1972_v6 = vld [vmem:[#allocation28 + $0x28] sm:$0xff]  ;;  %v1970_v7 = vld [vmem:[#allocation28 + $0x18] sm:$0xff] }
 0x5d8   :  { %3386 = vmatprep.subr.bf16.mxu0 %v3385_v11  ;;  %v3405_v11 = vpack.c.bf16 %v1972_v6, %v1968_v5  ;;  %v3469_v17 = vpack.c.bf16 %v1974_v8, %v1970_v7  ;;  %v2001_v5 = vld [vmem:[#allocation28 + $0x110] sm:$0xff]  ;;  %v2008_v8 = vld [vmem:[#allocation28 + $0x148] sm:$0xff] }
 0x5d9   :  { %v2005_v7 = vld [vmem:[#allocation28 + $0x130] sm:$0xff] }
 0x5da   :  { %3324 = vmatpush1.bf16.msra.mxu1 %v3323_v21  ;;  %v1976_v21 = vld [vmem:[#allocation28 + $0x48] sm:$0xff] }
 0x5db   :  { %3388 = vmatpush1.bf16.msra.mxu0 %v3387_v0  ;;  %3326 = vmatprep.subr.bf16.mxu1 %v3325_v23  ;;  %v1980_v0 = vld [vmem:[#allocation28 + $0x68] sm:$0xff]  ;;  %v3407_v23 = vpack.c.bf16 %v1971_v16, %v1967_v14  ;;  %v3487_v16 = vpack.c.bf16 %v2005_v7, %v2001_v5  ;;  %v2039_v7 = vld [vmem:[#allocation28 + $0x240] sm:$0xff] }
 0x5dc   :  { %3390 = vmatprep.subr.bf16.mxu0 %v3389_v27  ;;  %v1975_v27 = vld [vmem:[#allocation28 + $0x40] sm:$0xff]  ;;  %v3409_v30 = vpack.c.bf16 %v1980_v0, %v1976_v21  ;;  %v2009_v21 = vld [vmem:[#allocation28 + $0x150] sm:$0xff] }
 0x5dd   :  { %v3411_v39 = vpack.c.bf16 %v1979_v28, %v1975_v27  ;;  %v2022_v27 = vld [vmem:[#allocation28 + $0x1b8] sm:$0xff]  ;;  %v3427_v28 = vpack.c.bf16 %v2011_v20, %v2007_v18 }
 0x5de   :  { %3328 = vmatpush1.bf16.msra.mxu1 %v3327_v34  ;;  %v1988_v34 = vld [vmem:[#allocation28 + $0xa8] sm:$0xff]  ;;  %v2054_v18 = vld [vmem:[#allocation28 + $0x2b8] sm:$0xff] }
 0x5df   :  { %3392 = vmatpush1.bf16.msra.mxu0 %v3391_v35  ;;  %3330 = vmatprep.subr.bf16.mxu1 %v3329_v36  ;;  %v3473_v35 = vpack.c.bf16 %v1982_v25, %v1978_v24  ;;  %v1986_v36 = vld [vmem:[#allocation28 + $0x98] sm:$0xff]  ;;  %v2016_v24 = vld [vmem:[#allocation28 + $0x188] sm:$0xff] }
 0x5e0   :  { %3394 = vmatprep.subr.bf16.mxu0 %v3393_v41  ;;  %v3413_v41 = vpack.c.bf16 %v1988_v34, %v1984_v32  ;;  %v3477_v45 = vpack.c.bf16 %v1990_v37, %v1986_v36  ;;  %v2020_v25 = vld [vmem:[#allocation28 + $0x1a8] sm:$0xff]  ;;  %v2019_v32 = vld [vmem:[#allocation28 + $0x1a0] sm:$0xff]  ;;  %v2017_v34 = vld [vmem:[#allocation28 + $0x190] sm:$0xff] }
 0x5e1   :  { %v2021_v36 = vld [vmem:[#allocation28 + $0x1b0] sm:$0xff]  ;;  %v2024_v37 = vld [vmem:[#allocation28 + $0x1c8] sm:$0xff]  ;;  %v3431_v42 = vpack.c.bf16 %v2019_v32, %v2015_v31  ;;  %v2062_v31 = vld [vmem:[#allocation28 + $0x2f8] sm:$0xff] }
 0x5e2   :  { %3332 = vmatpush1.bf16.msra.mxu1 %v3331_v47  ;;  %v1992_v47 = vld [vmem:[#allocation28 + $0xc8] sm:$0xff]  ;;  %v3495_v43 = vpack.c.bf16 %v2021_v36, %v2017_v34  ;;  %v3607_v34 = vpop.eup %3606 }
 0x5e3   :  { %3396 = vmatpush1.bf16.msra.mxu0 %v3395_v48  ;;  %3334 = vmatprep.subr.bf16.mxu1 %v3333_v49  ;;  %v1996_v48 = vld [vmem:[#allocation28 + $0xe8] sm:$0xff]  ;;  %v1994_v49 = vld [vmem:[#allocation28 + $0xd8] sm:$0xff] }
 0x5e4   :  { %3398 = vmatprep.subr.bf16.mxu0 %v3397_v53  ;;  %v3417_v53 = vpack.c.bf16 %v1996_v48, %v1992_v47  ;;  %v3481_v57 = vpack.c.bf16 %v1998_v50, %v1994_v49  ;;  %v2025_v47 = vld [vmem:[#allocation28 + $0x1d0] sm:$0xff]  ;;  %v2032_v50 = vld [vmem:[#allocation28 + $0x208] sm:$0xff] }
 0x5e5   :  { %v2029_v49 = vld [vmem:[#allocation28 + $0x1f0] sm:$0xff] }
 0x5e6   :  { %3336 = vmatpush1.bf16.msra.mxu1 %v3335_v59  ;;  %v2004_v59 = vld [vmem:[#allocation28 + $0x128] sm:$0xff] }
 0x5e7   :  { %3400 = vmatpush1.bf16.msra.mxu0 %v3399_v60  ;;  %3338 = vmatprep.subr.bf16.mxu1 %v3337_v61  ;;  %v2002_v60 = vld [vmem:[#allocation28 + $0x118] sm:$0xff]  ;;  %v3421_v2 = vpack.c.bf16 %v2004_v59, %v2000_v58  ;;  %v2035_v58 = vld [vmem:[#allocation28 + $0x220] sm:$0xff]  ;;  %v2033_v59 = vld [vmem:[#allocation28 + $0x210] sm:$0xff] }
 0x5e8   :  { %3402 = vmatprep.subr.bf16.mxu0 %v3401_v3  ;;  %v2006_v61 = vld [vmem:[#allocation28 + $0x138] sm:$0xff]  ;;  %v1999_v3 = vld [vmem:[#allocation28 + $0x100] sm:$0xff] }
 0x5e9   :  { %v3485_v6 = vpack.c.bf16 %v2006_v61, %v2002_v60  ;;  %v3423_v14 = vpack.c.bf16 %v2003_v4, %v1999_v3  ;;  %v2037_v61 = vld [vmem:[#allocation28 + $0x230] sm:$0xff]  ;;  %v2046_v3 = vld [vmem:[#allocation28 + $0x278] sm:$0xff] }
 0x5ea   :  { %3340 = vmatpush1.bf16.msra.mxu1 %v3339_v9  ;;  %v2012_v9 = vld [vmem:[#allocation28 + $0x168] sm:$0xff]  ;;  %v3503_v5 = vpack.c.bf16 %v2037_v61, %v2033_v59  ;;  %v2078_v59 = vld [vmem:[#allocation28 + $0x378] sm:$0xff] }
 0x5eb   :  { %3404 = vmatpush1.bf16.msra.mxu0 %v3403_v10  ;;  %3406 = vmatprep.subr.bf16.mxu1 %v3405_v11  ;;  %v2010_v10 = vld [vmem:[#allocation28 + $0x158] sm:$0xff] }
 0x5ec   :  { %3470 = vmatprep.subr.bf16.mxu0 %v3469_v17  ;;  %v2014_v11 = vld [vmem:[#allocation28 + $0x178] sm:$0xff]  ;;  %v3425_v17 = vpack.c.bf16 %v2012_v9, %v2008_v8  ;;  %v2043_v8 = vld [vmem:[#allocation28 + $0x260] sm:$0xff]  ;;  %v2041_v9 = vld [vmem:[#allocation28 + $0x250] sm:$0xff] }
 0x5ed   :  { %1866 = vmatmul.mubr.f32.vlgmr.msra.gmra.mrb[10].mxu1 %v4528_v38  ;;  %v3489_v0 = vpack.c.bf16 %v2014_v11, %v2010_v10  ;;  %v2045_v11 = vld [vmem:[#allocation28 + $0x270] sm:$0xff]  ;;  %v3443_v20 = vpack.c.bf16 %v2043_v8, %v2039_v7  ;;  %v2080_v8 = vld [vmem:[#allocation28 + $0x388] sm:$0xff] }
 0x5ee   :  { %1937 = vmatmul.mubr.f32.vlgmr.msra.gmra.mrb[8].mxu0 %v4528_v38  ;;  %3408 = vmatpush1.bf16.msra.mxu1 %v3407_v23  ;;  %v2013_v23 = vld [vmem:[#allocation28 + $0x170] sm:$0xff] }
 0x5ef   :  { %2181 = vmatprep.mubr.f32.mxu1 %v4526_v33  ;;  %3472 = vmatpush1.bf16.msra.mxu0 %v3471_v26  ;;  %v2018_v26 = vld [vmem:[#allocation28 + $0x198] sm:$0xff]  ;;  %v3491_v29 = vpack.c.bf16 %v2013_v23, %v2009_v21  ;;  %v3507_v21 = vpack.c.bf16 %v2045_v11, %v2041_v9  ;;  %v2047_v23 = vld [vmem:[#allocation28 + $0x280] sm:$0xff]  ;;  %v2077_v7 = vld [vmem:[#allocation28 + $0x370] sm:$0xff] }
 0x5f0   :  { %2252 = vmatprep.mubr.f32.mxu0 %v4526_v33  ;;  %3410 = vmatprep.subr.bf16.mxu1 %v3409_v30  ;;  %v1997_v33 = vld [vmem:[#allocation28 + $0xf0] sm:$0xff]  ;;  %v3429_v30 = vpack.c.bf16 %v2020_v25, %v2016_v24  ;;  %v2051_v24 = vld [vmem:[#allocation28 + $0x2a0] sm:$0xff]  ;;  %v2084_v9 = vld [vmem:[#allocation28 + $0x3a8] sm:$0xff] }
 0x5f1   :  { %3474 = vmatprep.subr.bf16.mxu0 %v3473_v35  ;;  %v3483_v63 = vpack.c.bf16 %v1997_v33, %v1993_v56  ;;  %v3493_v35 = vpack.c.bf16 %v2022_v27, %v2018_v26  ;;  %v3499_v56 = vpack.c.bf16 %v2029_v49, %v2025_v47  ;;  %v2031_v33 = vld [vmem:[#allocation28 + $0x200] sm:$0xff]  ;;  %v2049_v25 = vld [vmem:[#allocation28 + $0x290] sm:$0xff]  ;;  %v3447_v32 = vpack.c.bf16 %v2051_v24, %v2047_v23  ;;  %v2082_v11 = vld [vmem:[#allocation28 + $0x398] sm:$0xff] }
 0x5f2   :  { %3412 = vmatpush1.bf16.msra.mxu1 %v3411_v39  ;;  %v2028_v39 = vld [vmem:[#allocation28 + $0x1e8] sm:$0xff]  ;;  %v3439_v4 = vpack.c.bf16 %v2035_v58, %v2031_v33  ;;  %v2053_v27 = vld [vmem:[#allocation28 + $0x2b0] sm:$0xff]  ;;  %v2385_v47 = vmul.f32 %v3607_v34, %v4544_v54  ;;  %v2074_v58 = vld [vmem:[#allocation28 + $0x358] sm:$0xff] }
 0x5f3   :  { %3476 = vmatpush1.bf16.msra.mxu0 %v3475_v40  ;;  %3414 = vmatprep.subr.bf16.mxu1 %v3413_v41  ;;  %v2026_v40 = vld [vmem:[#allocation28 + $0x1d8] sm:$0xff]  ;;  %v3433_v44 = vpack.c.bf16 %v2028_v39, %v2024_v37  ;;  %v2055_v37 = vld [vmem:[#allocation28 + $0x2c0] sm:$0xff]  ;;  %v2076_v33 = vld [vmem:[#allocation28 + $0x368] sm:$0xff] }
 0x5f4   :  { %3478 = vmatprep.subr.bf16.mxu0 %v3477_v45  ;;  %v2030_v41 = vld [vmem:[#allocation28 + $0x1f8] sm:$0xff]  ;;  %v2023_v45 = vld [vmem:[#allocation28 + $0x1c0] sm:$0xff]  ;;  %v2085_v24 = vld [vmem:[#allocation28 + $0x3b0] sm:$0xff] }
 0x5f5   :  { %v3497_v48 = vpack.c.bf16 %v2030_v41, %v2026_v40  ;;  %v3435_v55 = vpack.c.bf16 %v2027_v46, %v2023_v45  ;;  %v2059_v39 = vld [vmem:[#allocation28 + $0x2e0] sm:$0xff]  ;;  %v2057_v40 = vld [vmem:[#allocation28 + $0x2d0] sm:$0xff]  ;;  %v2066_v45 = vld [vmem:[#allocation28 + $0x318] sm:$0xff] }
 0x5f6   :  { %3416 = vmatpush1.bf16.msra.mxu1 %v3415_v51  ;;  %v2036_v51 = vld [vmem:[#allocation28 + $0x228] sm:$0xff]  ;;  %v2070_v46 = vld [vmem:[#allocation28 + $0x338] sm:$0xff]  ;;  %v2091_v34 = vld [vmem:[#allocation28 + $0x3e0] sm:$0xff] }
 0x5f7   :  { %3480 = vmatpush1.bf16.msra.mxu0 %v3479_v52  ;;  %3418 = vmatprep.subr.bf16.mxu1 %v3417_v53  ;;  %v2034_v52 = vld [vmem:[#allocation28 + $0x218] sm:$0xff] }
 0x5f8   :  { %3482 = vmatprep.subr.bf16.mxu0 %v3481_v57  ;;  %v2038_v53 = vld [vmem:[#allocation28 + $0x238] sm:$0xff]  ;;  %v3437_v57 = vpack.c.bf16 %v2036_v51, %v2032_v50  ;;  %v2063_v51 = vld [vmem:[#allocation28 + $0x300] sm:$0xff] }
 0x5f9   :  { %v3501_v60 = vpack.c.bf16 %v2038_v53, %v2034_v52  ;;  %v2067_v52 = vld [vmem:[#allocation28 + $0x320] sm:$0xff]  ;;  %v2065_v53 = vld [vmem:[#allocation28 + $0x310] sm:$0xff] }
 0x5fa   :  { %3420 = vmatpush1.bf16.msra.mxu1 %v3419_v62  ;;  %v2040_v62 = vld [vmem:[#allocation28 + $0x248] sm:$0xff]  ;;  %v3455_v61 = vpack.c.bf16 %v2067_v52, %v2063_v51  ;;  %v4569_v52 = vsub.s32 3, %v4500_v12 }
 0x5fb   :  { %3484 = vmatpush1.bf16.msra.mxu0 %v3483_v63  ;;  %3422 = vmatprep.subr.bf16.mxu1 %v3421_v2  ;;  %v2044_v63 = vld [vmem:[#allocation28 + $0x268] sm:$0xff]  ;;  %v2042_v2 = vld [vmem:[#allocation28 + $0x258] sm:$0xff] }
 0x5fc   :  { %3486 = vmatprep.subr.bf16.mxu0 %v3485_v6  ;;  %v3441_v6 = vpack.c.bf16 %v2044_v63, %v2040_v62  ;;  %v3505_v10 = vpack.c.bf16 %v2046_v3, %v2042_v2  ;;  %v2389_v62 = vand.u32 2147483648, %v4544_v54  ;;  %v2071_v3 = vld [vmem:[#allocation28 + $0x340] sm:$0xff] }
 0x5fd   :  { %v1487_v51 = vld [vmem:[%s4672_s15] sm:$0xf] }
 0x5fe   :  { %3424 = vmatpush1.bf16.msra.mxu1 %v3423_v14  ;;  %v2048_v14 = vld [vmem:[#allocation28 + $0x288] sm:$0xff] }
 0x5ff   :  { %3488 = vmatpush1.bf16.msra.mxu0 %v3487_v16  ;;  %3426 = vmatprep.subr.bf16.mxu1 %v3425_v17  ;;  %v2052_v16 = vld [vmem:[#allocation28 + $0x2a8] sm:$0xff]  ;;  %v2050_v17 = vld [vmem:[#allocation28 + $0x298] sm:$0xff] }
 0x600   :  { %3490 = vmatprep.subr.bf16.mxu0 %v3489_v0  ;;  %v3445_v0 = vpack.c.bf16 %v2052_v16, %v2048_v14  ;;  %v3509_v26 = vpack.c.bf16 %v2054_v18, %v2050_v17  ;;  %v2086_v14 = vld [vmem:[#allocation28 + $0x3b8] sm:$0xff]  ;;  %v3461_v18 = vpack.c.bf16 %v2084_v9, %v2080_v8 }
 0x602   :  { %3428 = vmatpush1.bf16.msra.mxu1 %v3427_v28  ;;  %v2056_v28 = vld [vmem:[#allocation28 + $0x2c8] sm:$0xff] }
 0x603   :  { %3492 = vmatpush1.bf16.msra.mxu0 %v3491_v29  ;;  %3430 = vmatprep.subr.bf16.mxu1 %v3429_v30  ;;  %v2060_v29 = vld [vmem:[#allocation28 + $0x2e8] sm:$0xff]  ;;  %v2058_v30 = vld [vmem:[#allocation28 + $0x2d8] sm:$0xff] }
 0x604   :  { %3494 = vmatprep.subr.bf16.mxu0 %v3493_v35  ;;  %v3511_v35 = vpack.c.bf16 %v2053_v27, %v2049_v25  ;;  %v3449_v36 = vpack.c.bf16 %v2060_v29, %v2056_v28  ;;  %v3513_v41 = vpack.c.bf16 %v2062_v31, %v2058_v30  ;;  %v2088_v25 = vld [vmem:[#allocation28 + $0x3c8] sm:$0xff]  ;;  %v2090_v27 = vld [vmem:[#allocation28 + $0x3d8] sm:$0xff] }
 0x605   :  { %v2094_v28 = vld [vmem:[#allocation28 + $0x3f8] sm:$0xff] }
 0x606   :  { %3432 = vmatpush1.bf16.msra.mxu1 %v3431_v42  ;;  %v2061_v42 = vld [vmem:[#allocation28 + $0x2f0] sm:$0xff] }
 0x607   :  { %3496 = vmatpush1.bf16.msra.mxu0 %v3495_v43  ;;  %3434 = vmatprep.subr.bf16.mxu1 %v3433_v44  ;;  %v2064_v43 = vld [vmem:[#allocation28 + $0x308] sm:$0xff]  ;;  %v3515_v49 = vpack.c.bf16 %v2061_v42, %v2057_v40 }
 0x608   :  { %3498 = vmatprep.subr.bf16.mxu0 %v3497_v48  ;;  %v2068_v44 = vld [vmem:[#allocation28 + $0x328] sm:$0xff]  ;;  %v3451_v48 = vpack.c.bf16 %v2059_v39, %v2055_v37  ;;  %v2093_v37 = vld [vmem:[#allocation28 + $0x3f0] sm:$0xff] }
 0x609   :  { %v3453_v50 = vpack.c.bf16 %v2068_v44, %v2064_v43  ;;  %v2394_v42 = vld [vmem:[#allocation5] sm:$0xff] }
 0x60a   :  { %3436 = vmatpush1.bf16.msra.mxu1 %v3435_v55  ;;  %v3517_v55 = vpack.c.bf16 %v2070_v46, %v2066_v45 }
 0x60b   :  { %3500 = vmatpush1.bf16.msra.mxu0 %v3499_v56  ;;  %3438 = vmatprep.subr.bf16.mxu1 %v3437_v57  ;;  %v2069_v56 = vld [vmem:[#allocation28 + $0x330] sm:$0xff]  ;;  %v2072_v57 = vld [vmem:[#allocation28 + $0x348] sm:$0xff] }
 0x60c   :  { %3502 = vmatprep.subr.bf16.mxu0 %v3501_v60  ;;  %v2387_v60 = vsel %vm2386_vm5, %v4544_v54, %v2385_v47  ;;  %v3519_v63 = vpack.c.bf16 %v2069_v56, %v2065_v53  ;;  %v3457_v2 = vpack.c.bf16 %v2076_v33, %v2072_v57  ;;  %v3525_v54 = vpack.c.bf16 %v2086_v14, %v2082_v11 }
 0x60d   :  { %v1492_v53 = vrot.slane %v1487_v51, %v4503_v13  ;;  %v1496_v57 = vrot.slane %v1487_v51, %v4507_v15  ;;  %v1504_v33 = vrot.slane %v1487_v51, %v4569_v52 }
 0x60e   :  { %3440 = vmatpush1.bf16.msra.mxu1 %v3439_v4  ;;  %v2075_v4 = vld [vmem:[#allocation28 + $0x360] sm:$0xff] }
 0x60f   :  { %3504 = vmatpush1.bf16.msra.mxu0 %v3503_v5  ;;  %3442 = vmatprep.subr.bf16.mxu1 %v3441_v6  ;;  %v2073_v5 = vld [vmem:[#allocation28 + $0x350] sm:$0xff]  ;;  %v3521_v6 = vpack.c.bf16 %v2078_v59, %v2074_v58  ;;  %v3459_v16 = vpack.c.bf16 %v2075_v4, %v2071_v3 }
 0x610   :  { %3506 = vmatprep.subr.bf16.mxu0 %v3505_v10  ;;  %v2390_v10 = vsel %vm2388_vm6, %v2389_v62, %v2387_v60  ;;  %v3523_v17 = vpack.c.bf16 %v2077_v7, %v2073_v5 }
 0x611   :  { %v2391_v23 = vmax.f32 %v2390_v10, 1e-12 }
 0x612   :  { %3444 = vmatpush1.bf16.msra.mxu1 %v3443_v20  ;;  %v2079_v20 = vld [vmem:[#allocation28 + $0x380] sm:$0xff] }
 0x613   :  { %3508 = vmatpush1.bf16.msra.mxu0 %v3507_v21  ;;  %3446 = vmatprep.subr.bf16.mxu1 %v3445_v0  ;;  %v2083_v21 = vld [vmem:[#allocation28 + $0x3a0] sm:$0xff]  ;;  %v2081_v0 = vld [vmem:[#allocation28 + $0x390] sm:$0xff]  ;;  %3608 = vrcp.f32 %v2391_v23 }
 0x614   :  { %3510 = vmatprep.subr.bf16.mxu0 %v3509_v26  ;;  %v2092_v26 = vld [vmem:[#allocation28 + $0x3e8] sm:$0xff]  ;;  %v3463_v29 = vpack.c.bf16 %v2083_v21, %v2079_v20  ;;  %v3527_v30 = vpack.c.bf16 %v2085_v24, %v2081_v0 }
 0x615   :  { %v3465_v31 = vpack.c.bf16 %v2092_v26, %v2088_v25  ;;  %v2281_v25 = vld [vmem:[#allocation11 + $0x10] sm:$0xff] }
 0x616   :  { %3448 = vmatpush1.bf16.msra.mxu1 %v3447_v32  ;;  %v2087_v32 = vld [vmem:[#allocation28 + $0x3c0] sm:$0xff] }
 0x617   :  { %3512 = vmatpush1.bf16.msra.mxu0 %v3511_v35  ;;  %3450 = vmatprep.subr.bf16.mxu1 %v3449_v36  ;;  %v3529_v35 = vpack.c.bf16 %v2094_v28, %v2090_v27  ;;  %v2089_v36 = vld [vmem:[#allocation28 + $0x3d0] sm:$0xff]  ;;  %v3467_v39 = vpack.c.bf16 %v2091_v34, %v2087_v32  ;;  %v2280_v27 = vld [vmem:[#allocation11 + $0x8] sm:$0xff] }
 0x618   :  { %3514 = vmatprep.subr.bf16.mxu0 %v3513_v41  ;;  %v3531_v40 = vpack.c.bf16 %v2093_v37, %v2089_v36 }
 0x61a   :  { %3452 = vmatpush1.bf16.msra.mxu1 %v3451_v48  ;;  %v1187_v48 = vld [vmem:[%s4671_s3] sm:$0xf] }
 0x61b   :  { %3516 = vmatpush1.bf16.msra.mxu0 %v3515_v49  ;;  %3454 = vmatprep.subr.bf16.mxu1 %v3453_v50  ;;  %v1192_v49 = vrot.slane %v1187_v48, %v4503_v13  ;;  %v1196_v58 = vrot.slane %v1187_v48, %v4507_v15  ;;  %v1204_v59 = vrot.slane %v1187_v48, %v4569_v52 }
 0x61c   :  { %3518 = vmatprep.subr.bf16.mxu0 %v3517_v55 }
 0x61d   :  { %v3609_v41 = vpop.eup %3608 }
 0x61e   :  { %3456 = vmatpush1.bf16.msra.mxu1 %v3455_v61  ;;  %v2393_v43 = vmul.f32 %v3609_v41, %v4495_v22 }
 0x61f   :  { %3520 = vmatpush1.bf16.msra.mxu0 %v3519_v63  ;;  %3458 = vmatprep.subr.bf16.mxu1 %v3457_v2 }
 0x620   :  { %3522 = vmatprep.subr.bf16.mxu0 %v3521_v6 }
 0x622   :  { %3460 = vmatpush1.bf16.msra.mxu1 %v3459_v16 }
 0x623   :  { %3524 = vmatpush1.bf16.msra.mxu0 %v3523_v17  ;;  %3462 = vmatprep.subr.bf16.mxu1 %v3461_v18 }
 0x624   :  { %3526 = vmatprep.subr.bf16.mxu0 %v3525_v54  ;;  %v2279_v54 = vld [vmem:[#allocation11] sm:$0xff] }
 0x626   :  { %3464 = vmatpush1.bf16.msra.mxu1 %v3463_v29 }
 0x627   :  { %3528 = vmatpush1.bf16.msra.mxu0 %v3527_v30  ;;  %3466 = vmatprep.subr.bf16.mxu1 %v3465_v31  ;;  %v2282_v30 = vld [vmem:[#allocation11 + $0x18] sm:$0xff] }
 0x628   :  { %3530 = vmatprep.subr.bf16.mxu0 %v3529_v35 }
 0x62a   :  { %3468 = vmatpush1.bf16.msra.mxu1 %v3467_v39 }
 0x62b   :  { %3532 = vmatpush1.bf16.msra.mxu0 %v3531_v40  ;;  %2848 = vmatprep.subr.mxu1 %v4177_v1 }
 0x62c   :  { %2843 = vmatprep.subr.mxu0 %v4177_v1 }
 0x62d   :  { %2182 = vmatmul.mubr.f32.vlgmr.msra.gmra.mrb[12].mxu1 %v4528_v38 }
 0x62e   :  { %2253 = vmatmul.mubr.f32.vlgmr.msra.gmra.mrb[10].mxu0 %v4528_v38  ;;  %2850 = vmatprep.mubr.msk.f32.mxu1 %vm4176_vm0, %v4177_v1  ;;  %v4563_v38 = vsub.s32 2, %v4500_v12 }
 0x62f   :  { %2845 = vmatprep.mubr.msk.f32.mxu0 %vm4176_vm0, %v4177_v1  ;;  %vm651_vm0 = vcmask 0  }
 0x630   :  { %v1200_v50 = vrot.slane %v1187_v48, %v4563_v38  ;;  %v1500_v55 = vrot.slane %v1487_v51, %v4563_v38 }
 0x633   :  { %2849 = vmatpush3.xpose.msra.mxu1 %v2393_v43 }
 0x634   :  { %2844 = vmatpush3.xpose.msra.mxu0 %v2394_v42 }
 0x636   :  { %2851 = vmatmul.mubr.f32.vlgmr.msra.gmra.mrb[14].mxu1 %v2394_v42 }
 0x637   :  { %2846 = vmatmul.mubr.f32.vlgmr.msra.gmra.mrb[12].mxu0 %v2393_v43 }
 0x640   :  { %v1275_v44 = vpop.f32.mrb[6].mxu1  ;;  %v1346_v45 = vpop.f32.mrb[4].mxu0 }
 0x641   :  { %v1277_v46 = vpop.f32.mrb[7].mxu1  ;;  %v1348_v47 = vpop.f32.mrb[5].mxu0  ;;  %v1276_v22 = vadd.f32 %v1275_v44, %v1192_v49  ;;  %v1347_v56 = vadd.f32 %v1346_v45, %v1200_v50  ;;  %v1779_v44 = vld [vmem:[%s4673_s8] sm:$0xf] }
 0x642   :  { %v1278_v7 = vadd.f32 %v1277_v46, %v1196_v58  ;;  %v1349_v10 = vadd.f32 %v1348_v47, %v1204_v59  ;;  %v1784_v45 = vrot.slane %v1779_v44, %v4503_v13  ;;  %v1792_v46 = vrot.slane %v1779_v44, %v4563_v38 }
 0x643   :  { %v1351_v62 = vmul.f32 1.442695, %v1276_v22  ;;  %v1355_v4 = vmul.f32 1.442695, %v1347_v56  ;;  %v1788_v47 = vrot.slane %v1779_v44, %v4507_v15  ;;  %v1796_v48 = vrot.slane %v1779_v44, %v4569_v52 }
 0x644   :  { %v1353_v21 = vmul.f32 1.442695, %v1278_v7  ;;  %v1357_v0 = vmul.f32 1.442695, %v1349_v10  ;;  %v2303_v10 = vld [vmem:[#allocation13] sm:$0xff] }
 0x645   :  { %3610 = vpow2.f32 %v1351_v62 }
 0x646   :  { %3612 = vpow2.f32 %v1355_v4 }
 0x64f   :  { %v3611_v23 = vpop.eup %3610 }
 0x650   :  { %v3613_v24 = vpop.eup %3612 }
 0x680   :  { %v1575_v60 = vpop.f32.mrb[8].mxu1  ;;  %v1646_v61 = vpop.f32.mrb[6].mxu0 }
 0x681   :  { %v1576_v63 = vadd.f32 %v1575_v60, %v1492_v53  ;;  %v1647_v12 = vadd.f32 %v1646_v61, %v1500_v55  ;;  %v1577_v2 = vpop.f32.mrb[9].mxu1  ;;  %v1648_v3 = vpop.f32.mrb[7].mxu0 }
 0x682   :  { %v1578_v5 = vadd.f32 %v1577_v2, %v1496_v57  ;;  %v1649_v6 = vadd.f32 %v1648_v3, %v1504_v33 }
 0x683   :  { %v2283_v8 = vmul.f32 0.5, %v1576_v63  ;;  %v2285_v9 = vmul.f32 0.5, %v1647_v12 }
 0x684   :  { %v2284_v11 = vmul.f32 0.5, %v1578_v5  ;;  %v2286_v14 = vmul.f32 0.5, %v1649_v6 }
 0x685   :  { %v2287_v16 = vmul.f32 1.442695, %v2283_v8  ;;  %v2291_v17 = vmul.f32 1.442695, %v2285_v9 }
 0x686   :  { %v2289_v18 = vmul.f32 1.442695, %v2284_v11  ;;  %v2293_v20 = vmul.f32 1.442695, %v2286_v14  ;;  %v2305_v11 = vld [vmem:[#allocation13 + $0x10] sm:$0xff] }
 0x687   :  { %3614 = vpow2.f32 %v2287_v16  ;;  %v2304_v16 = vld [vmem:[#allocation13 + $0x8] sm:$0xff] }
 0x688   :  { %3616 = vpow2.f32 %v2291_v17 }
 0x689   :  { %3618 = vpow2.f32 %v2289_v18  ;;  %v2306_v18 = vld [vmem:[#allocation13 + $0x18] sm:$0xff] }
 0x68a   :  { %3620 = vpow2.f32 %v2293_v20 }
 0x68b   :  { %3622 = vpow2.f32 %v1353_v21 }
 0x68c   :  { %3624 = vpow2.f32 %v1357_v0 }
 0x691   :  { %v3615_v26 = vpop.eup %3614 }
 0x692   :  { %v3617_v28 = vpop.eup %3616  ;;  %v2295_v29 = vmul.f32 %v3615_v26, %v2279_v54 }
 0x693   :  { %v3619_v31 = vpop.eup %3618  ;;  %v2297_v32 = vmul.f32 %v3617_v28, %v2281_v25 }
 0x694   :  { %v3621_v34 = vpop.eup %3620  ;;  %v2299_v35 = vadd.f32 %v3611_v23, %v2295_v29  ;;  %v2296_v36 = vmul.f32 %v3619_v31, %v2280_v27 }
 0x695   :  { %v3623_v37 = vpop.eup %3622  ;;  %v4577_v39 = vadd.f32 %v3613_v24, %v2297_v32  ;;  %v2298_v40 = vmul.f32 %v3621_v34, %v2282_v30  ;;  %v2095_v34 = vld [vmem:[%s4334_s4] sm:$0xf]  ;;  %s4674_s4 = sld [smem:[#allocation44_spill]] }
 0x696   :  { %v3625_v41 = vpop.eup %3624  ;;  %v2300_v42 = vadd.f32 %v3623_v37, %v2296_v36  ;;  %v2100_v36 = vrot.slane %v2095_v34, %v4503_v13  ;;  %v2108_v37 = vrot.slane %v2095_v34, %v4563_v38 }
 0x697   :  { %v2302_v43 = vadd.f32 %v3625_v41, %v2298_v40  ;;  %v2104_v40 = vrot.slane %v2095_v34, %v4507_v15  ;;  %v2112_v41 = vrot.slane %v2095_v34, %v4569_v52 }
 0x6c0   :  { %v1867_v49 = vpop.f32.mrb[10].mxu1 }
 0x6c1   :  { %v1868_v50 = vadd.f32 %v1867_v49, %v1784_v45  ;;  %v1938_v51 = vpop.f32.mrb[8].mxu0  ;;  %v1869_v22 = vpop.f32.mrb[11].mxu1 }
 0x6c2   :  { %v1939_v53 = vadd.f32 %v1938_v51, %v1792_v46  ;;  %v1870_v55 = vadd.f32 %v1869_v22, %v1788_v47  ;;  %v1940_v56 = vpop.f32.mrb[9].mxu0 }
 0x6c3   :  { %v1943_v57 = vsub.f32 0.0, %v1868_v50  ;;  %v1941_v33 = vadd.f32 %v1940_v56, %v1796_v48 }
 0x6c4   :  { %v1945_v58 = vsub.f32 0.0, %v1939_v53  ;;  %v1944_v59 = vsub.f32 0.0, %v1870_v55 }
 0x6c5   :  { %v1947_v60 = vmul.f32 1.442695, %v1943_v57  ;;  %v1946_v61 = vsub.f32 0.0, %v1941_v33 }
 0x6c6   :  { %v1951_v62 = vmul.f32 1.442695, %v1945_v58  ;;  %v1949_v63 = vmul.f32 1.442695, %v1944_v59  ;;  %v2259_v59 = vld [vmem:[#allocation10] sm:$0xff] }
 0x6c7   :  { %3626 = vpow2.f32 %v1947_v60  ;;  %v1953_v12 = vmul.f32 1.442695, %v1946_v61  ;;  %v2261_v60 = vld [vmem:[#allocation10 + $0x10] sm:$0xff] }
 0x6c8   :  { %3628 = vpow2.f32 %v1951_v62  ;;  %v2260_v62 = vld [vmem:[#allocation10 + $0x8] sm:$0xff] }
 0x6c9   :  { %3630 = vpow2.f32 %v1949_v63 }
 0x6ca   :  { %3632 = vpow2.f32 %v1953_v12 }
 0x6d1   :  { %v3627_v2 = vpop.eup %3626 }
 0x6d2   :  { %v3629_v3 = vpop.eup %3628  ;;  %v1955_v4 = vadd.f32 1.0, %v3627_v2  ;;  %v2262_v2 = vld [vmem:[#allocation10 + $0x18] sm:$0xff] }
 0x6d3   :  { %v3631_v5 = vpop.eup %3630  ;;  %v1957_v6 = vadd.f32 1.0, %v3629_v3 }
 0x6d4   :  { %v3633_v7 = vpop.eup %3632  ;;  %3634 = vrcp.f32 %v1955_v4  ;;  %v1956_v8 = vadd.f32 1.0, %v3631_v5 }
 0x6d5   :  { %3636 = vrcp.f32 %v1957_v6  ;;  %v1958_v9 = vadd.f32 1.0, %v3633_v7 }
 0x6d6   :  { %3638 = vrcp.f32 %v1956_v8 }
 0x6d7   :  { %3640 = vrcp.f32 %v1958_v9 }
 0x6de   :  { %v3635_v14 = vpop.eup %3634 }
 0x6df   :  { %v3637_v17 = vpop.eup %3636  ;;  %vm2307_vm7 = vcmp.lt.f32.partialorder %v2303_v10, %v3635_v14  ;;  %v2335_v10 = vld [vmem:[#allocation7] sm:$0xff] }
 0x6e0   :  { %v3639_v20 = vpop.eup %3638  ;;  %vm2309_vm8 = vcmp.lt.f32.partialorder %v2305_v11, %v3637_v17  ;;  %v2675_v21 = vsel %vm2307_vm7, 1.0, %v4177_v1 }
 0x6e1   :  { %v3641_v0 = vpop.eup %3640  ;;  %vm2308_vm9 = vcmp.lt.f32.partialorder %v2304_v16, %v3639_v20  ;;  %v2323_v23 = vsub.f32 1.0, %v2675_v21  ;;  %v2677_v54 = vsel %vm2309_vm8, 1.0, %v4177_v1  ;;  %v2337_v16 = vld [vmem:[#allocation7 + $0x10] sm:$0xff]  ;;  %v2336_v20 = vld [vmem:[#allocation7 + $0x8] sm:$0xff] }
 0x6e2   :  { %vm2310_vm10 = vcmp.lt.f32.partialorder %v2306_v18, %v3641_v0  ;;  %v2325_v24 = vsub.f32 1.0, %v2677_v54  ;;  %v2676_v25 = vsel %vm2308_vm9, 1.0, %v4177_v1 }
 0x6e3   :  { %v2327_v26 = vmul.f32 %v2323_v23, %v2299_v35  ;;  %v2324_v27 = vsub.f32 1.0, %v2676_v25  ;;  %v2678_v28 = vsel %vm2310_vm10, 1.0, %v4177_v1  ;;  %v2338_v23 = vld [vmem:[#allocation7 + $0x18] sm:$0xff] }
 0x6e4   :  { %v2326_v29 = vsub.f32 1.0, %v2678_v28  ;;  %v2329_v30 = vmul.f32 %v2325_v24, %v4577_v39 }
 0x6e5   :  { %v2328_v31 = vmul.f32 %v2324_v27, %v2300_v42 }
 0x6e6   :  { %v2330_v32 = vmul.f32 %v2326_v29, %v2302_v43 }
 0x700   :  { %v2183_v44 = vpop.f32.mrb[12].mxu1 }
 0x701   :  { %v2184_v45 = vadd.f32 %v2183_v44, %v2100_v36  ;;  %v2254_v35 = vpop.f32.mrb[10].mxu0  ;;  %v2185_v46 = vpop.f32.mrb[13].mxu1 }
 0x702   :  { %v2255_v47 = vadd.f32 %v2254_v35, %v2108_v37  ;;  %v2186_v1 = vadd.f32 %v2185_v46, %v2104_v40  ;;  %v2256_v48 = vpop.f32.mrb[11].mxu0 }
 0x703   :  { %v2263_v49 = vmul.f32 0.5, %v2184_v45  ;;  %v2257_v39 = vadd.f32 %v2256_v48, %v2112_v41 }
 0x704   :  { %v2265_v42 = vmul.f32 0.5, %v2255_v47  ;;  %v2264_v43 = vmul.f32 0.5, %v2186_v1 }
 0x705   :  { %v2267_v50 = vmul.f32 1.442695, %v2263_v49  ;;  %v2266_v51 = vmul.f32 0.5, %v2257_v39 }
 0x706   :  { %v2271_v13 = vmul.f32 1.442695, %v2265_v42  ;;  %v2269_v22 = vmul.f32 1.442695, %v2264_v43 }
 0x707   :  { %3642 = vpow2.f32 %v2267_v50  ;;  %v2273_v38 = vmul.f32 1.442695, %v2266_v51 }
 0x708   :  { %3644 = vpow2.f32 %v2271_v13 }
 0x709   :  { %3646 = vpow2.f32 %v2269_v22  ;;  %v2532_v15 = vpop.f32.mrb[14].mxu1 }
 0x70a   :  { %3648 = vpow2.f32 %v2273_v38  ;;  %v2461_v52 = vpop.f32.mrb[12].mxu0  ;;  %v4594_v53 = vmul.f32 5.0, %v2532_v15  ;;  %v2852_v55 = vpop.f32.mrb[15].mxu1 }
 0x70b   :  { %v4596_v56 = vmul.f32 5.0, %v2461_v52  ;;  %v2847_v57 = vpop.f32.mrb[13].mxu0 }
 0x70c   :  { %v2563_v33 = vsel %vm2538_vm11, %v4594_v53, -inf }
 0x70d   :  { %v2539_v58 = vsel %vm2538_vm11, %v4596_v56, -inf  ;;  %2564 = vmax.xlane.f32.xlu1 %v2563_v33 }
 0x70e   :  { %2540 = vmax.xlane.f32.xlu0 %v2539_v58 }
 0x711   :  { %v3643_v61 = vpop.eup %3642 }
 0x712   :  { %v3645_v63 = vpop.eup %3644  ;;  %v2275_v12 = vmul.f32 %v3643_v61, %v2259_v59 }
 0x713   :  { %v3647_v3 = vpop.eup %3646  ;;  %v2277_v4 = vmul.f32 %v3645_v63, %v2261_v60  ;;  %v2537_v63 = vld [vmem:[%s4674_s4] sm:$0xff] }
 0x714   :  { %v3649_v5 = vpop.eup %3648  ;;  %v2319_v6 = vmul.f32 %v2675_v21, %v2275_v12  ;;  %v2276_v7 = vmul.f32 %v3647_v3, %v2260_v62 }
 0x715   :  { %v2321_v8 = vmul.f32 %v2677_v54, %v2277_v4  ;;  %v2278_v9 = vmul.f32 %v3649_v5, %v2262_v2 }
 0x716   :  { %v2331_v11 = vadd.f32 %v2327_v26, %v2319_v6  ;;  %v2320_v14 = vmul.f32 %v2676_v25, %v2276_v7 }
 0x717   :  { %v2322_v17 = vmul.f32 %v2678_v28, %v2278_v9  ;;  %v2333_v18 = vadd.f32 %v2329_v30, %v2321_v8 }
 0x718   :  { %v2332_v0 = vadd.f32 %v2328_v31, %v2320_v14  ;;  %v2339_v24 = vsub.f32 %v2331_v11, %v2335_v10 }
 0x719   :  { %v2334_v27 = vadd.f32 %v2330_v32, %v2322_v17  ;;  %v2341_v29 = vsub.f32 %v2333_v18, %v2337_v16 }
 0x71a   :  { %v2340_v34 = vsub.f32 %v2332_v0, %v2336_v20  ;;  %v2343_v36 = vand.u32 2147483647, %v2339_v24  ;;  %v2351_v37 = vmul.f32 0.5, %v2339_v24 }
 0x71b   :  { %v2342_v40 = vsub.f32 %v2334_v27, %v2338_v23  ;;  %v2345_v21 = vand.u32 2147483647, %v2341_v29  ;;  %v2353_v41 = vmul.f32 0.5, %v2341_v29 }
 0x71c   :  { %v2344_v54 = vand.u32 2147483647, %v2340_v34  ;;  %v2352_v44 = vmul.f32 0.5, %v2340_v34  ;;  %v2355_v45 = vmul.f32 %v2351_v37, %v2339_v24  ;;  %vm2347_vm12 = vcmp.lt.f32.partialorder %v2343_v36, 1.0 }
 0x71d   :  { %v2346_v26 = vand.u32 2147483647, %v2342_v40  ;;  %v2354_v25 = vmul.f32 0.5, %v2342_v40  ;;  %v2357_v28 = vmul.f32 %v2353_v41, %v2341_v29  ;;  %v2679_v31 = vadd.f32 -0.5, %v2343_v36 }
 0x71e   :  { %vm2348_vm13 = vcmp.lt.f32.partialorder %v2344_v54, 1.0  ;;  %v2356_v30 = vmul.f32 %v2352_v44, %v2340_v34  ;;  %v2680_v35 = vadd.f32 -0.5, %v2344_v54  ;;  %vm2349_vm14 = vcmp.lt.f32.partialorder %v2345_v21, 1.0 }
 0x71f   :  { %v2681_v32 = vadd.f32 -0.5, %v2345_v21  ;;  %v2358_v46 = vmul.f32 %v2354_v25, %v2342_v40  ;;  %v2682_v47 = vadd.f32 -0.5, %v2346_v26  ;;  %v2363_v1 = vsel %vm2347_vm12, %v2355_v45, %v2679_v31 }
 0x720   :  { %v2364_v48 = vsel %vm2348_vm13, %v2356_v30, %v2680_v35  ;;  %vm2350_vm15 = vcmp.lt.f32.partialorder %v2346_v26, 1.0 }
 0x721   :  { %v2367_v49 = vadd.f32 %v2364_v48, %v2363_v1  ;;  %v2365_v39 = vsel %vm2349_vm14, %v2357_v28, %v2681_v32  ;;  %v2366_v43 = vsel %vm2350_vm15, %v2358_v46, %v2682_v47 }
 0x723   :  { %v2368_v42 = vadd.f32 %v2367_v49, %v2365_v39 }
 0x725   :  { %v2369_v50 = vadd.f32 %v2368_v42, %v2366_v43 }
 0x79a   :  { %v2565_v51 = vpop.xlane.xlu1 %2564 }
 0x79b   :  { %v2541_v13 = vpop.xlane.xlu0 %2540  ;;  %v2566_v22 = vsub.f32 %v4594_v53, %v2565_v51 }
 0x79c   :  { %v2542_v38 = vsub.f32 %v4596_v56, %v2541_v13 }
 0x79d   :  { %v2567_v15 = vmul.f32 1.442695, %v2566_v22 }
 0x79e   :  { %v2543_v52 = vmul.f32 1.442695, %v2542_v38 }
 0x79f   :  { %3650 = vpow2.f32 %v2567_v15 }
 0x7a0   :  { %3652 = vpow2.f32 %v2543_v52 }
 0x7a9   :  { %v3651_v55 = vpop.eup %3650 }
 0x7aa   :  { %v3653_v57 = vpop.eup %3652  ;;  %v2569_v33 = vsel %vm2538_vm11, %v3651_v55, 0.0 }
 0x7ab   :  { %v2545_v58 = vsel %vm2538_vm11, %v3653_v57, 0.0  ;;  %2570 = vadd.xlane.f32.xlu0 %v2569_v33 }
 0x7ac   :  { %2546 = vadd.xlane.f32.xlu1 %v2545_v58 }
 0x838   :  { %v2571_v59 = vpop.xlane.xlu0 %2570 }
 0x839   :  { %3654 = vlog2.f32 %v2571_v59  ;;  %v2547_v60 = vpop.xlane.xlu1 %2546 }
 0x83a   :  { %3656 = vlog2.f32 %v2547_v60 }
 0x843   :  { %v3655_v53 = vpop.eup %3654 }
 0x844   :  { %v3657_v61 = vpop.eup %3656  ;;  %v2573_v56 = vmul.f32 0.6931472, %v3655_v53 }
 0x845   :  { %v2549_v62 = vmul.f32 0.6931472, %v3657_v61 }
 0x846   :  { %v2574_v12 = vsub.f32 %v2566_v22, %v2573_v56 }
 0x847   :  { %v2550_v2 = vsub.f32 %v2542_v38, %v2549_v62 }
 0x848   :  { %v2575_v3 = vmul.f32 %v2574_v12, %v2537_v63 }
 0x849   :  { %v2551_v4 = vmul.f32 %v2550_v2, %v2537_v63 }
 0x84a   :  { %v2576_v5 = vsel %vm2538_vm11, %v2575_v3, 0.0 }
 0x84b   :  { %2577 = vadd.xlane.f32.xlu0 %v2576_v5  ;;  %v2552_v6 = vsel %vm2538_vm11, %v2551_v4, 0.0 }
 0x84c   :  { %2553 = vadd.xlane.f32.xlu1 %v2552_v6 }
 0x84f   :  { %2370 = vadd.xlane.f32.xlu0 %v2369_v50 }
 0x850   :  { %640 = vadd.xlane.f32.xlu1 %v4493_v19 }
 0x8d8   :  { %v2578_v7 = vpop.xlane.xlu0 %2577 }
 0x8d9   :  { %v2579_v8 = vsub.f32 0.0, %v2578_v7  ;;  %v2554_v9 = vpop.xlane.xlu1 %2553 }
 0x8da   :  { %v2555_v10 = vsub.f32 0.0, %v2554_v9 }
 0x8db   :  { %v2580_v11 = vrot.slane %v2579_v8, 4 }
 0x8dc   :  { %v2556_v14 = vrot.slane %v2555_v10, 4  ;;  %v2371_v16 = vpop.xlane.xlu0 %2370 }
 0x8dd   :  { %v2581_v17 = vadd.f32 %v2580_v11, %v2579_v8  ;;  %v641_v18 = vpop.xlane.xlu1 %640  ;;  %v2372_v20 = vrot.slane %v2371_v16, 4 }
 0x8de   :  { %v2557_v0 = vadd.f32 %v2556_v14, %v2555_v10  ;;  %v642_v23 = vmul.f32 -0.001, %v641_v18 }
 0x8df   :  { %v2582_v24 = vrot.slane %v2581_v17, 2  ;;  %v2373_v27 = vadd.f32 %v2372_v20, %v2371_v16 }
 0x8e0   :  { %v2558_v29 = vrot.slane %v2557_v0, 2  ;;  %v643_v34 = vrot.slane %v642_v23, 4 }
 0x8e1   :  { %v2583_v36 = vadd.f32 %v2582_v24, %v2581_v17  ;;  %v2374_v37 = vrot.slane %v2373_v27, 2 }
 0x8e2   :  { %v2559_v40 = vadd.f32 %v2558_v29, %v2557_v0  ;;  %v644_v19 = vadd.f32 %v643_v34, %v642_v23 }
 0x8e3   :  { %v2584_v21 = vrot.slane %v2583_v36, 1  ;;  %v2375_v41 = vadd.f32 %v2374_v37, %v2373_v27 }
 0x8e4   :  { %v2560_v54 = vrot.slane %v2559_v40, 1  ;;  %v645_v44 = vrot.slane %v644_v19, 2 }
 0x8e5   :  { %v2585_v45 = vadd.f32 %v2584_v21, %v2583_v36  ;;  %v2376_v26 = vrot.slane %v2375_v41, 1 }
 0x8e6   :  { %v2561_v25 = vadd.f32 %v2560_v54, %v2559_v40  ;;  %v646_v28 = vadd.f32 %v645_v44, %v644_v19 }
 0x8e7   :  { %v2586_v30 = vmul.f32 0.125, %v2585_v45  ;;  %v2377_v31 = vadd.f32 %v2376_v26, %v2375_v41 }
 0x8e8   :  { %v2562_v35 = vmul.f32 0.125, %v2561_v25  ;;  %v647_v32 = vrot.slane %v646_v28, 1 }
 0x8e9   :  { %v2379_v46 = vmul.f32 0.00024414063, %v2377_v31 }
 0x8ea   :  { %v648_v47 = vadd.f32 %v647_v32, %v646_v28  ;;  %v2587_v1 = vadd.f32 %v2586_v30, %v2562_v35 }
 0x8eb   :  { %2380 = vst.msk [vmem:[#allocation30] sm:$0x1] %vm651_vm0, %v2379_v46 }
 0x8ec   :  { %v650_v48 = vmul.f32 0.125, %v648_v47 }
 0x8ed   :  { %4043 = shalt.err (!%p4040_p0)
}
 0x8ee   :  { %s4044_s1 = scalar_lea.hbm %s4344_s20, 16 }
 0x8ef   :  { %p4045_p1 = scmp.ne.s32.totalorder %s4344_s20, %s4044_s1  ;;  %p4048_p2 = scmp.lt.u32.totalorder %s4044_s1, %s4344_s20 }
 0x8f1   :  { %p4050_p3 = pnand %p4048_p2, %p4045_p1 }
 0x8f3   :  { %4053 = shalt.err (!%p4050_p3)
}
 0x8f4   :  { %2609 = dma.vmem_to_hbm [thread:$0]  %s2607_s16, 16, %s4344_s20, [#allocation31]   ;;  %v2588_v49 = vmul.f32 0.5, %v2587_v1  ;;  %652 = vst.msk [vmem:[#allocation32] sm:$0x1] %vm651_vm0, %v650_v48 }
 0x8f5   :  { %s4054_s29 = scalar_lea.vmem %s4611_s14, 16  ;;  %s4058_s26 = scalar_lea.vmem %s4611_s14, 32 }
 0x8f6   :  { %2589 = vst.msk [vmem:[#allocation29] sm:$0x1] %vm651_vm0, %v2588_v49  ;;  %p4055_p4 = scmp.ne.s32.totalorder %s4611_s14, %s4054_s29  ;;  %p4059_p5 = scmp.lt.s32.totalorder %s4611_s14, %s4611_s14 }
 0x8f7   :  { %p4060_p6 = scmp.lt.s32.totalorder %s4058_s26, %s4054_s29 }
 0x8f9   :  { %p4061_p7 = por %p4060_p6, %p4059_p5 }
 0x8fb   :  { %p4062_p8 = pnand %p4061_p7, %p4055_p4 }
 0x8fd   :  { %4065 = shalt.err (!%p4062_p8)
}
 0x8fe   :  { %s4066_s20 = scalar_lea.hbm %s4339_s17, 16 }
 0x8ff   :  { %p4067_p9 = scmp.ne.s32.totalorder %s4339_s17, %s4066_s20  ;;  %p4070_p10 = scmp.lt.u32.totalorder %s4066_s20, %s4339_s17 }
 0x901   :  { %p4072_p11 = pnand %p4070_p10, %p4067_p9 }
 0x903   :  { %4075 = shalt.err (!%p4072_p11)
}
 0x904   :  { %2599 = dma.vmem_to_hbm [thread:$0]  %s4611_s14, 16, %s4339_s17, [#allocation4]  }
 0x905   :  { %s4076_s28 = scalar_lea.vmem %s4617_s23, 16  ;;  %s4080_s13 = scalar_lea.vmem %s4617_s23, 32 }
 0x906   :  { %p4077_p12 = scmp.ne.s32.totalorder %s4617_s23, %s4076_s28  ;;  %p4081_p13 = scmp.lt.s32.totalorder %s4617_s23, %s4617_s23 }
 0x907   :  { %p4082_p0 = scmp.lt.s32.totalorder %s4080_s13, %s4076_s28 }
 0x909   :  { %p4083_p1 = por %p4082_p0, %p4081_p13 }
 0x90b   :  { %p4084_p2 = pnand %p4083_p1, %p4077_p12 }
 0x90d   :  { %4087 = shalt.err (!%p4084_p2)
}
 0x90e   :  { %s4088_s18 = scalar_lea.hbm %s4349_s27, 16 }
 0x90f   :  { %p4089_p3 = scmp.ne.s32.totalorder %s4349_s27, %s4088_s18  ;;  %p4092_p4 = scmp.lt.u32.totalorder %s4088_s18, %s4349_s27 }
 0x911   :  { %p4094_p5 = pnand %p4092_p4, %p4089_p3 }
 0x913   :  { %4097 = shalt.err (!%p4094_p5)
}
 0x914   :  { %2619 = dma.vmem_to_hbm [thread:$0]  %s4617_s23, 16, %s4349_s27, [#allocation31]  }
 0x915   :  { %4116 = dma.done.wait [#allocation4], 16  }
 0x916   :  { %4117 = vsyncadd [#allocation4], 4294967280 }
 0x917   :  { %4118 = dma.done.wait [#allocation31], 32  }
 0x918   :  { %4119 = vsyncadd [#allocation31], 4294967264 }
 0x919   :  { %2629 = vsyncpa [#allocation3], 1 }
 0x91a   :  { %2630 = vsyncpa [#allocation6], 1 }
 0x91b   :  { %2631 = vsyncpa [#allocation9], 1 }
 0x91c   :  { %2632 = vsyncpa [#allocation12], 1 }
 0x91d   :  { %2633 = vsyncpa [#allocation15], 1 }
 0x91e   :  { %2634 = vsyncpa [#allocation18], 1 }
 0x91f   :  { %2635 = vsyncpa [#allocation21], 1 }
 0x920   :  { %2636 = vsyncpa [#allocation24], 1 }
 0x921   :  { %2637 = vsyncpa [#allocation27], 1 }
 0x922   :  { %2638 = vsyncpa [#allocation4], 1 }
 0x923   :  { %2639 = vsyncpa [#allocation31], 1 }

</bundles_post_ra>
